<compile_context>
chip_gen: v5e
topology: v5e:2x2
jax: 0.10.0
libtpu: 0.0.40
codegen_flags: <defaults>
</compile_context>

<pallas_src>
import functools

import jax
import jax.numpy as jnp
from jax import lax
from jax.experimental import pallas as pl
from jax.experimental.pallas import tpu as pltpu


def _lane_tile(a, reps):
    """Tile a small array along its last (lane) axis via lane concatenation."""
    return jnp.concatenate([a] * reps, axis=-1)


def _dham_kernel(gxy_ref, lin_ref, ydiff_ref, kmod_ref, img_ref, fm_ref,
                 roi_ref, par_ref, *, Yo, Xo, Yi, Xi, Ci, scale_factor):
    # Block shapes:
    #   gxy_ref   (2, S)            constant coordinate grids (gx, gy), S = Yf*Xf
    #   lin_ref   (2, LP)           constant output-coord lines (ylin, xlin), LP=max(Yo,Xo)
    #   ydiff_ref (Bt, Bt*Yi)       constant: col - b*Yi   (block-diag-in-Bt y one-hot)
    #   kmod_ref  (Ci*Xi, Ci*Xo)    constant: k - (j//Xo)*Xi (block-diag-in-Ci x one-hot)
    #   img_ref   (Bt, Yi, Ci*Xi)   bf16 packed image
    #   fm_ref    (Bt, C, S)        f32 flattened feature map
    #   roi_ref   (Bt, C*Yo, Ci*Xo) f32
    #   par_ref   (Bt, C, 3)        f32  (mean_x, mean_y, scale)
    Bt, C, S = fm_ref.shape
    K = Ci * Xi
    J = Ci * Xo
    BtYi = ydiff_ref.shape[1]

    fm = fm_ref[...]                                   # (Bt, C, S)
    gxy = gxy_ref[...]                                 # (2, S)
    gx = gxy[0:1, :][None]                             # (1, 1, S)
    gy = gxy[1:2, :][None]                             # (1, 1, S)

    # ---- softmax moments with DEFERRED normalization (divide only (Bt,C,1)) ----
    m = jnp.max(fm, axis=-1, keepdims=True)
    e = jnp.exp(fm - m)                                # (Bt, C, S)
    inv_z = 1.0 / jnp.sum(e, axis=-1, keepdims=True)   # exact f32 divide (param tol 1e-4)
    mean_x = jnp.sum(e * gx, axis=-1, keepdims=True) * inv_z     # (Bt, C, 1)
    mean_y = jnp.sum(e * gy, axis=-1, keepdims=True) * inv_z
    dx = gx - mean_x
    dy = gy - mean_y
    scale = (jnp.sum(jnp.sqrt(dx * dx + dy * dy) * e, axis=-1, keepdims=True)
             * inv_z) * scale_factor                   # (Bt, C, 1)

    # single combined param store (one output ref, one writeback DMA)
    par_ref[...] = jnp.concatenate([mean_x, mean_y, scale], axis=-1).astype(par_ref.dtype)

    # ---- ROI fractional coordinates (separable: y per output row, x per col) ----
    lin = lin_ref[...]                                 # (2, LP)
    ylin = lin[0:1, :Yo][None]                         # (1, 1, Yo)
    xlin = lin[1:2, :Xo][None]                         # (1, 1, Xo)
    y_ind = ylin * scale + mean_y                      # (Bt, C, Yo)
    x_ind = xlin * scale + mean_x                      # (Bt, C, Xo)

    y_raw = jnp.clip((y_ind + 1.0) * (Yi / 2.0), 0.0, Yi - 1.0)
    x_raw = jnp.clip((x_ind + 1.0) * (Xi / 2.0), 0.0, Xi - 1.0)
    y_u = jnp.clip(jnp.ceil(y_raw), 0.0, Yi - 1.0)
    y_l = jnp.clip(jnp.floor(y_raw), 0.0, Yi - 1.0)
    x_u = jnp.clip(jnp.ceil(x_raw), 0.0, Xi - 1.0)
    x_l = jnp.clip(jnp.floor(x_raw), 0.0, Xi - 1.0)

    # ---- step 1: y-interp folded over Bt into ONE matmul ----
    # wy[(b,c,yo), (b',yi)] = [b'==b] * bilinear y-weight; degenerate corners -> 0
    # (same clamp semantics as the torch reference).
    ydiff = ydiff_ref[...][:, None, None, :]           # (Bt, 1, 1, Bt*Yi) int32
    wy = ((ydiff == y_u.astype(jnp.int32)[..., None]).astype(jnp.float32)
          * (y_raw - y_l)[..., None]
          + (ydiff == y_l.astype(jnp.int32)[..., None]).astype(jnp.float32)
          * (y_u - y_raw)[..., None])                  # (Bt, C, Yo, Bt*Yi)
    # layout-trivial reshape (Yo multiple of 8; lane dim unchanged)
    wy2 = wy.reshape(Bt * C * Yo, BtYi).astype(jnp.bfloat16)
    img2 = img_ref[...].reshape(Bt * Yi, K)            # bf16, trivial reshape
    tmp = jnp.dot(wy2, img2, preferred_element_type=jnp.float32)   # (Bt*C*Yo, Ci*Xi)

    # ---- step 2: x-interp via block-diagonal-in-Ci one-hot weight (per (b,c)) ----
    kmod = kmod_ref[...][None, None]                   # (1, 1, K, J) int32
    x_u_t = _lane_tile(x_u.astype(jnp.int32), Ci)[:, :, None, :]   # (Bt, C, 1, J)
    x_l_t = _lane_tile(x_l.astype(jnp.int32), Ci)[:, :, None, :]
    w_u_t = _lane_tile(x_raw - x_l, Ci)[:, :, None, :]             # (Bt, C, 1, J)
    w_l_t = _lane_tile(x_u - x_raw, Ci)[:, :, None, :]
    rx = ((kmod == x_u_t).astype(jnp.float32) * w_u_t
          + (kmod == x_l_t).astype(jnp.float32) * w_l_t).astype(jnp.bfloat16)  # (Bt,C,K,J)

    tmp_g = tmp.reshape(Bt * C, Yo, K).astype(jnp.bfloat16)        # trivial reshape
    rx_g = rx.reshape(Bt * C, K, J)
    res = jnp.einsum("gyk,gkj->gyj", tmp_g, rx_g,
                     preferred_element_type=jnp.float32)           # (Bt*C, Yo, Ci*Xo)

    # single dense 3-D store (no per-Ci masked stores)
    roi_ref[...] = res.reshape(Bt, C * Yo, J).astype(roi_ref.dtype)


def _choose_block_b(B, Yi, requested=None):
    """Per-generation batch tiling: grid=1 on single-TC chips, grid>=2 on 2-TC chips."""
    if requested is not None and requested > 0 and B % requested == 0:
        return requested
    try:
        kind = jax.devices()[0].device_kind.lower()
    except Exception:
        kind = ""
    two_tc = ("v4" in kind) or ("v7" in kind) or ("7x" in kind)
    divisors = [d for d in range(1, B + 1) if B % d == 0]
    # keep the folded y-interp contraction depth (Bt*Yi) bounded / near MXU depth
    fitting = [d for d in divisors if d * Yi <= 512] or [1]
    bt = max(fitting)
    if two_tc and bt == B and B % 2 == 0 and B > 1:
        bt = B // 2     # keep >= 2 "parallel" grid steps so both TensorCores get work
    return bt


def dham_forward(images, feature_map, output_size, scale_factor=1.0, block_b=None):
    B, Ci, Yi, Xi = images.shape
    B2, C, Yf, Xf = feature_map.shape
    assert B == B2
    Yo, Xo = output_size
    Bt = _choose_block_b(B, Yi, block_b)
    S = Yf * Xf
    K = Ci * Xi
    J = Ci * Xo
    LP = max(Yo, Xo)

    # Layout prep (cheap XLA ops, outside the kernel):
    img_packed = jnp.transpose(images, (0, 2, 1, 3)).reshape(B, Yi, K).astype(jnp.bfloat16)
    fm_flat = feature_map.reshape(B, C, S).astype(jnp.float32)

    # Hoisted loop-invariant constants (index_map always returns block 0):
    gxv = jnp.linspace(-1.0, 1.0, Xf, dtype=jnp.float32)
    gyv = jnp.linspace(-1.0, 1.0, Yf, dtype=jnp.float32)
    gxg, gyg = jnp.meshgrid(gxv, gyv)                   # each (Yf, Xf)
    gxy = jnp.stack([gxg.reshape(S), gyg.reshape(S)], axis=0)        # (2, S)

    lin = jnp.zeros((2, LP), jnp.float32)
    lin = lin.at[0, :Yo].set(jnp.linspace(-1.0, 1.0, Yo, dtype=jnp.float32))
    lin = lin.at[1, :Xo].set(jnp.linspace(-1.0, 1.0, Xo, dtype=jnp.float32))

    # block-diagonal-in-Bt y one-hot target map: ydiff[b, j] = j - b*Yi
    ydiff = (jnp.arange(Bt * Yi, dtype=jnp.int32)[None, :]
             - (jnp.arange(Bt, dtype=jnp.int32) * Yi)[:, None])      # (Bt, Bt*Yi)

    # block-diagonal-in-Ci x one-hot target map: kmod[k, j] = k - (j//Xo)*Xi
    kk = jnp.arange(K, dtype=jnp.int32)[:, None]
    jj = jnp.arange(J, dtype=jnp.int32)[None, :]
    kmod = kk - (jj // Xo) * Xi                                      # (K, J)

    kernel = functools.partial(_dham_kernel, Yo=Yo, Xo=Xo, Yi=Yi, Xi=Xi, Ci=Ci,
                               scale_factor=scale_factor)

    roi_flat, params = pl.pallas_call(
        kernel,
        out_shape=(jax.ShapeDtypeStruct((B, C * Yo, J), jnp.float32),
                   jax.ShapeDtypeStruct((B, C, 3), jnp.float32)),
        grid=(B // Bt,),
        in_specs=[pl.BlockSpec((2, S), lambda g: (0, 0)),
                  pl.BlockSpec((2, LP), lambda g: (0, 0)),
                  pl.BlockSpec((Bt, Bt * Yi), lambda g: (0, 0)),
                  pl.BlockSpec((K, J), lambda g: (0, 0)),
                  pl.BlockSpec((Bt, Yi, K), lambda g: (g, 0, 0)),
                  pl.BlockSpec((Bt, C, S), lambda g: (g, 0, 0))],
        out_specs=(pl.BlockSpec((Bt, C * Yo, J), lambda g: (g, 0, 0)),
                   pl.BlockSpec((Bt, C, 3), lambda g: (g, 0, 0))),
        compiler_params=pltpu.CompilerParams(dimension_semantics=("parallel",)),
    )(gxy, lin, ydiff, kmod, img_packed, fm_flat)

    # TODO(synk): a consumer that accepts (B, C, Yo, Ci, Xo) directly would skip
    # this extra XLA transpose (one full HBM round-trip of the ROI tensor).
    roi = roi_flat.reshape(B, C, Yo, Ci, Xo).transpose(0, 3, 1, 2, 4)   # (B, Ci, C, Yo, Xo)
    mx, my, sc = params[:, :, 0], params[:, :, 1], params[:, :, 2]
    return roi, (mx, my, sc)


def dham_reference(images, feature_map, output_size, scale_factor=1.0):
    """Pure-JAX reference mirroring the PyTorch forward (for a sanity check)."""
    B, Ci, Yi, Xi = images.shape
    _, C, Yf, Xf = feature_map.shape
    Yo, Xo = output_size
    gx = jnp.linspace(-1.0, 1.0, Xf)
    gy = jnp.linspace(-1.0, 1.0, Yf)
    sm = jax.nn.softmax(feature_map.reshape(B, C, -1), axis=-1).reshape(B, C, Yf, Xf)
    mean_x = (sm.sum(-2) * gx[None, None]).sum(-1)
    mean_y = (sm.sum(-1) * gy[None, None]).sum(-1)
    dx = gx[None, None, None, :] - mean_x[..., None, None]
    dy = gy[None, None, :, None] - mean_y[..., None, None]
    scale = (jnp.sqrt(dx ** 2 + dy ** 2) * sm).sum((-1, -2)) * scale_factor
    ylin = jnp.linspace(-1.0, 1.0, Yo)
    xlin = jnp.linspace(-1.0, 1.0, Xo)
    y_ind = jnp.broadcast_to(ylin[None, None, :, None] * scale[..., None, None]
                             + mean_y[..., None, None], (B, C, Yo, Xo))
    x_ind = jnp.broadcast_to(xlin[None, None, None, :] * scale[..., None, None]
                             + mean_x[..., None, None], (B, C, Yo, Xo))
    y_raw = jnp.clip((y_ind + 1.0) * (Yi / 2.0), 0.0, Yi - 1.0)
    x_raw = jnp.clip((x_ind + 1.0) * (Xi / 2.0), 0.0, Xi - 1.0)
    y_u = jnp.clip(jnp.ceil(y_raw), 0.0, Yi - 1.0)
    y_l = jnp.clip(jnp.floor(y_raw), 0.0, Yi - 1.0)
    x_u = jnp.clip(jnp.ceil(x_raw), 0.0, Xi - 1.0)
    x_l = jnp.clip(jnp.floor(x_raw), 0.0, Xi - 1.0)

    bidx = jnp.arange(B)[:, None, None, None, None]
    cidx = jnp.arange(Ci)[None, :, None, None, None]

    def gather(yi, xi):
        return images[bidx, cidx,
                      yi[:, None].astype(jnp.int32),
                      xi[:, None].astype(jnp.int32)]

    w_uu = ((x_raw - x_l) * (y_raw - y_l))[:, None]
    w_ul = ((x_u - x_raw) * (y_raw - y_l))[:, None]
    w_lu = ((x_raw - x_l) * (y_u - y_raw))[:, None]
    w_ll = ((x_u - x_raw) * (y_u - y_raw))[:, None]
    out = (gather(y_u, x_u) * w_uu + gather(y_u, x_l) * w_ul
           + gather(y_l, x_u) * w_lu + gather(y_l, x_l) * w_ll)
    return out, (mean_x, mean_y, scale)


if __name__ == "__main__":
    key = jax.random.PRNGKey(0)
    k1, k2 = jax.random.split(key)
    B, Ci, C = 4, 3, 4          # batch, image channels, attention (feature) channels
    Yi = Xi = 16                # image spatial dims
    Yf = Xf = 16                # feature-map spatial dims
    output_size = (8, 8)        # Dham(output_size)

    images = jax.random.normal(k1, (B, Ci, Yi, Xi), dtype=jnp.float32)
    feature_map = jax.random.normal(k2, (B, C, Yf, Xf), dtype=jnp.float32)

    out, (mx, my, sc) = dham_forward(images, feature_map, output_size)
    jax.block_until_ready(out)

    ref_out, (rmx, rmy, rsc) = dham_reference(images, feature_map, output_size)
    assert out.shape == (B, Ci, C, output_size[0], output_size[1])
    # ROI is computed with bf16 MXU matmuls (f32 accumulate) -> looser tolerance.
    assert jnp.allclose(out, ref_out, atol=5e-2, rtol=5e-2), float(jnp.max(jnp.abs(out - ref_out)))
    # params are computed fully in f32 (no matmul, exact divides) -> tight tolerance.
    assert jnp.allclose(mx, rmx, atol=1e-4)
    assert jnp.allclose(my, rmy, atol=1e-4)
    assert jnp.allclose(sc, rsc, atol=1e-4)

    print("KERNEL_OK")
</pallas_src>

<mosaic_0001>
module attributes {stable_mosaic.version = 11 : i64} {
  func.func @_dham_kernel(%arg0: i32, %arg1: memref<2x256xf32, #tpu.memory_space<vmem>>, %arg2: memref<2x8xf32, #tpu.memory_space<vmem>>, %arg3: memref<4x64xi32, #tpu.memory_space<vmem>>, %arg4: memref<48x24xi32, #tpu.memory_space<vmem>>, %arg5: memref<4x16x48xbf16, #tpu.memory_space<vmem>>, %arg6: memref<4x4x256xf32, #tpu.memory_space<vmem>>, %arg7: memref<4x32x24xf32, #tpu.memory_space<vmem>>, %arg8: memref<4x4x3xf32, #tpu.memory_space<vmem>>) attributes {dimension_semantics = [#tpu.dimension_semantics<parallel>], iteration_bounds = array<i64: 1>, scalar_prefetch = 0 : i64, scratch_operands = 0 : i64, tpu.core_type = #tpu.core_type<tc>, window_params = [{pipeline_mode = #tpu.pipeline_mode<synchronous>, transform_indices = @transform_0, window_bounds = array<i64: 2, 256>}, {pipeline_mode = #tpu.pipeline_mode<synchronous>, transform_indices = @transform_1, window_bounds = array<i64: 2, 8>}, {pipeline_mode = #tpu.pipeline_mode<synchronous>, transform_indices = @transform_2, window_bounds = array<i64: 4, 64>}, {pipeline_mode = #tpu.pipeline_mode<synchronous>, transform_indices = @transform_3, window_bounds = array<i64: 48, 24>}, {transform_indices = @transform_4, window_bounds = array<i64: 4, 16, 48>}, {transform_indices = @transform_5, window_bounds = array<i64: 4, 4, 256>}, {transform_indices = @transform_6, window_bounds = array<i64: 4, 32, 24>}, {transform_indices = @transform_7, window_bounds = array<i64: 4, 4, 3>}]} {
    %c0 = arith.constant 0 : index
    %c0_0 = arith.constant 0 : index
    %c0_1 = arith.constant 0 : index
    %0 = vector.load %arg6[%c0, %c0_0, %c0_1] : memref<4x4x256xf32, #tpu.memory_space<vmem>>, vector<4x4x256xf32>
    %c0_2 = arith.constant 0 : index
    %c0_3 = arith.constant 0 : index
    %1 = vector.load %arg1[%c0_2, %c0_3] : memref<2x256xf32, #tpu.memory_space<vmem>>, vector<2x256xf32>
    %2 = vector.extract_strided_slice %1 {offsets = [0, 0], sizes = [1, 256], strides = [1, 1]} : vector<2x256xf32> to vector<1x256xf32>
    %3 = vector.shape_cast %2 : vector<1x256xf32> to vector<1x1x256xf32>
    %4 = vector.extract_strided_slice %1 {offsets = [1, 0], sizes = [1, 256], strides = [1, 1]} : vector<2x256xf32> to vector<1x256xf32>
    %5 = vector.shape_cast %4 : vector<1x256xf32> to vector<1x1x256xf32>
    %cst = arith.constant dense<0xFF800000> : vector<4x4xf32>
    %6 = vector.multi_reduction <maximumf>, %0, %cst [2] : vector<4x4x256xf32> to vector<4x4xf32>
    %7 = vector.shape_cast %6 : vector<4x4xf32> to vector<4x4x1xf32>
    %8 = vector.broadcast %7 : vector<4x4x1xf32> to vector<4x4x256xf32>
    %9 = arith.subf %0, %8 : vector<4x4x256xf32>
    %10 = math.exp %9 : vector<4x4x256xf32>
    %cst_4 = arith.constant dense<0.000000e+00> : vector<4x4xf32>
    %11 = vector.multi_reduction <add>, %10, %cst_4 [2] : vector<4x4x256xf32> to vector<4x4xf32>
    %12 = vector.shape_cast %11 : vector<4x4xf32> to vector<4x4x1xf32>
    %cst_5 = arith.constant 1.000000e+00 : f32
    %13 = vector.broadcast %cst_5 : f32 to vector<4x4x1xf32>
    %14 = arith.divf %13, %12 : vector<4x4x1xf32>
    %15 = vector.broadcast %3 : vector<1x1x256xf32> to vector<4x4x256xf32>
    %16 = arith.mulf %10, %15 : vector<4x4x256xf32>
    %cst_6 = arith.constant dense<0.000000e+00> : vector<4x4xf32>
    %17 = vector.multi_reduction <add>, %16, %cst_6 [2] : vector<4x4x256xf32> to vector<4x4xf32>
    %18 = vector.shape_cast %17 : vector<4x4xf32> to vector<4x4x1xf32>
    %19 = arith.mulf %18, %14 : vector<4x4x1xf32>
    %20 = vector.broadcast %5 : vector<1x1x256xf32> to vector<4x4x256xf32>
    %21 = arith.mulf %10, %20 : vector<4x4x256xf32>
    %cst_7 = arith.constant dense<0.000000e+00> : vector<4x4xf32>
    %22 = vector.multi_reduction <add>, %21, %cst_7 [2] : vector<4x4x256xf32> to vector<4x4xf32>
    %23 = vector.shape_cast %22 : vector<4x4xf32> to vector<4x4x1xf32>
    %24 = arith.mulf %23, %14 : vector<4x4x1xf32>
    %25 = vector.broadcast %3 : vector<1x1x256xf32> to vector<4x4x256xf32>
    %26 = vector.broadcast %19 : vector<4x4x1xf32> to vector<4x4x256xf32>
    %27 = arith.subf %25, %26 : vector<4x4x256xf32>
    %28 = vector.broadcast %5 : vector<1x1x256xf32> to vector<4x4x256xf32>
    %29 = vector.broadcast %24 : vector<4x4x1xf32> to vector<4x4x256xf32>
    %30 = arith.subf %28, %29 : vector<4x4x256xf32>
    %31 = arith.mulf %27, %27 : vector<4x4x256xf32>
    %32 = arith.mulf %30, %30 : vector<4x4x256xf32>
    %33 = arith.addf %31, %32 : vector<4x4x256xf32>
    %34 = math.sqrt %33 : vector<4x4x256xf32>
    %35 = arith.mulf %34, %10 : vector<4x4x256xf32>
    %cst_8 = arith.constant dense<0.000000e+00> : vector<4x4xf32>
    %36 = vector.multi_reduction <add>, %35, %cst_8 [2] : vector<4x4x256xf32> to vector<4x4xf32>
    %37 = vector.shape_cast %36 : vector<4x4xf32> to vector<4x4x1xf32>
    %38 = arith.mulf %37, %14 : vector<4x4x1xf32>
    %cst_9 = arith.constant 1.000000e+00 : f32
    %39 = vector.broadcast %cst_9 : f32 to vector<4x4x1xf32>
    %40 = arith.mulf %38, %39 : vector<4x4x1xf32>
    %41 = tpu.concatenate %19, %24, %40 in 2 : vector<4x4x1xf32>, vector<4x4x1xf32>, vector<4x4x1xf32> -> vector<4x4x3xf32>
    %c0_10 = arith.constant 0 : index
    %c0_11 = arith.constant 0 : index
    %c0_12 = arith.constant 0 : index
    %42 = vector.load %arg8[%c0_10, %c0_11, %c0_12] : memref<4x4x3xf32, #tpu.memory_space<vmem>>, vector<4x4x3xf32>
    tpu.vector_store %arg8[%c0_10, %c0_11, %c0_12], %41 {strides = array<i32>} : memref<4x4x3xf32, #tpu.memory_space<vmem>>, vector<4x4x3xf32>,
    %c0_13 = arith.constant 0 : index
    %c0_14 = arith.constant 0 : index
    %43 = vector.load %arg2[%c0_13, %c0_14] : memref<2x8xf32, #tpu.memory_space<vmem>>, vector<2x8xf32>
    %44 = vector.extract_strided_slice %43 {offsets = [0, 0], sizes = [1, 8], strides = [1, 1]} : vector<2x8xf32> to vector<1x8xf32>
    %45 = vector.shape_cast %44 : vector<1x8xf32> to vector<1x1x8xf32>
    %46 = vector.extract_strided_slice %43 {offsets = [1, 0], sizes = [1, 8], strides = [1, 1]} : vector<2x8xf32> to vector<1x8xf32>
    %47 = vector.shape_cast %46 : vector<1x8xf32> to vector<1x1x8xf32>
    %48 = vector.broadcast %45 : vector<1x1x8xf32> to vector<4x4x8xf32>
    %49 = vector.broadcast %40 : vector<4x4x1xf32> to vector<4x4x8xf32>
    %50 = arith.mulf %48, %49 : vector<4x4x8xf32>
    %51 = vector.broadcast %24 : vector<4x4x1xf32> to vector<4x4x8xf32>
    %52 = arith.addf %50, %51 : vector<4x4x8xf32>
    %53 = vector.broadcast %47 : vector<1x1x8xf32> to vector<4x4x8xf32>
    %54 = vector.broadcast %40 : vector<4x4x1xf32> to vector<4x4x8xf32>
    %55 = arith.mulf %53, %54 : vector<4x4x8xf32>
    %56 = vector.broadcast %19 : vector<4x4x1xf32> to vector<4x4x8xf32>
    %57 = arith.addf %55, %56 : vector<4x4x8xf32>
    %cst_15 = arith.constant 1.000000e+00 : f32
    %58 = vector.broadcast %cst_15 : f32 to vector<4x4x8xf32>
    %59 = arith.addf %52, %58 : vector<4x4x8xf32>
    %cst_16 = arith.constant 8.000000e+00 : f32
    %60 = vector.broadcast %cst_16 : f32 to vector<4x4x8xf32>
    %61 = arith.mulf %59, %60 : vector<4x4x8xf32>
    %cst_17 = arith.constant 0.000000e+00 : f32
    %cst_18 = arith.constant 1.500000e+01 : f32
    %62 = vector.broadcast %cst_17 : f32 to vector<4x4x8xf32>
    %63 = arith.maximumf %62, %61 : vector<4x4x8xf32>
    %64 = vector.broadcast %cst_18 : f32 to vector<4x4x8xf32>
    %65 = arith.minimumf %64, %63 : vector<4x4x8xf32>
    %cst_19 = arith.constant 1.000000e+00 : f32
    %66 = vector.broadcast %cst_19 : f32 to vector<4x4x8xf32>
    %67 = arith.addf %57, %66 : vector<4x4x8xf32>
    %cst_20 = arith.constant 8.000000e+00 : f32
    %68 = vector.broadcast %cst_20 : f32 to vector<4x4x8xf32>
    %69 = arith.mulf %67, %68 : vector<4x4x8xf32>
    %cst_21 = arith.constant 0.000000e+00 : f32
    %cst_22 = arith.constant 1.500000e+01 : f32
    %70 = vector.broadcast %cst_21 : f32 to vector<4x4x8xf32>
    %71 = arith.maximumf %70, %69 : vector<4x4x8xf32>
    %72 = vector.broadcast %cst_22 : f32 to vector<4x4x8xf32>
    %73 = arith.minimumf %72, %71 : vector<4x4x8xf32>
    %74 = math.ceil %65 : vector<4x4x8xf32>
    %cst_23 = arith.constant 0.000000e+00 : f32
    %cst_24 = arith.constant 1.500000e+01 : f32
    %75 = vector.broadcast %cst_23 : f32 to vector<4x4x8xf32>
    %76 = arith.maximumf %75, %74 : vector<4x4x8xf32>
    %77 = vector.broadcast %cst_24 : f32 to vector<4x4x8xf32>
    %78 = arith.minimumf %77, %76 : vector<4x4x8xf32>
    %79 = math.floor %65 : vector<4x4x8xf32>
    %cst_25 = arith.constant 0.000000e+00 : f32
    %cst_26 = arith.constant 1.500000e+01 : f32
    %80 = vector.broadcast %cst_25 : f32 to vector<4x4x8xf32>
    %81 = arith.maximumf %80, %79 : vector<4x4x8xf32>
    %82 = vector.broadcast %cst_26 : f32 to vector<4x4x8xf32>
    %83 = arith.minimumf %82, %81 : vector<4x4x8xf32>
    %84 = math.ceil %73 : vector<4x4x8xf32>
    %cst_27 = arith.constant 0.000000e+00 : f32
    %cst_28 = arith.constant 1.500000e+01 : f32
    %85 = vector.broadcast %cst_27 : f32 to vector<4x4x8xf32>
    %86 = arith.maximumf %85, %84 : vector<4x4x8xf32>
    %87 = vector.broadcast %cst_28 : f32 to vector<4x4x8xf32>
    %88 = arith.minimumf %87, %86 : vector<4x4x8xf32>
    %89 = math.floor %73 : vector<4x4x8xf32>
    %cst_29 = arith.constant 0.000000e+00 : f32
    %cst_30 = arith.constant 1.500000e+01 : f32
    %90 = vector.broadcast %cst_29 : f32 to vector<4x4x8xf32>
    %91 = arith.maximumf %90, %89 : vector<4x4x8xf32>
    %92 = vector.broadcast %cst_30 : f32 to vector<4x4x8xf32>
    %93 = arith.minimumf %92, %91 : vector<4x4x8xf32>
    %c0_31 = arith.constant 0 : index
    %c0_32 = arith.constant 0 : index
    %94 = vector.load %arg3[%c0_31, %c0_32] : memref<4x64xi32, #tpu.memory_space<vmem>>, vector<4x64xi32>
    %95 = vector.shape_cast %94 : vector<4x64xi32> to vector<4x1x1x64xi32>
    %96 = arith.fptosi %78 : vector<4x4x8xf32> to vector<4x4x8xi32>
    %97 = vector.shape_cast %96 : vector<4x4x8xi32> to vector<4x4x8x1xi32>
    %98 = vector.broadcast %95 : vector<4x1x1x64xi32> to vector<4x4x8x64xi32>
    %99 = vector.broadcast %97 : vector<4x4x8x1xi32> to vector<4x4x8x64xi32>
    %100 = arith.cmpi eq, %98, %99 : vector<4x4x8x64xi32>
    %101 = arith.extui %100 : vector<4x4x8x64xi1> to vector<4x4x8x64xi32>
    %102 = arith.sitofp %101 : vector<4x4x8x64xi32> to vector<4x4x8x64xf32>
    %103 = arith.subf %65, %83 : vector<4x4x8xf32>
    %104 = vector.shape_cast %103 : vector<4x4x8xf32> to vector<4x4x8x1xf32>
    %105 = vector.broadcast %104 : vector<4x4x8x1xf32> to vector<4x4x8x64xf32>
    %106 = arith.mulf %102, %105 : vector<4x4x8x64xf32>
    %107 = arith.fptosi %83 : vector<4x4x8xf32> to vector<4x4x8xi32>
    %108 = vector.shape_cast %107 : vector<4x4x8xi32> to vector<4x4x8x1xi32>
    %109 = vector.broadcast %95 : vector<4x1x1x64xi32> to vector<4x4x8x64xi32>
    %110 = vector.broadcast %108 : vector<4x4x8x1xi32> to vector<4x4x8x64xi32>
    %111 = arith.cmpi eq, %109, %110 : vector<4x4x8x64xi32>
    %112 = arith.extui %111 : vector<4x4x8x64xi1> to vector<4x4x8x64xi32>
    %113 = arith.sitofp %112 : vector<4x4x8x64xi32> to vector<4x4x8x64xf32>
    %114 = arith.subf %78, %65 : vector<4x4x8xf32>
    %115 = vector.shape_cast %114 : vector<4x4x8xf32> to vector<4x4x8x1xf32>
    %116 = vector.broadcast %115 : vector<4x4x8x1xf32> to vector<4x4x8x64xf32>
    %117 = arith.mulf %113, %116 : vector<4x4x8x64xf32>
    %118 = arith.addf %106, %117 : vector<4x4x8x64xf32>
    %119 = vector.shape_cast %118 : vector<4x4x8x64xf32> to vector<128x64xf32>
    %120 = arith.truncf %119 : vector<128x64xf32> to vector<128x64xbf16>
    %c0_33 = arith.constant 0 : index
    %c0_34 = arith.constant 0 : index
    %c0_35 = arith.constant 0 : index
    %121 = vector.load %arg5[%c0_33, %c0_34, %c0_35] : memref<4x16x48xbf16, #tpu.memory_space<vmem>>, vector<4x16x48xbf16>
    %122 = vector.shape_cast %121 : vector<4x16x48xbf16> to vector<64x48xbf16>
    %cst_36 = arith.constant dense<0.000000e+00> : vector<128x48xf32>
    %123 = tpu.matmul %120, %122, %cst_36 {dimension_numbers = #tpu.dot_dimension_numbers<[1], [0], [0], [1], [0, 0, 1, 1], [], []>} : vector<128x64xbf16>, vector<64x48xbf16>, vector<128x48xf32> -> vector<128x48xf32>
    %c0_37 = arith.constant 0 : index
    %c0_38 = arith.constant 0 : index
    %124 = vector.load %arg4[%c0_37, %c0_38] : memref<48x24xi32, #tpu.memory_space<vmem>>, vector<48x24xi32>
    %125 = vector.shape_cast %124 : vector<48x24xi32> to vector<1x1x48x24xi32>
    %126 = arith.fptosi %88 : vector<4x4x8xf32> to vector<4x4x8xi32>
    %127 = tpu.concatenate %126, %126, %126 in 2 : vector<4x4x8xi32>, vector<4x4x8xi32>, vector<4x4x8xi32> -> vector<4x4x24xi32>
    %128 = vector.shape_cast %127 : vector<4x4x24xi32> to vector<4x4x1x24xi32>
    %129 = arith.fptosi %93 : vector<4x4x8xf32> to vector<4x4x8xi32>
    %130 = tpu.concatenate %129, %129, %129 in 2 : vector<4x4x8xi32>, vector<4x4x8xi32>, vector<4x4x8xi32> -> vector<4x4x24xi32>
    %131 = vector.shape_cast %130 : vector<4x4x24xi32> to vector<4x4x1x24xi32>
    %132 = arith.subf %73, %93 : vector<4x4x8xf32>
    %133 = tpu.concatenate %132, %132, %132 in 2 : vector<4x4x8xf32>, vector<4x4x8xf32>, vector<4x4x8xf32> -> vector<4x4x24xf32>
    %134 = vector.shape_cast %133 : vector<4x4x24xf32> to vector<4x4x1x24xf32>
    %135 = arith.subf %88, %73 : vector<4x4x8xf32>
    %136 = tpu.concatenate %135, %135, %135 in 2 : vector<4x4x8xf32>, vector<4x4x8xf32>, vector<4x4x8xf32> -> vector<4x4x24xf32>
    %137 = vector.shape_cast %136 : vector<4x4x24xf32> to vector<4x4x1x24xf32>
    %138 = vector.broadcast %125 : vector<1x1x48x24xi32> to vector<4x4x48x24xi32>
    %139 = vector.broadcast %128 : vector<4x4x1x24xi32> to vector<4x4x48x24xi32>
    %140 = arith.cmpi eq, %138, %139 : vector<4x4x48x24xi32>
    %141 = arith.extui %140 : vector<4x4x48x24xi1> to vector<4x4x48x24xi32>
    %142 = arith.sitofp %141 : vector<4x4x48x24xi32> to vector<4x4x48x24xf32>
    %143 = vector.broadcast %134 : vector<4x4x1x24xf32> to vector<4x4x48x24xf32>
    %144 = arith.mulf %142, %143 : vector<4x4x48x24xf32>
    %145 = vector.broadcast %125 : vector<1x1x48x24xi32> to vector<4x4x48x24xi32>
    %146 = vector.broadcast %131 : vector<4x4x1x24xi32> to vector<4x4x48x24xi32>
    %147 = arith.cmpi eq, %145, %146 : vector<4x4x48x24xi32>
    %148 = arith.extui %147 : vector<4x4x48x24xi1> to vector<4x4x48x24xi32>
    %149 = arith.sitofp %148 : vector<4x4x48x24xi32> to vector<4x4x48x24xf32>
    %150 = vector.broadcast %137 : vector<4x4x1x24xf32> to vector<4x4x48x24xf32>
    %151 = arith.mulf %149, %150 : vector<4x4x48x24xf32>
    %152 = arith.addf %144, %151 : vector<4x4x48x24xf32>
    %153 = arith.truncf %152 : vector<4x4x48x24xf32> to vector<4x4x48x24xbf16>
    %154 = vector.shape_cast %123 : vector<128x48xf32> to vector<16x8x48xf32>
    %155 = arith.truncf %154 : vector<16x8x48xf32> to vector<16x8x48xbf16>
    %156 = vector.shape_cast %153 : vector<4x4x48x24xbf16> to vector<16x48x24xbf16>
    "tpu.trace_start"() <{level = 10 : i32, message = "gyk,gkj->gyj"}> : () -> ()
    %cst_39 = arith.constant dense<0.000000e+00> : vector<16x8x24xf32>
    %157 = tpu.matmul %155, %156, %cst_39 {dimension_numbers = #tpu.dot_dimension_numbers<[2], [1], [1], [2], [0, 0, 0, 1, 1, 2], [0], [0]>} : vector<16x8x48xbf16>, vector<16x48x24xbf16>, vector<16x8x24xf32> -> vector<16x8x24xf32>
    "tpu.trace_stop"() : () -> ()
    %158 = vector.shape_cast %157 : vector<16x8x24xf32> to vector<4x32x24xf32>
    %c0_40 = arith.constant 0 : index
    %c0_41 = arith.constant 0 : index
    %c0_42 = arith.constant 0 : index
    %159 = vector.load %arg7[%c0_40, %c0_41, %c0_42] : memref<4x32x24xf32, #tpu.memory_space<vmem>>, vector<4x32x24xf32>
    tpu.vector_store %arg7[%c0_40, %c0_41, %c0_42], %158 {strides = array<i32>} : memref<4x32x24xf32, #tpu.memory_space<vmem>>, vector<4x32x24xf32>,
    return
  }
  func.func @transform_0(%arg0: i32) -> (i32, i32) {
    %c0_i32 = arith.constant 0 : i32
    %c0_i32_0 = arith.constant 0 : i32
    %c0_i32_1 = arith.constant 0 : i32
    return %c0_i32, %c0_i32_0 : i32, i32
  }
  func.func @transform_1(%arg0: i32) -> (i32, i32) {
    %c0_i32 = arith.constant 0 : i32
    %c0_i32_0 = arith.constant 0 : i32
    %c0_i32_1 = arith.constant 0 : i32
    return %c0_i32, %c0_i32_0 : i32, i32
  }
  func.func @transform_2(%arg0: i32) -> (i32, i32) {
    %c0_i32 = arith.constant 0 : i32
    %c0_i32_0 = arith.constant 0 : i32
    %c0_i32_1 = arith.constant 0 : i32
    return %c0_i32, %c0_i32_0 : i32, i32
  }
  func.func @transform_3(%arg0: i32) -> (i32, i32) {
    %c0_i32 = arith.constant 0 : i32
    %c0_i32_0 = arith.constant 0 : i32
    %c0_i32_1 = arith.constant 0 : i32
    return %c0_i32, %c0_i32_0 : i32, i32
  }
  func.func @transform_4(%arg0: i32) -> (i32, i32, i32) {
    %c0_i32 = arith.constant 0 : i32
    %c0_i32_0 = arith.constant 0 : i32
    %c0_i32_1 = arith.constant 0 : i32
    return %arg0, %c0_i32, %c0_i32_0 : i32, i32, i32
  }
  func.func @transform_5(%arg0: i32) -> (i32, i32, i32) {
    %c0_i32 = arith.constant 0 : i32
    %c0_i32_0 = arith.constant 0 : i32
    %c0_i32_1 = arith.constant 0 : i32
    return %arg0, %c0_i32, %c0_i32_0 : i32, i32, i32
  }
  func.func @transform_6(%arg0: i32) -> (i32, i32, i32) {
    %c0_i32 = arith.constant 0 : i32
    %c0_i32_0 = arith.constant 0 : i32
    %c0_i32_1 = arith.constant 0 : i32
    return %arg0, %c0_i32, %c0_i32_0 : i32, i32, i32
  }
  func.func @transform_7(%arg0: i32) -> (i32, i32, i32) {
    %c0_i32 = arith.constant 0 : i32
    %c0_i32_0 = arith.constant 0 : i32
    %c0_i32_1 = arith.constant 0 : i32
    return %arg0, %c0_i32, %c0_i32_0 : i32, i32, i32
  }
}

</mosaic_0001>

<bundles_post_ra>
// kernel: tpu_custom_call.1
= control target key start
LH: loop header
LB: loop body
LE: loop exit
PB: predicated region body
PF: predicated region fallthrough
CT: control target
= control target key end

     0   :  { %13 = vsyncpa [#allocation3], 0  ;;  %s3631_s27 = smov [#allocation2]   ;;  %s5572_s0 = inlined_call_operand.vmem [shape: f32[2,256], index: 0, kind: input, shape index: {}]   ;;  %s5573_s1 = inlined_call_operand.hbm [shape: f32[2,8], index: 1, kind: input, shape index: {}]   ;;  %s5574_s2 = inlined_call_operand.vmem [shape: s32[4,64], index: 2, kind: input, shape index: {}]   ;;  %s5575_s3 = inlined_call_operand.vmem [shape: s32[48,24], index: 3, kind: input, shape index: {}]   ;;  %s5576_s4 = inlined_call_operand.vmem [shape: bf16[4,16,48], index: 4, kind: input, shape index: {}]   ;;  %s5577_s5 = inlined_call_operand.vmem [shape: f32[4,4,256], index: 5, kind: input, shape index: {}]   ;;  %s5578_s6 = inlined_call_operand.vmem [shape: f32[4,32,24], index: 6, kind: output, shape index: {0}]   ;;  %s5579_s7 = inlined_call_operand.vmem [shape: f32[4,4,3], index: 7, kind: output, shape index: {1}]  }
   0x1   :  { %s21_s26 = sshll.u32 %s5573_s1, 4  ;;  %s23_s28 = sshll.u32 %s3631_s27, 4  ;;  %s22_s26 = int_to_ptr.hbm [resolvable:$true] %s21_s26  ;;  %s24_s28 = int_to_ptr.vmem [resolvable:$true] %s23_s28 }
   0x2   :  { %26 = dma.hbm_to_vmem [thread:$0]  %s22_s26, 32, %s24_s28, [#allocation3]  }
   0x3   :  { %3629 = dma.done.wait [#allocation3], 32  }
   0x4   :  { %3630 = vsyncadd [#allocation3], 4294967264  ;;  %v42_v0 = vld [vmem:[%s5577_s5 + $0x10] sm:$0xff]  ;;  %v40_v1 = vld [vmem:[%s5577_s5] sm:$0xff]  ;;  %vm72_vm0 = vcmask 1043456   ;;  %s3635_s29 = smov 16  }
   0x5   :  { %v41_v2 = vld [vmem:[%s5577_s5 + $0x8] sm:$0xff]  ;;  %57 = vst [vmem:[#allocation1 + $0x20] ss:$2 sm:$0xff] %v42_v0  ;;  %v3691_v3 = vld [vmem:[%s5577_s5 + $0x18] sm:$0xff]  ;;  %v3632_v24 = vmov 839922192  }
   0x6   :  { %49 = vst [vmem:[#allocation1] ss:$2 sm:$0xff] %v40_v1  ;;  %v98_v25 = vunpack.c.l.s4 %v3632_v24  ;;  %v44_v29 = vld [vmem:[%s5572_s0] sm:$0xf] }
   0x7   :  { %53 = vst [vmem:[#allocation1 + $0x10] ss:$2 sm:$0xff] %v41_v2  ;;  %v238_v33 = vperm.slane %v44_v29, 2  ;;  %v237_v37 = vperm.slane %v44_v29, 0  ;;  %v304_v41 = vperm.slane %v44_v29, 3  ;;  %v303_v48 = vperm.slane %v44_v29, 1 }
   0x8   :  { %61 = vst [vmem:[#allocation1 + $0x30] ss:$2 sm:$0xff] %v3691_v3  ;;  %v99_v26 = vunpack.c.0.s8 %v98_v25 }
   0x9   :  { %v3705_v38 = vperm.slane %v238_v33, 0  ;;  %v3709_v43 = vperm.slane %v237_v37, 0  ;;  %v3715_v49 = vperm.slane %v304_v41, 1  ;;  %v3721_v54 = vperm.slane %v303_v48, 1 }
   0xb   :  { %v245_v44 = vrot.slane %v3705_v38, 4  ;;  %v311_v55 = vrot.slane %v3715_v49, 4 }
   0xc   :  { %v58_v4 = vld.sshfl [vmem:[#allocation1 + $0x20] sm:$0xff pattern:$0x75316420]  ;;  %v59_v5 = vld.sshfl [vmem:[#allocation1 + $0x28] sm:$0xff pattern:$0x75316420] }
   0xd   :  { %v83_v6 = vsel %vm72_vm0, %v58_v4, -inf  ;;  %v84_v7 = vsel %vm72_vm0, %v59_v5, -inf  ;;  %v50_v8 = vld.sshfl [vmem:[#allocation1] sm:$0xff pattern:$0x75316420]  ;;  %v246_v50 = vsel %vm72_vm0, %v3709_v43, %v245_v44 }
   0xe   :  { %v85_v9 = vmax.f32 %v83_v6, %v84_v7  ;;  %v51_v10 = vld.sshfl [vmem:[#allocation1 + $0x8] sm:$0xff pattern:$0x75316420]  ;;  %v73_v11 = vsel %vm72_vm0, %v50_v8, -inf }
   0xf   :  { %v74_v12 = vsel %vm72_vm0, %v51_v10, -inf  ;;  %v54_v14 = vld.sshfl [vmem:[#allocation1 + $0x10] sm:$0xff pattern:$0x75316420] }
  0x10   :  { %86 = vmax.xlane.f32.xlu1 %v85_v9  ;;  %v75_v13 = vmax.f32 %v73_v11, %v74_v12  ;;  %v55_v15 = vld.sshfl [vmem:[#allocation1 + $0x18] sm:$0xff pattern:$0x75316420]  ;;  %v78_v16 = vsel %vm72_vm0, %v54_v14, -inf }
  0x11   :  { %v79_v17 = vsel %vm72_vm0, %v55_v15, -inf  ;;  %v62_v19 = vld.sshfl [vmem:[#allocation1 + $0x30] sm:$0xff pattern:$0x75316420] }
  0x12   :  { %76 = vmax.xlane.f32.xlu0 %v75_v13  ;;  %v80_v18 = vmax.f32 %v78_v16, %v79_v17  ;;  %v63_v20 = vld.sshfl [vmem:[#allocation1 + $0x38] sm:$0xff pattern:$0x75316420]  ;;  %v88_v21 = vsel %vm72_vm0, %v62_v19, -inf }
  0x13   :  { %v89_v22 = vsel %vm72_vm0, %v63_v20, -inf }
  0x14   :  { %v90_v23 = vmax.f32 %v88_v21, %v89_v22 }
  0x1a   :  { %81 = vmax.xlane.f32.xlu0 %v80_v18 }
  0x22   :  { %91 = vmax.xlane.f32.xlu0 %v90_v23 }
  0x83   :  { %v87_v27 = vpop.xlane.xlu1 %86 }
  0x84   :  { %v108_v28 = vperm.slane %v87_v27, %v99_v26 }
  0x85   :  { %v77_v30 = vpop.xlane.xlu0 %76 }
  0x86   :  { %v119_v31 = vsub.f32 %v42_v0, %v108_v28  ;;  %v100_v32 = vperm.slane %v77_v30, %v99_v26 }
  0x88   :  { %v125_v34 = vmul.f32 1.442695, %v119_v31  ;;  %v117_v35 = vsub.f32 %v40_v1, %v100_v32  ;;  %v312_v1 = vsel %vm72_vm0, %v3721_v54, %v311_v55 }
  0x8a   :  { %3563 = vpow2.f32 %v125_v34  ;;  %v121_v36 = vmul.f32 1.442695, %v117_v35 }
  0x8c   :  { %3565 = vpow2.f32 %v121_v36 }
  0x8d   :  { %v82_v39 = vpop.xlane.xlu0 %81 }
  0x8e   :  { %v104_v40 = vperm.slane %v82_v39, %v99_v26 }
  0x90   :  { %v3707_v42 = vpop.eup %3563  ;;  %v118_v45 = vsub.f32 %v41_v2, %v104_v40 }
  0x91   :  { %141 = vst [vmem:[#allocation1 + $0x20] ss:$2 sm:$0xff] %v3707_v42  ;;  %v250_v51 = vmul.f32 %v3707_v42, %v246_v50 }
  0x92   :  { %v3713_v46 = vpop.eup %3565  ;;  %v123_v47 = vmul.f32 1.442695, %v118_v45 }
  0x93   :  { %133 = vst [vmem:[#allocation1] ss:$2 sm:$0xff] %v3713_v46  ;;  %v248_v60 = vmul.f32 %v3713_v46, %v246_v50  ;;  %v314_v13 = vmul.f32 %v3713_v46, %v312_v1 }
  0x94   :  { %3567 = vpow2.f32 %v123_v47 }
  0x95   :  { %v92_v52 = vpop.xlane.xlu0 %91 }
  0x96   :  { %v112_v53 = vperm.slane %v92_v52, %v99_v26 }
  0x98   :  { %v120_v56 = vsub.f32 %v3691_v3, %v112_v53  ;;  %v142_v57 = vld.sshfl [vmem:[#allocation1 + $0x20] sm:$0xff pattern:$0x75316420]  ;;  %v143_v58 = vld.sshfl [vmem:[#allocation1 + $0x28] sm:$0xff pattern:$0x75316420]  ;;  %v316_v3 = vmul.f32 %v3707_v42, %v312_v1 }
  0x99   :  { %264 = vst [vmem:[#allocation1 + $0x20] ss:$2 sm:$0xff] %v250_v51  ;;  %v166_v24 = vsel %vm72_vm0, %v142_v57, 0.0  ;;  %v167_v25 = vsel %vm72_vm0, %v143_v58, 0.0 }
  0x9a   :  { %v3725_v59 = vpop.eup %3567  ;;  %v127_v61 = vmul.f32 1.442695, %v120_v56  ;;  %v134_v62 = vld.sshfl [vmem:[#allocation1] sm:$0xff pattern:$0x75316420]  ;;  %v168_v30 = vadd.f32 %v167_v25, %v166_v24 }
  0x9b   :  { %137 = vst [vmem:[#allocation1 + $0x10] ss:$2 sm:$0xff] %v3725_v59  ;;  %v135_v63 = vld.sshfl [vmem:[#allocation1 + $0x8] sm:$0xff pattern:$0x75316420]  ;;  %v156_v0 = vsel %vm72_vm0, %v134_v62, 0.0  ;;  %v249_v16 = vmul.f32 %v3725_v59, %v246_v50  ;;  %v315_v31 = vmul.f32 %v3725_v59, %v312_v1 }
  0x9c   :  { %3569 = vpow2.f32 %v127_v61  ;;  %v157_v2 = vsel %vm72_vm0, %v135_v63, 0.0  ;;  %256 = vst [vmem:[#allocation1] ss:$2 sm:$0xff] %v248_v60 }
  0x9d   :  { %v158_v4 = vadd.f32 %v157_v2, %v156_v0 }
  0x9f   :  { %159 = vadd.xlane.f32.xlu1 %v158_v4 }
  0xa0   :  { %v265_v5 = vld.sshfl [vmem:[#allocation1 + $0x20] sm:$0xff pattern:$0x75316420]  ;;  %v266_v6 = vld.sshfl [vmem:[#allocation1 + $0x28] sm:$0xff pattern:$0x75316420] }
  0xa1   :  { %v289_v7 = vsel %vm72_vm0, %v265_v5, 0.0  ;;  %v290_v8 = vsel %vm72_vm0, %v266_v6, 0.0  ;;  %330 = vst [vmem:[#allocation1 + $0x20] ss:$2 sm:$0xff] %v316_v3 }
  0xa2   :  { %v3736_v9 = vpop.eup %3569  ;;  %v138_v10 = vld.sshfl [vmem:[#allocation1 + $0x10] sm:$0xff pattern:$0x75316420]  ;;  %v139_v11 = vld.sshfl [vmem:[#allocation1 + $0x18] sm:$0xff pattern:$0x75316420]  ;;  %v291_v12 = vadd.f32 %v290_v8, %v289_v7 }
  0xa3   :  { %145 = vst [vmem:[#allocation1 + $0x30] ss:$2 sm:$0xff] %v3736_v9  ;;  %v257_v14 = vld.sshfl [vmem:[#allocation1] sm:$0xff pattern:$0x75316420]  ;;  %v161_v15 = vsel %vm72_vm0, %v138_v10, 0.0  ;;  %v251_v23 = vmul.f32 %v3736_v9, %v246_v50  ;;  %v317_v39 = vmul.f32 %v3736_v9, %v312_v1 }
  0xa4   :  { %v258_v17 = vld.sshfl [vmem:[#allocation1 + $0x8] sm:$0xff pattern:$0x75316420]  ;;  %v279_v18 = vsel %vm72_vm0, %v257_v14, 0.0  ;;  %v162_v19 = vsel %vm72_vm0, %v139_v11, 0.0  ;;  %292 = vadd.xlane.f32.xlu0 %v291_v12 }
  0xa5   :  { %v280_v20 = vsel %vm72_vm0, %v258_v17, 0.0  ;;  %322 = vst [vmem:[#allocation1] ss:$2 sm:$0xff] %v314_v13  ;;  %v163_v21 = vadd.f32 %v162_v19, %v161_v15 }
  0xa6   :  { %v281_v22 = vadd.f32 %v280_v20, %v279_v18  ;;  %260 = vst [vmem:[#allocation1 + $0x10] ss:$2 sm:$0xff] %v249_v16 }
  0xa7   :  { %164 = vadd.xlane.f32.xlu1 %v163_v21 }
  0xa8   :  { %282 = vadd.xlane.f32.xlu2 %v281_v22  ;;  %v331_v26 = vld.sshfl [vmem:[#allocation1 + $0x20] sm:$0xff pattern:$0x75316420]  ;;  %v332_v27 = vld.sshfl [vmem:[#allocation1 + $0x28] sm:$0xff pattern:$0x75316420] }
  0xa9   :  { %513 = vst [vmem:[#allocation1 + $0x20] ss:$2 sm:$0xff] %v3707_v42  ;;  %v356_v2 = vsel %vm72_vm0, %v332_v27, 0.0 }
  0xaa   :  { %v146_v28 = vld.sshfl [vmem:[#allocation1 + $0x30] sm:$0xff pattern:$0x75316420]  ;;  %v147_v29 = vld.sshfl [vmem:[#allocation1 + $0x38] sm:$0xff pattern:$0x75316420] }
  0xab   :  { %268 = vst [vmem:[#allocation1 + $0x30] ss:$2 sm:$0xff] %v251_v23  ;;  %v171_v57 = vsel %vm72_vm0, %v146_v28, 0.0  ;;  %v172_v58 = vsel %vm72_vm0, %v147_v29, 0.0 }
  0xac   :  { %v323_v32 = vld.sshfl [vmem:[#allocation1] sm:$0xff pattern:$0x75316420]  ;;  %v324_v33 = vld.sshfl [vmem:[#allocation1 + $0x8] sm:$0xff pattern:$0x75316420]  ;;  %v173_v0 = vadd.f32 %v172_v58, %v171_v57 }
  0xad   :  { %v261_v34 = vld.sshfl [vmem:[#allocation1 + $0x10] sm:$0xff pattern:$0x75316420]  ;;  %v262_v35 = vld.sshfl [vmem:[#allocation1 + $0x18] sm:$0xff pattern:$0x75316420] }
  0xae   :  { %v284_v36 = vsel %vm72_vm0, %v261_v34, 0.0  ;;  %v285_v37 = vsel %vm72_vm0, %v262_v35, 0.0  ;;  %326 = vst [vmem:[#allocation1 + $0x10] ss:$2 sm:$0xff] %v315_v31  ;;  %v345_v47 = vsel %vm72_vm0, %v323_v32, 0.0  ;;  %v346_v48 = vsel %vm72_vm0, %v324_v33, 0.0 }
  0xaf   :  { %v286_v40 = vadd.f32 %v285_v37, %v284_v36  ;;  %169 = vadd.xlane.f32.xlu1 %v168_v30  ;;  %505 = vst [vmem:[#allocation1] ss:$2 sm:$0xff] %v3713_v46  ;;  %v347_v56 = vadd.f32 %v346_v48, %v345_v47 }
  0xb1   :  { %287 = vadd.xlane.f32.xlu2 %v286_v40 }
  0xb2   :  { %v269_v41 = vld.sshfl [vmem:[#allocation1 + $0x30] sm:$0xff pattern:$0x75316420]  ;;  %v270_v42 = vld.sshfl [vmem:[#allocation1 + $0x38] sm:$0xff pattern:$0x75316420] }
  0xb3   :  { %334 = vst [vmem:[#allocation1 + $0x30] ss:$2 sm:$0xff] %v317_v39  ;;  %v294_v44 = vsel %vm72_vm0, %v269_v41, 0.0  ;;  %v295_v45 = vsel %vm72_vm0, %v270_v42, 0.0 }
  0xb4   :  { %v296_v50 = vadd.f32 %v295_v45, %v294_v44 }
  0xb5   :  { %v327_v51 = vld.sshfl [vmem:[#allocation1 + $0x10] sm:$0xff pattern:$0x75316420]  ;;  %v328_v52 = vld.sshfl [vmem:[#allocation1 + $0x18] sm:$0xff pattern:$0x75316420] }
  0xb6   :  { %v350_v53 = vsel %vm72_vm0, %v327_v51, 0.0  ;;  %v351_v55 = vsel %vm72_vm0, %v328_v52, 0.0  ;;  %509 = vst [vmem:[#allocation1 + $0x10] ss:$2 sm:$0xff] %v3725_v59  ;;  %v355_v59 = vsel %vm72_vm0, %v331_v26, 0.0 }
  0xb7   :  { %v352_v46 = vadd.f32 %v351_v55, %v350_v53  ;;  %297 = vadd.xlane.f32.xlu1 %v296_v50  ;;  %v357_v3 = vadd.f32 %v356_v2, %v355_v59 }
  0xb9   :  { %353 = vadd.xlane.f32.xlu0 %v352_v46  ;;  %348 = vadd.xlane.f32.xlu2 %v347_v56 }
  0xba   :  { %v335_v60 = vld.sshfl [vmem:[#allocation1 + $0x30] sm:$0xff pattern:$0x75316420]  ;;  %v336_v61 = vld.sshfl [vmem:[#allocation1 + $0x38] sm:$0xff pattern:$0x75316420] }
  0xbb   :  { %v360_v62 = vsel %vm72_vm0, %v335_v60, 0.0  ;;  %v361_v63 = vsel %vm72_vm0, %v336_v61, 0.0  ;;  %517 = vst [vmem:[#allocation1 + $0x30] ss:$2 sm:$0xff] %v3736_v9 }
  0xbc   :  { %v362_v1 = vadd.f32 %v361_v63, %v360_v62 }
  0xc1   :  { %174 = vadd.xlane.f32.xlu2 %v173_v0  ;;  %363 = vadd.xlane.f32.xlu0 %v362_v1 }
  0xc9   :  { %358 = vadd.xlane.f32.xlu2 %v357_v3 }
 0x112   :  { %v160_v4 = vpop.xlane.xlu1 %159 }
 0x113   :  { %3571 = vrcp.f32 %v160_v4  ;;  %v187_v9 = vand.u32 2147483648, %v160_v4  ;;  %vm181_vm2 = vweird.f32 %v160_v4  ;;  %v185_v13 = vand.u32 2147483647, %v160_v4 }
 0x115   :  { %v188_v19 = vor.u32 1.1754944e-38, %v187_v9  ;;  %vm186_vm4 = vcmp.eq.f32.partialorder %v185_v13, 8.507059e+37 }
 0x117   :  { %v293_v18 = vpop.xlane.xlu0 %292 }
 0x119   :  { %v3572_v5 = vpop.eup %3571 }
 0x11a   :  { %v177_v6 = vmul.f32 %v3572_v5, %v160_v4  ;;  %v165_v7 = vpop.xlane.xlu1 %164  ;;  %vm182_vm1 = vweird.f32 %v3572_v5 }
 0x11b   :  { %v283_v8 = vpop.xlane.xlu2 %282  ;;  %3573 = vrcp.f32 %v165_v7  ;;  %vm183_vm3 = vmor %vm181_vm2, %vm182_vm1  ;;  %v202_v23 = vand.u32 2147483648, %v165_v7  ;;  %v200_v25 = vand.u32 2147483647, %v165_v7  ;;  %vm196_vm6 = vweird.f32 %v165_v7 }
 0x11c   :  { %v178_v10 = vsub.f32 1.0, %v177_v6 }
 0x11d   :  { %v203_v29 = vor.u32 1.1754944e-38, %v202_v23  ;;  %vm201_vm8 = vcmp.eq.f32.partialorder %v200_v25, 8.507059e+37 }
 0x11e   :  { %v179_v11 = vmul.f32 %v3572_v5, %v178_v10 }
 0x120   :  { %v180_v12 = vadd.f32 %v3572_v5, %v179_v11 }
 0x121   :  { %v3574_v14 = vpop.eup %3573 }
 0x122   :  { %v184_v15 = vsel %vm183_vm3, %v3572_v5, %v180_v12  ;;  %v192_v16 = vmul.f32 %v3574_v14, %v165_v7  ;;  %v170_v17 = vpop.xlane.xlu1 %169  ;;  %vm197_vm5 = vweird.f32 %v3574_v14 }
 0x123   :  { %3575 = vrcp.f32 %v170_v17  ;;  %v3768_v22 = vsel %vm186_vm4, %v188_v19, %v184_v15  ;;  %vm198_vm7 = vmor %vm196_vm6, %vm197_vm5  ;;  %v217_v40 = vand.u32 2147483648, %v170_v17  ;;  %vm211_vm10 = vweird.f32 %v170_v17 }
 0x124   :  { %v193_v20 = vsub.f32 1.0, %v192_v16  ;;  %v288_v21 = vpop.xlane.xlu2 %287  ;;  %v3771_v26 = vmul.f32 %v283_v8, %v3768_v22  ;;  %v215_v46 = vand.u32 2147483647, %v170_v17 }
 0x125   :  { %v218_v1 = vor.u32 1.1754944e-38, %v217_v40 }
 0x126   :  { %v194_v24 = vmul.f32 %v3574_v14, %v193_v20  ;;  %v369_v33 = vsub.f32 %v3709_v43, %v3771_v26  ;;  %v370_v39 = vsub.f32 %v3705_v38, %v3771_v26  ;;  %vm216_vm12 = vcmp.eq.f32.partialorder %v215_v46, 8.507059e+37 }
 0x128   :  { %v195_v27 = vadd.f32 %v3574_v14, %v194_v24  ;;  %v385_v53 = vmul.f32 %v369_v33, %v369_v33  ;;  %v386_v61 = vmul.f32 %v370_v39, %v370_v39 }
 0x129   :  { %v3576_v28 = vpop.eup %3575 }
 0x12a   :  { %v199_v30 = vsel %vm198_vm7, %v3574_v14, %v195_v27  ;;  %v207_v31 = vmul.f32 %v3576_v28, %v170_v17  ;;  %vm212_vm9 = vweird.f32 %v3576_v28 }
 0x12b   :  { %v3773_v32 = vsel %vm201_vm8, %v203_v29, %v199_v30  ;;  %vm213_vm11 = vmor %vm211_vm10, %vm212_vm9 }
 0x12c   :  { %v3778_v34 = vmul.f32 %v288_v21, %v3773_v32  ;;  %v208_v35 = vsub.f32 1.0, %v207_v31  ;;  %v349_v36 = vpop.xlane.xlu2 %348  ;;  %v354_v37 = vpop.xlane.xlu0 %353 }
 0x12d   :  { %v3783_v41 = vmul.f32 %v349_v36, %v3768_v22  ;;  %v3786_v42 = vmul.f32 %v354_v37, %v3773_v32 }
 0x12e   :  { %v371_v44 = vsub.f32 %v3709_v43, %v3778_v34  ;;  %v372_v45 = vsub.f32 %v3705_v38, %v3778_v34  ;;  %v209_v47 = vmul.f32 %v3576_v28, %v208_v35 }
 0x12f   :  { %v377_v48 = vsub.f32 %v3721_v54, %v3783_v41  ;;  %v378_v50 = vsub.f32 %v3715_v49, %v3783_v41  ;;  %v379_v51 = vsub.f32 %v3721_v54, %v3786_v42  ;;  %v380_v52 = vsub.f32 %v3715_v49, %v3786_v42 }
 0x130   :  { %v210_v55 = vadd.f32 %v3576_v28, %v209_v47  ;;  %v387_v56 = vmul.f32 %v371_v44, %v371_v44  ;;  %v388_v62 = vmul.f32 %v372_v45, %v372_v45 }
 0x131   :  { %v393_v57 = vmul.f32 %v377_v48, %v377_v48  ;;  %v394_v58 = vmul.f32 %v378_v50, %v378_v50  ;;  %v395_v60 = vmul.f32 %v379_v51, %v379_v51  ;;  %v396_v0 = vmul.f32 %v380_v52, %v380_v52 }
 0x132   :  { %v214_v63 = vsel %vm213_vm11, %v3576_v28, %v210_v55 }
 0x133   :  { %v3800_v59 = vadd.f32 %v393_v57, %v385_v53  ;;  %v3802_v2 = vadd.f32 %v394_v58, %v386_v61  ;;  %v3804_v4 = vsel %vm216_vm12, %v218_v1, %v214_v63  ;;  %v3806_v5 = vadd.f32 %v395_v60, %v387_v56  ;;  %v298_v58 = vpop.xlane.xlu1 %297 }
 0x134   :  { %v175_v3 = vpop.xlane.xlu2 %174  ;;  %v3808_v6 = vadd.f32 %v396_v0, %v388_v62  ;;  %v3812_v7 = vmul.f32 %v293_v18, %v3804_v4  ;;  %v364_v61 = vpop.xlane.xlu0 %363 }
 0x135   :  { %3577 = vrcp.f32 %v175_v3  ;;  %v230_v8 = vand.u32 2147483647, %v175_v3  ;;  %v232_v10 = vand.u32 2147483648, %v175_v3  ;;  %vm226_vm13 = vweird.f32 %v175_v3 }
 0x136   :  { %3579 = vrsqrt.f32 %v3800_v59  ;;  %v373_v12 = vsub.f32 %v3709_v43, %v3812_v7  ;;  %v374_v15 = vsub.f32 %v3705_v38, %v3812_v7  ;;  %v419_v23 = vand.u32 2147483648, %v3800_v59 }
 0x137   :  { %3581 = vrsqrt.f32 %v3802_v2  ;;  %vm3825_vm14 = vcmp.eq.f32.partialorder %v230_v8, 8.507059e+37  ;;  %v233_v21 = vor.u32 1.1754944e-38, %v232_v10  ;;  %vm416_vm1 = vcmp.eq.f32.partialorder %v3800_v59, inf }
 0x138   :  { %3583 = vrsqrt.f32 %v3806_v5  ;;  %v389_v31 = vmul.f32 %v373_v12, %v373_v12  ;;  %v390_v36 = vmul.f32 %v374_v15, %v374_v15  ;;  %vm418_vm2 = vcmp.eq.f32.partialorder %v3800_v59, 0.0 }
 0x139   :  { %3585 = vrsqrt.f32 %v3808_v6  ;;  %vm428_vm3 = vcmp.eq.f32.partialorder %v3802_v2, inf  ;;  %v431_v45 = vand.u32 2147483648, %v3802_v2  ;;  %vm430_vm5 = vcmp.eq.f32.partialorder %v3802_v2, 0.0 }
 0x13a   :  { %vm440_vm6 = vcmp.eq.f32.partialorder %v3806_v5, inf  ;;  %v443_v56 = vand.u32 2147483648, %v3806_v5  ;;  %vm442_vm7 = vcmp.eq.f32.partialorder %v3806_v5, 0.0  ;;  %vm452_vm8 = vcmp.eq.f32.partialorder %v3808_v6, inf }
 0x13b   :  { %v3578_v11 = vpop.eup %3577  ;;  %vm454_vm9 = vcmp.eq.f32.partialorder %v3808_v6, 0.0 }
 0x13c   :  { %v3580_v9 = vpop.eup %3579  ;;  %v222_v13 = vmul.f32 %v3578_v11, %v175_v3  ;;  %v359_v14 = vpop.xlane.xlu2 %358  ;;  %vm227_vm15 = vweird.f32 %v3578_v11 }
 0x13d   :  { %v3822_v16 = vmul.f32 %v359_v14, %v3804_v4  ;;  %v410_v17 = vmul.f32 %v3580_v9, %v3800_v59  ;;  %v3582_v18 = vpop.eup %3581  ;;  %vm228_vm4 = vmor %vm226_vm13, %vm227_vm15 }
 0x13e   :  { %v223_v19 = vsub.f32 1.0, %v222_v13  ;;  %v3584_v24 = vpop.eup %3583  ;;  %v422_v29 = vmul.f32 %v3582_v18, %v3802_v2 }
 0x13f   :  { %v381_v25 = vsub.f32 %v3721_v54, %v3822_v16  ;;  %v382_v27 = vsub.f32 %v3715_v49, %v3822_v16  ;;  %v411_v28 = vmul.f32 %v3580_v9, %v410_v17  ;;  %v3586_v30 = vpop.eup %3585  ;;  %v434_v35 = vmul.f32 %v3584_v24, %v3806_v5 }
 0x140   :  { %v224_v33 = vmul.f32 %v3578_v11, %v223_v19  ;;  %v423_v40 = vmul.f32 %v3582_v18, %v422_v29  ;;  %v446_v48 = vmul.f32 %v3586_v30, %v3808_v6 }
 0x141   :  { %v397_v37 = vmul.f32 %v381_v25, %v381_v25  ;;  %v412_v39 = vmul.f32 0.5, %v411_v28  ;;  %v435_v47 = vmul.f32 %v3584_v24, %v434_v35  ;;  %v398_v50 = vmul.f32 %v382_v27, %v382_v27  ;;  %v507_v35 = vld.sshfl [vmem:[#allocation1 + $0x8] sm:$0xff pattern:$0x75316420] }
 0x142   :  { %v225_v44 = vadd.f32 %v3578_v11, %v224_v33  ;;  %v424_v53 = vmul.f32 0.5, %v423_v40  ;;  %v447_v57 = vmul.f32 %v3586_v30, %v446_v48 }
 0x143   :  { %v3842_v51 = vadd.f32 %v397_v37, %v389_v31  ;;  %v413_v52 = vsub.f32 1.5, %v412_v39  ;;  %v436_v46 = vmul.f32 0.5, %v435_v47  ;;  %v3860_v10 = vadd.f32 %v398_v50, %v390_v36 }
 0x144   :  { %v229_v55 = vsel %vm228_vm4, %v3578_v11, %v225_v44  ;;  %v425_v63 = vsub.f32 1.5, %v424_v53  ;;  %v448_v8 = vmul.f32 0.5, %v447_v57  ;;  %v455_v37 = vand.u32 2147483648, %v3808_v6 }
 0x145   :  { %v3849_v60 = vsel %vm3825_vm14, %v233_v21, %v229_v55  ;;  %v414_v62 = vmul.f32 %v3580_v9, %v413_v52  ;;  %3587 = vrsqrt.f32 %v3842_v51  ;;  %v437_v3 = vsub.f32 1.5, %v436_v46  ;;  %v511_v46 = vld.sshfl [vmem:[#allocation1 + $0x18] sm:$0xff pattern:$0x75316420] }
 0x146   :  { %v3854_v0 = vmul.f32 %v298_v58, %v3849_v60  ;;  %v3857_v1 = vmul.f32 %v364_v61, %v3849_v60  ;;  %v426_v9 = vmul.f32 %v3582_v18, %v425_v63  ;;  %v449_v20 = vsub.f32 1.5, %v448_v8 }
 0x147   :  { %v415_v11 = vmul.f32 %v414_v62, %v3800_v59  ;;  %v438_v19 = vmul.f32 %v3584_v24, %v437_v3  ;;  %3589 = vrsqrt.f32 %v3860_v10  ;;  %vm464_vm10 = vcmp.eq.f32.partialorder %v3842_v51, inf }
 0x148   :  { %v375_v12 = vsub.f32 %v3709_v43, %v3854_v0  ;;  %v376_v13 = vsub.f32 %v3705_v38, %v3854_v0  ;;  %v383_v14 = vsub.f32 %v3721_v54, %v3857_v1  ;;  %v384_v15 = vsub.f32 %v3715_v49, %v3857_v1  ;;  %v506_v54 = vld.sshfl [vmem:[#allocation1] sm:$0xff pattern:$0x75316420] }
 0x149   :  { %v417_v17 = vsel %vm416_vm1, %v3800_v59, %v415_v11  ;;  %v427_v18 = vmul.f32 %v426_v9, %v3802_v2  ;;  %v439_v29 = vmul.f32 %v438_v19, %v3806_v5  ;;  %v450_v31 = vmul.f32 %v3586_v30, %v449_v20 }
 0x14a   :  { %v391_v21 = vmul.f32 %v375_v12, %v375_v12  ;;  %v392_v25 = vmul.f32 %v376_v13, %v376_v13  ;;  %v399_v43 = vmul.f32 %v383_v14, %v383_v14  ;;  %v400_v27 = vmul.f32 %v384_v15, %v384_v15 }
 0x14b   :  { %v3588_v28 = vpop.eup %3587  ;;  %v420_v38 = vsel %vm418_vm2, %v419_v23, %v417_v17  ;;  %v429_v49 = vsel %vm428_vm3, %v3802_v2, %v427_v18  ;;  %v441_v59 = vsel %vm440_vm6, %v3806_v5, %v439_v29  ;;  %v451_v23 = vmul.f32 %v450_v31, %v3808_v6 }
 0x14c   :  { %v3884_v24 = vadd.f32 %v399_v43, %v391_v21  ;;  %v432_v33 = vsel %vm430_vm5, %v431_v45, %v429_v49  ;;  %v528_v36 = vmul.f32 %v506_v54, %v420_v38  ;;  %v458_v40 = vmul.f32 %v3588_v28, %v3842_v51  ;;  %v510_v45 = vld.sshfl [vmem:[#allocation1 + $0x10] sm:$0xff pattern:$0x75316420] }
 0x14d   :  { %v529_v39 = vmul.f32 %v507_v35, %v432_v33  ;;  %v3894_v44 = vadd.f32 %v400_v27, %v392_v25  ;;  %v444_v2 = vsel %vm442_vm7, %v443_v56, %v441_v59  ;;  %v453_v48 = vsel %vm452_vm8, %v3808_v6, %v451_v23  ;;  %v3590_v62 = vpop.eup %3589 }
 0x14e   :  { %v536_v30 = vsel %vm72_vm0, %v528_v36, 0.0  ;;  %v530_v50 = vmul.f32 %v510_v45, %v444_v2  ;;  %v459_v52 = vmul.f32 %v3588_v28, %v458_v40  ;;  %v456_v55 = vsel %vm454_vm9, %v455_v37, %v453_v48  ;;  %v515_v37 = vld.sshfl [vmem:[#allocation1 + $0x28] sm:$0xff pattern:$0x75316420] }
 0x14f   :  { %v537_v47 = vsel %vm72_vm0, %v529_v39, 0.0  ;;  %v531_v57 = vmul.f32 %v511_v46, %v456_v55  ;;  %3591 = vrsqrt.f32 %v3884_v24  ;;  %v470_v8 = vmul.f32 %v3590_v62, %v3860_v10  ;;  %v519_v46 = vld.sshfl [vmem:[#allocation1 + $0x38] sm:$0xff pattern:$0x75316420] }
 0x150   :  { %v538_v53 = vadd.f32 %v537_v47, %v536_v30  ;;  %v541_v5 = vsel %vm72_vm0, %v530_v50, 0.0  ;;  %v460_v56 = vmul.f32 0.5, %v459_v52  ;;  %3593 = vrsqrt.f32 %v3894_v44 }
 0x151   :  { %v542_v58 = vsel %vm72_vm0, %v531_v57, 0.0  ;;  %v471_v11 = vmul.f32 %v3590_v62, %v470_v8  ;;  %v467_v17 = vand.u32 2147483648, %v3842_v51  ;;  %vm466_vm11 = vcmp.eq.f32.partialorder %v3842_v51, 0.0 }
 0x152   :  { %539 = vadd.xlane.f32.xlu1 %v538_v53  ;;  %v461_v61 = vsub.f32 1.5, %v460_v56  ;;  %v543_v63 = vadd.f32 %v542_v58, %v541_v5  ;;  %vm476_vm12 = vcmp.eq.f32.partialorder %v3860_v10, inf  ;;  %v479_v31 = vand.u32 2147483648, %v3860_v10  ;;  %v518_v53 = vld.sshfl [vmem:[#allocation1 + $0x30] sm:$0xff pattern:$0x75316420] }
 0x153   :  { %v472_v14 = vmul.f32 0.5, %v471_v11  ;;  %vm478_vm13 = vcmp.eq.f32.partialorder %v3860_v10, 0.0  ;;  %vm488_vm14 = vcmp.eq.f32.partialorder %v3884_v24, inf  ;;  %vm490_vm15 = vcmp.eq.f32.partialorder %v3884_v24, 0.0 }
 0x154   :  { %v462_v3 = vmul.f32 %v3588_v28, %v461_v61  ;;  %544 = vadd.xlane.f32.xlu2 %v543_v63  ;;  %v514_v28 = vld.sshfl [vmem:[#allocation1 + $0x20] sm:$0xff pattern:$0x75316420]  ;;  %v491_v30 = vand.u32 2147483648, %v3884_v24  ;;  %vm500_vm1 = vcmp.eq.f32.partialorder %v3894_v44, inf  ;;  %v503_v47 = vand.u32 2147483648, %v3894_v44 }
 0x155   :  { %v3592_v9 = vpop.eup %3591  ;;  %v473_v19 = vsub.f32 1.5, %v472_v14  ;;  %vm502_vm2 = vcmp.eq.f32.partialorder %v3894_v44, 0.0  ;;  %v683_v61 = vlaneseq  ;;  %v575_v63 = vld [vmem:[#allocation2] sm:$0x3]  ;;  %vm560_vm3 = vcmask 7168  }
 0x156   :  { %v463_v6 = vmul.f32 %v462_v3, %v3842_v51  ;;  %v3594_v12 = vpop.eup %3593  ;;  %v482_v15 = vmul.f32 %v3592_v9, %v3884_v24  ;;  %v585_v3 = vperm.slane %v575_v63, 1  ;;  %vm565_vm4 = vcmask 15360  }
 0x157   :  { %v494_v18 = vmul.f32 %v3594_v12, %v3894_v44  ;;  %v474_v43 = vmul.f32 %v3590_v62, %v473_v19  ;;  %v684_v62 = vshrl.u32 %v683_v61, 7  ;;  %vm570_vm5 = vcmask 19456  }
 0x158   :  { %v465_v13 = vsel %vm464_vm10, %v3842_v51, %v463_v6  ;;  %v483_v20 = vmul.f32 %v3592_v9, %v482_v15  ;;  %v561_v11 = vsel %vm560_vm3, %v3771_v26, %v3783_v41  ;;  %vm1330_vm9 = vcmask 523264  }
 0x159   :  { %v468_v21 = vsel %vm466_vm11, %v467_v17, %v465_v13  ;;  %v495_v25 = vmul.f32 %v3594_v12, %v494_v18  ;;  %v475_v49 = vmul.f32 %v474_v43, %v3860_v10  ;;  %3562 = vset.pattern.permute.xlu1 %v684_v62  ;;  %3561 = vset.pattern.permute.xlu0 %v684_v62 }
 0x15a   :  { %v484_v27 = vmul.f32 0.5, %v483_v20  ;;  %v532_v54 = vmul.f32 %v514_v28, %v468_v21  ;;  %3560 = vset.pattern.permute.xlu2 %v684_v62 }
 0x15b   :  { %v496_v38 = vmul.f32 0.5, %v495_v25  ;;  %v477_v35 = vsel %vm476_vm12, %v3860_v10, %v475_v49 }
 0x15c   :  { %v485_v29 = vsub.f32 1.5, %v484_v27  ;;  %v480_v36 = vsel %vm478_vm13, %v479_v31, %v477_v35  ;;  %v546_v23 = vsel %vm72_vm0, %v532_v54, 0.0 }
 0x15d   :  { %v497_v33 = vsub.f32 1.5, %v496_v38  ;;  %v533_v59 = vmul.f32 %v515_v37, %v480_v36 }
 0x15e   :  { %v486_v51 = vmul.f32 %v3592_v9, %v485_v29 }
 0x15f   :  { %v498_v39 = vmul.f32 %v3594_v12, %v497_v33  ;;  %v547_v45 = vsel %vm72_vm0, %v533_v59, 0.0 }
 0x160   :  { %v487_v40 = vmul.f32 %v486_v51, %v3884_v24  ;;  %v548_v48 = vadd.f32 %v547_v45, %v546_v23  ;;  %v563_v23 = vsel %vm560_vm3, %v3812_v7, %v3822_v16 }
 0x161   :  { %v499_v2 = vmul.f32 %v498_v39, %v3894_v44 }
 0x162   :  { %v489_v10 = vsel %vm488_vm14, %v3884_v24, %v487_v40  ;;  %549 = vadd.xlane.f32.xlu0 %v548_v48 }
 0x163   :  { %v492_v50 = vsel %vm490_vm15, %v491_v30, %v489_v10  ;;  %v501_v52 = vsel %vm500_vm1, %v3894_v44, %v499_v2  ;;  %v576_v44 = vperm.slane %v575_v63, 0 }
 0x164   :  { %v504_v55 = vsel %vm502_vm2, %v503_v47, %v501_v52  ;;  %v534_v57 = vmul.f32 %v518_v53, %v492_v50  ;;  %v564_v52 = vsel %vm560_vm3, %v3854_v0, %v3857_v1 }
 0x165   :  { %v535_v5 = vmul.f32 %v519_v46, %v504_v55 }
 0x166   :  { %v551_v56 = vsel %vm72_vm0, %v534_v57, 0.0 }
 0x167   :  { %v552_v24 = vsel %vm72_vm0, %v535_v5, 0.0 }
 0x168   :  { %v553_v58 = vadd.f32 %v552_v24, %v551_v56 }
 0x16a   :  { %554 = vadd.xlane.f32.xlu1 %v553_v58 }
 0x1c5   :  { %v540_v8 = vpop.xlane.xlu1 %539 }
 0x1c6   :  { %v556_v6 = vmul.f32 %v540_v8, %v3768_v22  ;;  %v562_v22 = vsel %vm560_vm3, %v3778_v34, %v3786_v42 }
 0x1c7   :  { %v545_v14 = vpop.xlane.xlu2 %544 }
 0x1c8   :  { %v566_v9 = vsel %vm565_vm4, %v561_v11, %v556_v6  ;;  %v577_v12 = vmul.f32 %v576_v44, %v556_v6  ;;  %v3942_v13 = vmul.f32 %v585_v3, %v556_v6  ;;  %v557_v17 = vmul.f32 %v545_v14, %v3773_v32 }
 0x1c9   :  { %571 = vst.msk [vmem:[%s5579_s7] sm:$0xf] %vm570_vm5, %v566_v9 }
 0x1ca   :  { %v581_v15 = vadd.f32 %v577_v12, %v3783_v41  ;;  %v567_v19 = vsel %vm565_vm4, %v562_v22, %v557_v17  ;;  %v578_v20 = vmul.f32 %v576_v44, %v557_v17  ;;  %v3958_v21 = vmul.f32 %v585_v3, %v557_v17 }
 0x1cb   :  { %572 = vst.msk [vmem:[%s5579_s7 + $0x4] sm:$0xf] %vm570_vm5, %v567_v19 }
 0x1cc   :  { %v594_v18 = vadd.f32 1.0, %v581_v15  ;;  %v582_v41 = vadd.f32 %v578_v20, %v3786_v42 }
 0x1ce   :  { %v598_v25 = vmul.f32 8.0, %v594_v18  ;;  %v595_v32 = vadd.f32 1.0, %v582_v41 }
 0x1d0   :  { %v602_v43 = vmax.f32 %v598_v25, 0.0  ;;  %v599_v28 = vmul.f32 8.0, %v595_v32 }
 0x1d2   :  { %v3961_v27 = vmin.f32 %v602_v43, 15.0  ;;  %v603_v38 = vmax.f32 %v599_v28, 0.0 }
 0x1d4   :  { %v626_v49 = vceil.f32 %v3961_v27  ;;  %v3964_v54 = vmin.f32 %v603_v38, 15.0  ;;  %v638_v61 = vfloor.f32 %v3961_v27 }
 0x1d5   :  { %v550_v36 = vpop.xlane.xlu0 %549 }
 0x1d6   :  { %v3966_v29 = vmax.f32 %v626_v49, 0.0  ;;  %v627_v33 = vceil.f32 %v3964_v54  ;;  %v558_v42 = vmul.f32 %v550_v36, %v3804_v4  ;;  %v642_v8 = vmax.f32 %v638_v61, 0.0 }
 0x1d7   :  { %v639_v38 = vfloor.f32 %v3964_v54 }
 0x1d8   :  { %v634_v31 = vmin.f32 %v3966_v29, 15.0  ;;  %v631_v51 = vmax.f32 %v627_v33, 0.0  ;;  %v568_v30 = vsel %vm565_vm4, %v563_v23, %v558_v42  ;;  %v579_v2 = vmul.f32 %v576_v44, %v558_v42 }
 0x1d9   :  { %v3975_v45 = vmul.f32 %v585_v3, %v558_v42  ;;  %573 = vst.msk [vmem:[%s5579_s7 + $0x8] sm:$0xf] %vm570_vm5, %v568_v30  ;;  %v646_v12 = vmin.f32 %v642_v8, 15.0  ;;  %v643_v33 = vmax.f32 %v639_v38, 0.0  ;;  %v3513_v38 = vld [vmem:[%s5576_s4 + $0x10] sm:$0xff] }
 0x1da   :  { %v3524_v35 = vcvt.f32.s32 %v634_v31  ;;  %v635_v40 = vmin.f32 %v631_v51, 15.0  ;;  %v583_v4 = vadd.f32 %v579_v2, %v3822_v16  ;;  %v1142_v25 = vsub.f32 %v634_v31, %v3961_v27 }
 0x1db   :  { %v3532_v17 = vcvt.f32.s32 %v646_v12  ;;  %v846_v22 = vsub.f32 %v3961_v27, %v646_v12  ;;  %v647_v51 = vmin.f32 %v643_v33, 15.0 }
 0x1dc   :  { %v689_v37 = vperm.slane %v3524_v35, 1  ;;  %v682_v39 = vperm.slane %v3524_v35, 0  ;;  %v696_v59 = vperm.slane %v3524_v35, 2  ;;  %v3526_v48 = vcvt.f32.s32 %v635_v40 }
 0x1dd   :  { %v555_v10 = vpop.xlane.xlu1 %554  ;;  %v596_v50 = vadd.f32 1.0, %v583_v4  ;;  %v703_v16 = vperm.slane %v3524_v35, 3  ;;  %v3996_v5 = vsub.f32 %v635_v40, %v3964_v54  ;;  %v982_v18 = vperm.slane %v3532_v17, 0 }
 0x1de   :  { %694 = vperm.xlu0 %3561, %v689_v37   ;;  %687 = vperm.xlu2 %3560, %v682_v39   ;;  %v559_v47 = vmul.f32 %v555_v10, %v3849_v60  ;;  %v717_v60 = vperm.slane %v3526_v48, 1  ;;  %v710_v62 = vperm.slane %v3526_v48, 0  ;;  %v724_v14 = vperm.slane %v3526_v48, 2 }
 0x1df   :  { %701 = vperm.xlu1 %3562, %v696_v59   ;;  %v600_v57 = vmul.f32 8.0, %v596_v50  ;;  %v850_v20 = vperm.slane %v846_v22, 0  ;;  %v857_v41 = vperm.slane %v846_v22, 1  ;;  %v989_v43 = vperm.slane %v3532_v17, 1 }
 0x1e0   :  { %v569_v53 = vsel %vm565_vm4, %v564_v52, %v559_v47  ;;  %v3987_v55 = vmul.f32 %v576_v44, %v559_v47  ;;  %v3989_v46 = vmul.f32 %v585_v3, %v559_v47  ;;  %v731_v44 = vperm.slane %v3526_v48, 3 }
 0x1e1   :  { %574 = vst.msk [vmem:[%s5579_s7 + $0xc] sm:$0xf] %vm570_vm5, %v569_v53  ;;  %v604_v56 = vmax.f32 %v600_v57, 0.0  ;;  %v1153_v32 = vperm.slane %v1142_v25, 1  ;;  %v996_v28 = vperm.slane %v3532_v17, 2  ;;  %v1146_v49 = vperm.slane %v1142_v25, 0 }
 0x1e2   :  { %v864_v29 = vperm.slane %v846_v22, 2  ;;  %v871_v35 = vperm.slane %v846_v22, 3  ;;  %v1003_v36 = vperm.slane %v3532_v17, 3  ;;  %v1167_v27 = vperm.slane %v1142_v25, 3 }
 0x1e3   :  { %v3998_v24 = vmin.f32 %v604_v56, 15.0  ;;  %v3534_v31 = vcvt.f32.s32 %v647_v51  ;;  %v847_v42 = vsub.f32 %v3964_v54, %v647_v51  ;;  %v1160_v39 = vperm.slane %v1142_v25, 2 }
 0x1e4   :  { %v1181_v30 = vperm.slane %v3996_v5, 1  ;;  %v1174_v10 = vperm.slane %v3996_v5, 0  ;;  %v1195_v53 = vperm.slane %v3996_v5, 3  ;;  %v1188_v61 = vperm.slane %v3996_v5, 2 }
 0x1e5   :  { %v628_v58 = vceil.f32 %v3998_v24  ;;  %v1010_v37 = vperm.slane %v3534_v31, 0  ;;  %v878_v59 = vperm.slane %v847_v42, 0  ;;  %v885_v23 = vperm.slane %v847_v42, 1 }
 0x1e6   :  { %708 = vperm.xlu2 %3560, %v703_v16   ;;  %v1017_v40 = vperm.slane %v3534_v31, 1  ;;  %v1024_v2 = vperm.slane %v3534_v31, 2  ;;  %v640_v4 = vfloor.f32 %v3998_v24  ;;  %v892_v54 = vperm.slane %v847_v42, 2 }
 0x1e7   :  { %722 = vperm.xlu1 %3562, %v717_v60   ;;  %v632_v63 = vmax.f32 %v628_v58, 0.0  ;;  %v899_v48 = vperm.slane %v847_v42, 3  ;;  %v1031_v52 = vperm.slane %v3534_v31, 3  ;;  %v584_v60 = vadd.f32 %v3987_v55, %v3857_v1 }
 0x1e8   :  { %v644_v47 = vmax.f32 %v640_v4, 0.0 }
 0x1e9   :  { %v636_v3 = vmin.f32 %v632_v63, 15.0 }
 0x1ea   :  { %v648_v50 = vmin.f32 %v644_v47, 15.0 }
 0x1eb   :  { %v4002_v6 = vcvt.f32.s32 %v636_v3  ;;  %v4005_v11 = vsub.f32 %v636_v3, %v3998_v24 }
 0x1ec   :  { %v3536_v57 = vcvt.f32.s32 %v648_v50  ;;  %v848_v56 = vsub.f32 %v3998_v24, %v648_v50 }
 0x1ed   :  { %v738_v9 = vperm.slane %v4002_v6, 0  ;;  %v752_v15 = vperm.slane %v4002_v6, 2  ;;  %v745_v19 = vperm.slane %v4002_v6, 1  ;;  %v759_v5 = vperm.slane %v4002_v6, 3  ;;  %v3514_v6 = vld [vmem:[%s5576_s4 + $0x18] sm:$0xff] }
 0x1ee   :  { %715 = vperm.xlu2 %3560, %v710_v62   ;;  %v1038_v58 = vperm.slane %v3536_v57, 0  ;;  %v597_v62 = vadd.f32 1.0, %v584_v60  ;;  %v906_v63 = vperm.slane %v848_v56, 0  ;;  %v913_v8 = vperm.slane %v848_v56, 1  ;;  %1359 = vmatpush.bf16.msra.mxu0 %v3514_v6 }
 0x1ef   :  { %736 = vperm.xlu1 %3562, %v731_v44   ;;  %743 = vperm.xlu0 %3561, %v738_v9   ;;  %v1045_v9 = vperm.slane %v3536_v57, 1  ;;  %v1202_v24 = vperm.slane %v4005_v11, 0 }
 0x1f0   :  { %v601_v3 = vmul.f32 8.0, %v597_v62  ;;  %3515 = vmatpush.bf16.msra.mxu2 %v3514_v6  ;;  %3516 = vmatpush.bf16.msra.mxu3 %v3514_v6 }
 0x1f2   :  { %v605_v12 = vmax.f32 %v601_v3, 0.0  ;;  %1360 = vmatpush.bf16.msra.mxu0 %v3513_v38 }
 0x1f4   :  { %v609_v55 = vmin.f32 %v605_v12, 15.0  ;;  %3517 = vmatpush.bf16.msra.mxu2 %v3513_v38  ;;  %3518 = vmatpush.bf16.msra.mxu3 %v3513_v38 }
 0x1f6   :  { %729 = vperm.xlu2 %3560, %v724_v14   ;;  %v1209_v14 = vperm.slane %v4005_v11, 1  ;;  %v629_v17 = vceil.f32 %v609_v55  ;;  %v641_v25 = vfloor.f32 %v609_v55 }
 0x1f7   :  { %757 = vperm.xlu1 %3562, %v752_v15   ;;  %987 = vperm.xlu0 %3561, %v982_v18   ;;  %v1059_v15 = vperm.slane %v3536_v57, 3 }
 0x1fe   :  { %750 = vperm.xlu2 %3560, %v745_v19   ;;  %v633_v19 = vmax.f32 %v629_v17, 0.0 }
 0x1ff   :  { %855 = vperm.xlu1 %3562, %v850_v20   ;;  %862 = vperm.xlu0 %3561, %v857_v41   ;;  %v920_v20 = vperm.slane %v848_v56, 2  ;;  %v1052_v41 = vperm.slane %v3536_v57, 2 }
 0x206   :  { %994 = vperm.xlu2 %3560, %v989_v43   ;;  %v1216_v43 = vperm.slane %v4005_v11, 2 }
 0x207   :  { %1158 = vperm.xlu1 %3562, %v1153_v32   ;;  %1001 = vperm.xlu0 %3561, %v996_v28   ;;  %v637_v32 = vmin.f32 %v633_v19, 15.0  ;;  %v645_v28 = vmax.f32 %v641_v25, 0.0 }
 0x209   :  { %v4046_v33 = vcvt.f32.s32 %v637_v32  ;;  %v649_v51 = vmin.f32 %v645_v28, 15.0  ;;  %v4071_v50 = vsub.f32 %v637_v32, %v609_v55 }
 0x20b   :  { %v773_v31 = vperm.slane %v4046_v33, 1  ;;  %v1230_v3 = vperm.slane %v4071_v50, 0  ;;  %v787_v38 = vperm.slane %v4046_v33, 3 }
 0x20e   :  { %1151 = vperm.xlu2 %3560, %v1146_v49  }
 0x20f   :  { %869 = vperm.xlu1 %3562, %v864_v29   ;;  %876 = vperm.xlu0 %3561, %v871_v35   ;;  %v1223_v35 = vperm.slane %v4005_v11, 3 }
 0x216   :  { %1008 = vperm.xlu2 %3560, %v1003_v36   ;;  %v927_v36 = vperm.slane %v848_v56, 3 }
 0x217   :  { %1172 = vperm.xlu1 %3562, %v1167_v27   ;;  %1015 = vperm.xlu0 %3561, %v1010_v37   ;;  %v3512_v27 = vld [vmem:[%s5576_s4 + $0x8] sm:$0xff]  ;;  %v4053_v37 = vcvt.f32.s32 %v649_v51 }
 0x218   :  { %1361 = vmatpush.bf16.msra.mxu0 %v3512_v27  ;;  %3519 = vmatpush.bf16.msra.mxu2 %v3512_v27 }
 0x219   :  { %3520 = vmatpush.bf16.msra.mxu3 %v3512_v27  ;;  %v1087_v6 = vperm.slane %v4053_v37, 3 }
 0x21e   :  { %1165 = vperm.xlu2 %3560, %v1160_v39  }
 0x21f   :  { %883 = vperm.xlu1 %3562, %v878_v59   ;;  %890 = vperm.xlu0 %3561, %v885_v23   ;;  %v4057_v59 = vsub.f32 %v609_v55, %v649_v51  ;;  %v3511_v23 = vld [vmem:[%s5576_s4] sm:$0xff] }
 0x220   :  { %1362 = vmatpush.bf16.msra.mxu0 %v3511_v23  ;;  %3521 = vmatpush.bf16.msra.mxu2 %v3511_v23 }
 0x221   :  { %3522 = vmatpush.bf16.msra.mxu3 %v3511_v23  ;;  %v934_v4 = vperm.slane %v4057_v59, 0  ;;  %v955_v51 = vperm.slane %v4057_v59, 3 }
 0x226   :  { %1022 = vperm.xlu2 %3560, %v1017_v40   ;;  %v1066_v40 = vperm.slane %v4053_v37, 0 }
 0x227   :  { %1186 = vperm.xlu1 %3562, %v1181_v30   ;;  %1029 = vperm.xlu0 %3561, %v1024_v2   ;;  %v766_v30 = vperm.slane %v4046_v33, 0  ;;  %v590_v2 = vadd.f32 %v3942_v13, %v3771_v26  ;;  %v4078_v26 = vld [vmem:[%s5574_s2] sm:$0xf]  ;;  %v1237_v13 = vperm.slane %v4071_v50, 1  ;;  %s3634_s2 = smov 8  }
 0x228   :  { %v4082_v56 = vperm.slane %v4078_v26, 0 }
 0x229   :  { %v610_v47 = vadd.f32 1.0, %v590_v2 }
 0x22b   :  { %v614_v57 = vmul.f32 8.0, %v610_v47 }
 0x22e   :  { %1179 = vperm.xlu2 %3560, %v1174_v10  }
 0x22f   :  { %897 = vperm.xlu1 %3562, %v892_v54   ;;  %904 = vperm.xlu0 %3561, %v899_v48  }
 0x236   :  { %1036 = vperm.xlu2 %3560, %v1031_v52   ;;  %v941_v52 = vperm.slane %v4057_v59, 1 }
 0x237   :  { %1200 = vperm.xlu1 %3562, %v1195_v53   ;;  %1043 = vperm.xlu0 %3561, %v1038_v58   ;;  %v1073_v53 = vperm.slane %v4053_v37, 1 }
 0x238   :  { %v4018_v16 = vpop.permute.xlu2 %687 }
 0x239   :  { %vm798_vm0 = vcmp.eq.s32.totalorder %v4082_v56, %v4018_v16 }
 0x23e   :  { %1193 = vperm.xlu2 %3560, %v1188_v61   ;;  %v618_v61 = vmax.f32 %v614_v57, 0.0 }
 0x23f   :  { %911 = vperm.xlu1 %3562, %v906_v63   ;;  %918 = vperm.xlu0 %3561, %v913_v8   ;;  %v780_v63 = vperm.slane %v4046_v33, 2 }
 0x240   :  { %v4024_v44 = vpop.permute.xlu2 %708  ;;  %v4091_v8 = vmin.f32 %v618_v61, 15.0 }
 0x241   :  { %vm801_vm12 = vcmp.eq.s32.totalorder %v4082_v56, %v4024_v44 }
 0x246   :  { %1050 = vperm.xlu2 %3560, %v1045_v9   ;;  %v1080_v9 = vperm.slane %v4053_v37, 2 }
 0x247   :  { %1214 = vperm.xlu1 %3562, %v1209_v14   ;;  %764 = vperm.xlu0 %3561, %v759_v5   ;;  %v5580_v14 = vmov 0.0  }
 0x248   :  { %v4027_v1 = vpop.permute.xlu2 %715  ;;  %v3247_v16 = vsel %vm798_vm0, 1.0, %v5580_v14  ;;  %v3250_v57 = vsel %vm801_vm12, 1.0, %v5580_v14 }
 0x24e   :  { %1207 = vperm.xlu2 %3560, %v1202_v24  }
 0x24f   :  { %1064 = vperm.xlu1 %3562, %v1059_v15   ;;  %925 = vperm.xlu0 %3561, %v920_v20   ;;  %v650_v20 = vceil.f32 %v4091_v8 }
 0x250   :  { %v4031_v22 = vpop.permute.xlu2 %729  ;;  %v695_v42 = vpop.permute.xlu0 %694 }
 0x251   :  { %v4033_v18 = vpop.permute.xlu1 %701  ;;  %vm799_vm7 = vcmp.eq.s32.totalorder %v4082_v56, %v695_v42  ;;  %v662_v42 = vfloor.f32 %v4091_v8 }
 0x252   :  { %v3248_v15 = vsel %vm799_vm7, 1.0, %v5580_v14  ;;  %vm800_vm10 = vcmp.eq.s32.totalorder %v4082_v56, %v4033_v18 }
 0x253   :  { %v3249_v47 = vsel %vm800_vm10, 1.0, %v5580_v14 }
 0x256   :  { %1057 = vperm.xlu2 %3560, %v1052_v41  }
 0x257   :  { %1221 = vperm.xlu1 %3562, %v1216_v43   ;;  %1228 = vperm.xlu0 %3561, %v1223_v35   ;;  %v591_v35 = vadd.f32 %v3958_v21, %v3778_v34  ;;  %v1244_v34 = vperm.slane %v4071_v50, 2  ;;  %v666_v21 = vmax.f32 %v662_v42, 0.0 }
 0x258   :  { %v4042_v49 = vpop.permute.xlu2 %750 }
 0x259   :  { %v4044_v29 = vpop.permute.xlu1 %722 }
 0x25e   :  { %932 = vperm.xlu2 %3560, %v927_v36   ;;  %v4106_v36 = vmax.f32 %v650_v20, 0.0 }
 0x25f   :  { %778 = vperm.xlu1 %3562, %v773_v31   ;;  %1071 = vperm.xlu0 %3561, %v1066_v40   ;;  %v948_v40 = vperm.slane %v4057_v59, 2 }
 0x260   :  { %v995_v11 = vpop.permute.xlu2 %994  ;;  %v658_v23 = vmin.f32 %v4106_v36, 15.0 }
 0x261   :  { %v4055_v39 = vpop.permute.xlu1 %736  ;;  %v4067_v10 = vpop.permute.xlu0 %743  ;;  %vm1095_vm8 = vcmp.eq.s32.totalorder %v4082_v56, %v995_v11  ;;  %v611_v11 = vadd.f32 1.0, %v591_v35 }
 0x262   :  { %v3264_v19 = vsel %vm1095_vm8, 1.0, %v5580_v14  ;;  %v4120_v2 = vcvt.f32.s32 %v658_v23 }
 0x266   :  { %771 = vperm.xlu2 %3560, %v766_v30   ;;  %v615_v30 = vmul.f32 8.0, %v611_v11 }
 0x267   :  { %939 = vperm.xlu1 %3562, %v934_v4   ;;  %946 = vperm.xlu0 %3561, %v941_v52  }
 0x268   :  { %v1152_v54 = vpop.permute.xlu2 %1151 }
 0x269   :  { %v4069_v48 = vpop.permute.xlu1 %757  ;;  %v988_v60 = vpop.permute.xlu0 %987 }
 0x26a   :  { %vm1094_vm6 = vcmp.eq.s32.totalorder %v4082_v56, %v988_v60 }
 0x26b   :  { %v3263_v55 = vsel %vm1094_vm6, 1.0, %v5580_v14 }
 0x26c   :  { %v1258_v25 = vmul.f32 %v3263_v55, %v1152_v54  ;;  %v670_v54 = vmin.f32 %v666_v21, 15.0 }
 0x26e   :  { %1078 = vperm.xlu2 %3560, %v1073_v53   ;;  %v619_v53 = vmax.f32 %v615_v30, 0.0 }
 0x26f   :  { %1242 = vperm.xlu1 %3562, %v1237_v13   ;;  %785 = vperm.xlu0 %3561, %v780_v63  }
 0x270   :  { %v4084_v58 = vpop.permute.xlu2 %1008 }
 0x271   :  { %v856_v62 = vpop.permute.xlu1 %855  ;;  %v863_v12 = vpop.permute.xlu0 %862  ;;  %vm1097_vm13 = vcmp.eq.s32.totalorder %v4082_v56, %v4084_v58  ;;  %v4132_v58 = vcvt.f32.s32 %v670_v54 }
 0x272   :  { %v962_v5 = vmul.f32 %v3247_v16, %v856_v62  ;;  %v963_v41 = vmul.f32 %v3248_v15, %v863_v12  ;;  %v3266_v13 = vsel %vm1097_vm13, 1.0, %v5580_v14  ;;  %v675_v62 = vrot.slane %v4078_v26, 1 }
 0x273   :  { %v4138_v12 = vmin.f32 %v619_v53, 15.0 }
 0x274   :  { %v1274_v32 = vadd.f32 %v1258_v25, %v962_v5  ;;  %v592_v5 = vadd.f32 %v3975_v45, %v3812_v7 }
 0x275   :  { %v651_v25 = vceil.f32 %v4138_v12 }
 0x276   :  { %1235 = vperm.xlu2 %3560, %v1230_v3   ;;  %v612_v20 = vadd.f32 1.0, %v592_v5 }
 0x277   :  { %1085 = vperm.xlu1 %3562, %v1080_v9   ;;  %1092 = vperm.xlu0 %3561, %v1087_v6   ;;  %v1251_v9 = vperm.slane %v4071_v50, 3  ;;  %v663_v50 = vfloor.f32 %v4138_v12 }
 0x278   :  { %v1166_v24 = vpop.permute.xlu2 %1165  ;;  %v616_v6 = vmul.f32 8.0, %v612_v20 }
 0x279   :  { %v1159_v17 = vpop.permute.xlu1 %1158  ;;  %v1002_v27 = vpop.permute.xlu0 %1001  ;;  %v667_v7 = vmax.f32 %v663_v50, 0.0 }
 0x27a   :  { %v1259_v43 = vmul.f32 %v3264_v19, %v1159_v17  ;;  %vm1096_vm11 = vcmp.eq.s32.totalorder %v4082_v56, %v1002_v27  ;;  %v4151_v19 = vsub.f32 %v4091_v8, %v670_v54  ;;  %v620_v21 = vmax.f32 %v616_v6, 0.0 }
 0x27b   :  { %v3265_v18 = vsel %vm1096_vm11, 1.0, %v5580_v14 }
 0x27c   :  { %v1275_v28 = vadd.f32 %v1259_v43, %v963_v41  ;;  %v1260_v60 = vmul.f32 %v3265_v18, %v1166_v24  ;;  %v4144_v24 = vperm.slane %v675_v62, 0  ;;  %v593_v18 = vadd.f32 %v3989_v46, %v3854_v0 }
 0x27e   :  { %792 = vperm.xlu2 %3560, %v787_v38   ;;  %v1290_v31 = vpack.c.bf16 %v1275_v28, %v1274_v32  ;;  %vm802_vm14 = vcmp.eq.s32.totalorder %v4144_v24, %v4027_v1  ;;  %vm803_vm1 = vcmp.eq.s32.totalorder %v4144_v24, %v4044_v29  ;;  %v4173_v28 = vsub.f32 %v658_v23, %v4091_v8 }
 0x27f   :  { %960 = vperm.xlu1 %3562, %v955_v51   ;;  %1249 = vperm.xlu0 %3561, %v1244_v34   ;;  %v3251_v41 = vsel %vm802_vm14, 1.0, %v5580_v14  ;;  %v3252_v29 = vsel %vm803_vm1, 1.0, %v5580_v14  ;;  %v671_v51 = vmin.f32 %v667_v7, 15.0  ;;  %vm804_vm3 = vcmp.eq.s32.totalorder %v4144_v24, %v4031_v22 }
 0x280   :  { %3295 = vmatmul.msk.bf16.vlgmr.msra.gmra.mxu0 %vm1330_vm9, %v1290_v31  ;;  %v4110_v37 = vpop.permute.xlu2 %1022  ;;  %vm805_vm5 = vcmp.eq.s32.totalorder %v4144_v24, %v4055_v39  ;;  %v3253_v53 = vsel %vm804_vm3, 1.0, %v5580_v14 }
 0x281   :  { %v870_v33 = vpop.permute.xlu1 %869  ;;  %v877_v4 = vpop.permute.xlu0 %876  ;;  %vm1099_vm2 = vcmp.eq.s32.totalorder %v4144_v24, %v4110_v37  ;;  %v655_v37 = vmax.f32 %v651_v25, 0.0  ;;  %v4178_v34 = vcvt.f32.s32 %v671_v51  ;;  %v3254_v39 = vsel %vm805_vm5, 1.0, %v5580_v14 }
 0x282   :  { %v964_v59 = vmul.f32 %v3249_v47, %v870_v33  ;;  %v965_v56 = vmul.f32 %v3250_v57, %v877_v4  ;;  %v3268_v35 = vsel %vm1099_vm2, 1.0, %v5580_v14  ;;  %v4187_v4 = vmin.f32 %v620_v21, 15.0 }
 0x283   :  { %v659_v8 = vmin.f32 %v655_v37, 15.0  ;;  %v4199_v47 = vsub.f32 %v4138_v12, %v671_v51  ;;  %v613_v57 = vadd.f32 1.0, %v593_v18 }
 0x284   :  { %v1276_v63 = vadd.f32 %v1260_v60, %v964_v59  ;;  %v652_v22 = vceil.f32 %v4187_v4 }
 0x285   :  { %v4189_v54 = vcvt.f32.s32 %v659_v8 }
 0x286   :  { %953 = vperm.xlu2 %3560, %v948_v40  }
 0x287   :  { %1414 = vrot.lane.b32.xlu1 %v4120_v2, %s3634_s2  ;;  %1456 = vrot.lane.b32.xlu0 %v4132_v58, %s3634_s2 }
 0x288   :  { %v1180_v52 = vpop.permute.xlu2 %1179 }
 0x289   :  { %v1173_v44 = vpop.permute.xlu1 %1172  ;;  %v1016_v55 = vpop.permute.xlu0 %1015 }
 0x28a   :  { %v1261_v61 = vmul.f32 %v3266_v13, %v1173_v44  ;;  %vm1098_vm15 = vcmp.eq.s32.totalorder %v4144_v24, %v1016_v55  ;;  %v4214_v44 = vsub.f32 %v659_v8, %v4138_v12  ;;  %v617_v55 = vmul.f32 8.0, %v613_v57 }
 0x28b   :  { %v3267_v1 = vsel %vm1098_vm15, 1.0, %v5580_v14 }
 0x28c   :  { %v1277_v3 = vadd.f32 %v1261_v61, %v965_v56  ;;  %v1262_v27 = vmul.f32 %v3267_v1, %v1180_v52  ;;  %v621_v50 = vmax.f32 %v617_v55, 0.0 }
 0x28e   :  { %1256 = vperm.xlu2 %3560, %v1251_v9   ;;  %v1291_v16 = vpack.c.bf16 %v1277_v3, %v1276_v63  ;;  %v656_v63 = vmax.f32 %v652_v22, 0.0  ;;  %v4231_v1 = vmin.f32 %v621_v50, 15.0 }
 0x28f   :  { %1464 = vrot.lane.b32.xlu1 %v4132_v58, %s3635_s29  ;;  %1500 = vrot.lane.b32.xlu0 %v4151_v19, %s3634_s2 }
 0x290   :  { %3296 = vmatmul.msk.bf16.gmra.mxu0 %vm1330_vm9, %v1291_v16  ;;  %v4147_v15 = vpop.permute.xlu2 %1036  ;;  %v676_v16 = vrot.slane %v4078_v26, 2  ;;  %v660_v12 = vmin.f32 %v656_v63, 15.0  ;;  %v653_v51 = vceil.f32 %v4231_v1 }
 0x291   :  { %v884_v17 = vpop.permute.xlu1 %883  ;;  %v891_v45 = vpop.permute.xlu0 %890  ;;  %vm1101_vm0 = vcmp.eq.s32.totalorder %v4144_v24, %v4147_v15  ;;  %v664_v15 = vfloor.f32 %v4187_v4 }
 0x292   :  { %v966_v43 = vmul.f32 %v3251_v41, %v884_v17  ;;  %v967_v31 = vmul.f32 %v3252_v29, %v891_v45  ;;  %v3270_v60 = vsel %vm1101_vm0, 1.0, %v5580_v14  ;;  %v796_v7 = vperm.slane %v676_v16, 0 }
 0x293   :  { %v4226_v45 = vcvt.f32.s32 %v660_v12  ;;  %v668_v25 = vmax.f32 %v664_v15, 0.0  ;;  %v4249_v21 = vsub.f32 %v660_v12, %v4187_v4 }
 0x294   :  { %v1278_v11 = vadd.f32 %v1262_v27, %v966_v43  ;;  %vm806_vm6 = vcmp.eq.s32.totalorder %v796_v7, %v4067_v10  ;;  %vm807_vm8 = vcmp.eq.s32.totalorder %v796_v7, %v4042_v49  ;;  %vm808_vm12 = vcmp.eq.s32.totalorder %v796_v7, %v4069_v48 }
 0x295   :  { %v672_v6 = vmin.f32 %v668_v25, 15.0  ;;  %5598 = vst [vmem:[#allocation5_spill] sm:$0xff] %v4249_v21 }
 0x296   :  { %1422 = vrot.lane.b32.xlu2 %v4120_v2, %s3635_s29 }
 0x297   :  { %1512 = vrot.lane.b32.xlu1 %v4151_v19, %s3635_s29  ;;  %1568 = vrot.lane.b32.xlu0 %v4173_v28, %s3635_s29  ;;  %v4258_v22 = vsub.f32 %v4187_v4, %v672_v6 }
 0x298   :  { %v1194_v32 = vpop.permute.xlu2 %1193 }
 0x299   :  { %v1187_v38 = vpop.permute.xlu1 %1186  ;;  %v1030_v40 = vpop.permute.xlu0 %1029 }
 0x29a   :  { %v1263_v42 = vmul.f32 %v3268_v35, %v1187_v38  ;;  %vm1100_vm4 = vcmp.eq.s32.totalorder %v4144_v24, %v1030_v40  ;;  %v3256_v38 = vsel %vm807_vm8, 1.0, %v5580_v14  ;;  %v657_v40 = vmax.f32 %v653_v51, 0.0 }
 0x29b   :  { %v3269_v52 = vsel %vm1100_vm4, 1.0, %v5580_v14  ;;  %vm1435_vm8 = vcmask 130048  }
 0x29c   :  { %v1279_v33 = vadd.f32 %v1263_v42, %v967_v31  ;;  %v1264_v56 = vmul.f32 %v3269_v52, %v1194_v32  ;;  %v3255_v32 = vsel %vm806_vm6, 1.0, %v5580_v14  ;;  %v4244_v42 = vcvt.f32.s32 %v672_v6 }
 0x29e   :  { %1556 = vrot.lane.b32.xlu2 %v4173_v28, %s3634_s2  ;;  %v1292_v36 = vpack.c.bf16 %v1279_v33, %v1278_v11 }
 0x29f   :  { %1458 = vrot.lane.b32.xlu1 %v4178_v34, %s3634_s2  ;;  %1424 = vrot.lane.b32.xlu0 %v4189_v54, %s3635_s29 }
 0x2a0   :  { %3297 = vmatmul.msk.bf16.gmra.mxu0 %vm1330_vm9, %v1292_v36  ;;  %v4185_v23 = vpop.permute.xlu2 %1050 }
 0x2a1   :  { %v898_v30 = vpop.permute.xlu1 %897  ;;  %v905_v59 = vpop.permute.xlu0 %904  ;;  %vm1103_vm10 = vcmp.eq.s32.totalorder %v796_v7, %v4185_v23  ;;  %v665_v23 = vfloor.f32 %v4231_v1 }
 0x2a2   :  { %v968_v0 = vmul.f32 %v3253_v53, %v898_v30  ;;  %v969_v61 = vmul.f32 %v3254_v39, %v905_v59  ;;  %v3272_v49 = vsel %vm1103_vm10, 1.0, %v5580_v14  ;;  %v661_v59 = vmin.f32 %v657_v40, 15.0 }
 0x2a3   :  { %v669_v52 = vmax.f32 %v665_v23, 0.0 }
 0x2a4   :  { %v1280_v3 = vadd.f32 %v1264_v56, %v968_v0  ;;  %v4262_v53 = vcvt.f32.s32 %v661_v59 }
 0x2a6   :  { %1416 = vrot.lane.b32.xlu2 %v4189_v54, %s3634_s2  ;;  %5599 = vst [vmem:[#allocation6_spill] sm:$0xff] %v4262_v53 }
 0x2a7   :  { %1502 = vrot.lane.b32.xlu1 %v4199_v47, %s3634_s2  ;;  %1558 = vrot.lane.b32.xlu0 %v4214_v44, %s3634_s2 }
 0x2a8   :  { %v1208_v46 = vpop.permute.xlu2 %1207 }
 0x2a9   :  { %v1201_v13 = vpop.permute.xlu1 %1200  ;;  %v1044_v5 = vpop.permute.xlu0 %1043 }
 0x2aa   :  { %v1265_v62 = vmul.f32 %v3270_v60, %v1201_v13  ;;  %vm1102_vm7 = vcmp.eq.s32.totalorder %v796_v7, %v1044_v5 }
 0x2ab   :  { %v3271_v43 = vsel %vm1102_vm7, 1.0, %v5580_v14  ;;  %vm1430_vm7 = vcmask 64512  }
 0x2ac   :  { %v1281_v9 = vadd.f32 %v1265_v62, %v969_v61  ;;  %v1266_v27 = vmul.f32 %v3271_v43, %v1208_v46  ;;  %v673_v46 = vmin.f32 %v669_v52, 15.0  ;;  %v3257_v61 = vsel %vm808_vm12, 1.0, %v5580_v14 }
 0x2ae   :  { %1466 = vrot.lane.b32.xlu2 %v4178_v34, %s3635_s29  ;;  %v1293_v24 = vpack.c.bf16 %v1281_v9, %v1280_v3  ;;  %v4269_v39 = vcvt.f32.s32 %v673_v46 }
 0x2af   :  { %1570 = vrot.lane.b32.xlu1 %v4214_v44, %s3635_s29  ;;  %1418 = vrot.lane.b32.xlu0 %v4226_v45, %s3634_s2 }
 0x2b0   :  { %3298 = vmatmul.msk.bf16.gmra.mxu0 %vm1330_vm9, %v1293_v24  ;;  %v1058_v17 = vpop.permute.xlu2 %1057  ;;  %5600 = vst [vmem:[#allocation7_spill] sm:$0xff] %v4269_v39  ;;  %v4282_v24 = vsub.f32 %v4231_v1, %v673_v46 }
 0x2b1   :  { %v912_v20 = vpop.permute.xlu1 %911  ;;  %v919_v41 = vpop.permute.xlu0 %918  ;;  %vm1104_vm11 = vcmp.eq.s32.totalorder %v796_v7, %v1058_v17  ;;  %v677_v17 = vrot.slane %v4078_v26, 3 }
 0x2b2   :  { %v970_v10 = vmul.f32 %v3255_v32, %v912_v20  ;;  %v971_v31 = vmul.f32 %v3256_v38, %v919_v41  ;;  %v3273_v13 = vsel %vm1104_vm11, 1.0, %v5580_v14  ;;  %5601 = vst [vmem:[#allocation8_spill] sm:$0xff] %v4282_v24  ;;  %v4293_v41 = vsub.f32 %v661_v59, %v4231_v1 }
 0x2b3   :  { %v797_v20 = vperm.slane %v677_v17, 0  ;;  %v4329_v17 = vld [vmem:[%s5575_s3 + $0x10] sm:$0xff] }
 0x2b4   :  { %v1282_v11 = vadd.f32 %v1266_v27, %v970_v10  ;;  %5602 = vst [vmem:[#allocation9_spill] sm:$0xff] %v4293_v41 }
 0x2b6   :  { %1514 = vrot.lane.b32.xlu2 %v4199_v47, %s3635_s29 }
 0x2b7   :  { %1426 = vrot.lane.b32.xlu1 %v4226_v45, %s3635_s29  ;;  %1468 = vrot.lane.b32.xlu0 %v4244_v42, %s3635_s29 }
 0x2b8   :  { %v933_v29 = vpop.permute.xlu2 %932 }
 0x2b9   :  { %v1215_v35 = vpop.permute.xlu1 %1214  ;;  %v765_v8 = vpop.permute.xlu0 %764 }
 0x2ba   :  { %v1267_v37 = vmul.f32 %v3272_v49, %v1215_v35  ;;  %vm809_vm13 = vcmp.eq.s32.totalorder %v796_v7, %v765_v8 }
 0x2bb   :  { %v3258_v56 = vsel %vm809_vm13, 1.0, %v5580_v14 }
 0x2bc   :  { %v1283_v33 = vadd.f32 %v1267_v37, %v971_v31  ;;  %v973_v48 = vmul.f32 %v3258_v56, %v933_v29 }
 0x2be   :  { %1460 = vrot.lane.b32.xlu2 %v4244_v42, %s3634_s2  ;;  %v1294_v36 = vpack.c.bf16 %v1283_v33, %v1282_v11 }
 0x2bf   :  { %1560 = vrot.lane.b32.xlu1 %v4249_v21, %s3634_s2  ;;  %1516 = vrot.lane.b32.xlu0 %v4258_v22, %s3635_s29 }
 0x2c0   :  { %3299 = vmatmul.msk.bf16.gmra.mxu0 %vm1330_vm9, %v1294_v36  ;;  %v772_v30 = vpop.permute.xlu2 %771 }
 0x2c1   :  { %v1065_v18 = vpop.permute.xlu1 %1064  ;;  %v926_v0 = vpop.permute.xlu0 %925  ;;  %vm810_vm15 = vcmp.eq.s32.totalorder %v797_v20, %v772_v30 }
 0x2c2   :  { %vm1105_vm14 = vcmp.eq.s32.totalorder %v796_v7, %v1065_v18  ;;  %v972_v62 = vmul.f32 %v3257_v61, %v926_v0  ;;  %v3259_v43 = vsel %vm810_vm15, 1.0, %v5580_v14 }
 0x2c3   :  { %v3274_v63 = vsel %vm1105_vm14, 1.0, %v5580_v14 }
 0x2c6   :  { %1504 = vrot.lane.b32.xlu2 %v4258_v22, %s3634_s2 }
 0x2c7   :  { %1420 = vrot.lane.b32.xlu1 %v4262_v53, %s3634_s2  ;;  %1462 = vrot.lane.b32.xlu0 %v4269_v39, %s3634_s2 }
 0x2c8   :  { %v1079_v57 = vpop.permute.xlu2 %1078 }
 0x2c9   :  { %v1222_v4 = vpop.permute.xlu1 %1221  ;;  %v1229_v3 = vpop.permute.xlu0 %1228  ;;  %vm1107_vm2 = vcmp.eq.s32.totalorder %v797_v20, %v1079_v57 }
 0x2ca   :  { %v1268_v60 = vmul.f32 %v3273_v13, %v1222_v4  ;;  %v1269_v55 = vmul.f32 %v3274_v63, %v1229_v3  ;;  %v3276_v38 = vsel %vm1107_vm2, 1.0, %v5580_v14 }
 0x2cc   :  { %v1284_v9 = vadd.f32 %v1268_v60, %v972_v62  ;;  %v1285_v5 = vadd.f32 %v1269_v55, %v973_v48 }
 0x2ce   :  { %1572 = vrot.lane.b32.xlu2 %v4249_v21, %s3635_s29  ;;  %v1295_v15 = vpack.c.bf16 %v1285_v5, %v1284_v9 }
 0x2cf   :  { %1470 = vrot.lane.b32.xlu1 %v4269_v39, %s3635_s29  ;;  %1506 = vrot.lane.b32.xlu0 %v4282_v24, %s3634_s2 }
 0x2d0   :  { %v1236_v16 = vpop.permute.xlu2 %1235  ;;  %3300 = vmatmul.msk.bf16.gmra.mxu0 %vm1330_vm9, %v1295_v15  ;;  %v4321_v15 = vld [vmem:[%s5575_s3 + $0x28] sm:$0xff] }
 0x2d1   :  { %v779_v12 = vpop.permute.xlu1 %778  ;;  %v1072_v50 = vpop.permute.xlu0 %1071 }
 0x2d2   :  { %vm1106_vm1 = vcmp.eq.s32.totalorder %v797_v20, %v1072_v50  ;;  %vm811_vm3 = vcmp.eq.s32.totalorder %v797_v20, %v779_v12  ;;  %v4316_v12 = vld [vmem:[%s5575_s3 + $0x20] sm:$0xff] }
 0x2d3   :  { %v3275_v6 = vsel %vm1106_vm1, 1.0, %v5580_v14  ;;  %v3260_v1 = vsel %vm811_vm3, 1.0, %v5580_v14 }
 0x2d4   :  { %v1270_v35 = vmul.f32 %v3275_v6, %v1236_v16 }
 0x2d6   :  { %1428 = vrot.lane.b32.xlu2 %v4262_v53, %s3635_s29 }
 0x2d7   :  { %1518 = vrot.lane.b32.xlu1 %v4282_v24, %s3635_s29  ;;  %1574 = vrot.lane.b32.xlu0 %v4293_v41, %s3635_s29 }
 0x2d8   :  { %v793_v7 = vpop.permute.xlu2 %792 }
 0x2d9   :  { %v940_v25 = vpop.permute.xlu1 %939  ;;  %v947_v26 = vpop.permute.xlu0 %946  ;;  %vm813_vm4 = vcmp.eq.s32.totalorder %v797_v20, %v793_v7 }
 0x2da   :  { %v974_v32 = vmul.f32 %v3259_v43, %v940_v25  ;;  %v975_v49 = vmul.f32 %v3260_v1, %v947_v26  ;;  %v3262_v18 = vsel %vm813_vm4, 1.0, %v5580_v14  ;;  %v4350_v43 = vld [vmem:[%s5575_s3 + $0x18] sm:$0xff] }
 0x2dc   :  { %v1286_v27 = vadd.f32 %v1270_v35, %v974_v32 }
 0x2de   :  { %1562 = vrot.lane.b32.xlu2 %v4293_v41, %s3634_s2 }
 0x2e0   :  { %v954_v10 = vpop.permute.xlu2 %953 }
 0x2e1   :  { %v1243_v29 = vpop.permute.xlu1 %1242  ;;  %v786_v37 = vpop.permute.xlu0 %785 }
 0x2e2   :  { %v1271_v51 = vmul.f32 %v3276_v38, %v1243_v29  ;;  %vm812_vm0 = vcmp.eq.s32.totalorder %v797_v20, %v786_v37 }
 0x2e3   :  { %v3261_v52 = vsel %vm812_vm0, 1.0, %v5580_v14 }
 0x2e4   :  { %v1287_v31 = vadd.f32 %v1271_v51, %v975_v49  ;;  %v976_v4 = vmul.f32 %v3261_v52, %v954_v10 }
 0x2e6   :  { %v1296_v11 = vpack.c.bf16 %v1287_v31, %v1286_v27 }
 0x2e8   :  { %3301 = vmatmul.msk.bf16.vlgmr.msra.gmra.mxu2 %vm1330_vm9, %v1296_v11  ;;  %v1257_v33 = vpop.permute.xlu2 %1256 }
 0x2e9   :  { %v1086_v40 = vpop.permute.xlu1 %1085  ;;  %v1093_v8 = vpop.permute.xlu0 %1092 }
 0x2ea   :  { %vm1109_vm5 = vcmp.eq.s32.totalorder %v797_v20, %v1093_v8  ;;  %vm1108_vm6 = vcmp.eq.s32.totalorder %v797_v20, %v1086_v40 }
 0x2eb   :  { %v3278_v30 = vsel %vm1109_vm5, 1.0, %v5580_v14  ;;  %v3277_v46 = vsel %vm1108_vm6, 1.0, %v5580_v14 }
 0x2ec   :  { %v1273_v0 = vmul.f32 %v3278_v30, %v1257_v33 }
 0x2f0   :  { %v1423_v36 = vpop.permute.xlu2 %1422 }
 0x2f1   :  { %v961_v23 = vpop.permute.xlu1 %960  ;;  %v1250_v57 = vpop.permute.xlu0 %1249 }
 0x2f2   :  { %v977_v59 = vmul.f32 %v3262_v18, %v961_v23  ;;  %v1272_v60 = vmul.f32 %v3277_v46, %v1250_v57 }
 0x2f4   :  { %v1289_v13 = vadd.f32 %v1273_v0, %v977_v59  ;;  %v1288_v61 = vadd.f32 %v1272_v60, %v976_v4 }
 0x2f6   :  { %v1297_v3 = vpack.c.bf16 %v1289_v13, %v1288_v61 }
 0x2f8   :  { %v1557_v56 = vpop.permute.xlu2 %1556  ;;  %3302 = vmatmul.msk.bf16.vlgmr.msra.gmra.mxu3 %vm1330_vm9, %v1297_v3 }
 0x2f9   :  { %v1415_v62 = vpop.permute.xlu1 %1414  ;;  %v4337_v7 = vsel %vm1430_vm7, %v4173_v28, %v1557_v56  ;;  %v1457_v25 = vpop.permute.xlu0 %1456 }
 0x2fa   :  { %v1431_v63 = vsel %vm1430_vm7, %v4120_v2, %v1415_v62  ;;  %v1472_v28 = vsel %vm1430_vm7, %v4132_v58, %v1457_v25 }
 0x2fb   :  { %v1436_v48 = vsel %vm1435_vm8, %v1431_v63, %v1423_v36 }
 0x2fc   :  { %v1440_v9 = vrot.slane %v1436_v48, 1  ;;  %v1441_v55 = vrot.slane %v1436_v48, 2  ;;  %v1442_v16 = vrot.slane %v1436_v48, 3  ;;  %v4311_v5 = vperm.slane %v1436_v48, 0 }
 0x2fd   :  { %v4324_v2 = vpop.f32.mrf.mxu0 }
 0x2fe   :  { %v4331_v50 = vperm.slane %v1440_v9, 0  ;;  %v4333_v20 = vperm.slane %v1441_v55, 0  ;;  %v4339_v26 = vperm.slane %v1442_v16, 0  ;;  %vm1624_vm9 = vcmp.eq.s32.totalorder %v4316_v12, %v4311_v5 }
 0x2ff   :  { %vm1625_vm10 = vcmp.eq.s32.totalorder %v4321_v15, %v4311_v5  ;;  %v3307_v10 = vsel %vm1624_vm9, 1.0, %v5580_v14  ;;  %vm1622_vm12 = vcmp.eq.s32.totalorder %v4329_v17, %v4311_v5  ;;  %vm1623_vm1 = vcmp.eq.s32.totalorder %v4350_v43, %v4311_v5 }
 0x300   :  { %v1417_v32 = vpop.permute.xlu2 %1416  ;;  %vm1630_vm11 = vcmp.eq.s32.totalorder %v4316_v12, %v4331_v50  ;;  %v3308_v38 = vsel %vm1625_vm10, 1.0, %v5580_v14  ;;  %vm1631_vm13 = vcmp.eq.s32.totalorder %v4321_v15, %v4331_v50  ;;  %vm1636_vm14 = vcmp.eq.s32.totalorder %v4316_v12, %v4333_v20 }
 0x301   :  { %v1465_v1 = vpop.permute.xlu1 %1464  ;;  %v4361_v29 = vsel %vm1430_vm7, %v4189_v54, %v1417_v32  ;;  %v3313_v35 = vsel %vm1630_vm11, 1.0, %v5580_v14  ;;  %vm1637_vm15 = vcmp.eq.s32.totalorder %v4321_v15, %v4333_v20  ;;  %v3314_v31 = vsel %vm1631_vm13, 1.0, %v5580_v14  ;;  %v1501_v18 = vpop.permute.xlu0 %1500 }
 0x302   :  { %v1476_v58 = vsel %vm1435_vm8, %v1472_v28, %v1465_v1  ;;  %v3319_v37 = vsel %vm1636_vm14, 1.0, %v5580_v14  ;;  %v3320_v11 = vsel %vm1637_vm15, 1.0, %v5580_v14  ;;  %v3305_v33 = vsel %vm1622_vm12, 1.0, %v5580_v14 }
 0x303   :  { %v1480_v54 = vrot.slane %v1476_v58, 1  ;;  %v1481_v49 = vrot.slane %v1476_v58, 2  ;;  %v1482_v51 = vrot.slane %v1476_v58, 3  ;;  %v4374_v27 = vperm.slane %v1476_v58, 0 }
 0x304   :  { %v3306_v23 = vsel %vm1623_vm1, 1.0, %v5580_v14  ;;  %vm1628_vm4 = vcmp.eq.s32.totalorder %v4329_v17, %v4331_v50  ;;  %v1524_v0 = vsel %vm1430_vm7, %v4151_v19, %v1501_v18  ;;  %vm1629_vm12 = vcmp.eq.s32.totalorder %v4350_v43, %v4331_v50 }
 0x305   :  { %v4383_v40 = vperm.slane %v1480_v54, 0  ;;  %v4385_v8 = vperm.slane %v1481_v49, 0  ;;  %v4387_v36 = vpop.f32.mrf.mxu0  ;;  %vm2056_vm2 = vcmp.eq.s32.totalorder %v4316_v12, %v4374_v27  ;;  %v4392_v30 = vperm.slane %v1482_v51, 0 }
 0x306   :  { %5603 = vst [vmem:[#allocation10_spill] sm:$0xff] %v4387_v36  ;;  %vm2057_vm3 = vcmp.eq.s32.totalorder %v4321_v15, %v4374_v27  ;;  %v3403_v52 = vsel %vm2056_vm2, 1.0, %v5580_v14  ;;  %vm2054_vm6 = vcmp.eq.s32.totalorder %v4329_v17, %v4374_v27  ;;  %vm2055_vm11 = vcmp.eq.s32.totalorder %v4350_v43, %v4374_v27 }
 0x307   :  { %vm2062_vm5 = vcmp.eq.s32.totalorder %v4316_v12, %v4383_v40  ;;  %vm2063_vm0 = vcmp.eq.s32.totalorder %v4321_v15, %v4383_v40  ;;  %v3404_v57 = vsel %vm2057_vm3, 1.0, %v5580_v14  ;;  %vm2068_vm9 = vcmp.eq.s32.totalorder %v4316_v12, %v4385_v8 }
 0x308   :  { %v1467_v46 = vpop.permute.xlu2 %1466  ;;  %vm2069_vm10 = vcmp.eq.s32.totalorder %v4321_v15, %v4385_v8  ;;  %v3409_v13 = vsel %vm2062_vm5, 1.0, %v5580_v14  ;;  %v3410_v60 = vsel %vm2063_vm0, 1.0, %v5580_v14  ;;  %v4417_v56 = vsel %vm2068_vm9, 1.0, %v5580_v14 }
 0x309   :  { %v1513_v4 = vpop.permute.xlu1 %1512  ;;  %v4423_v61 = vsel %vm2069_vm10, 1.0, %v5580_v14  ;;  %v3401_v62 = vsel %vm2054_vm6, 1.0, %v5580_v14  ;;  %v4431_v55 = vsel %vm2055_vm11, 1.0, %v5580_v14  ;;  %v3311_v16 = vsel %vm1628_vm4, 1.0, %v5580_v14  ;;  %v1569_v49 = vpop.permute.xlu0 %1568 }
 0x30a   :  { %v1528_v19 = vsel %vm1435_vm8, %v1524_v0, %v1513_v4  ;;  %v3312_v25 = vsel %vm1629_vm12, 1.0, %v5580_v14  ;;  %vm2060_vm13 = vcmp.eq.s32.totalorder %v4329_v17, %v4383_v40  ;;  %vm2061_vm14 = vcmp.eq.s32.totalorder %v4350_v43, %v4383_v40 }
 0x30b   :  { %v1536_v63 = vrot.slane %v1528_v19, 1  ;;  %v1537_v3 = vrot.slane %v1528_v19, 2  ;;  %v1538_v48 = vrot.slane %v1528_v19, 3  ;;  %v4428_v9 = vperm.slane %v1528_v19, 0 }
 0x30c   :  { %v1584_v19 = vsel %vm1435_vm8, %v4337_v7, %v1569_v49  ;;  %vm1634_vm15 = vcmp.eq.s32.totalorder %v4329_v17, %v4333_v20  ;;  %vm1635_vm1 = vcmp.eq.s32.totalorder %v4350_v43, %v4333_v20  ;;  %vm2066_vm2 = vcmp.eq.s32.totalorder %v4329_v17, %v4385_v8 }
 0x30d   :  { %v4440_v28 = vperm.slane %v1536_v63, 0  ;;  %v4442_v32 = vperm.slane %v1537_v3, 0  ;;  %v4444_v1 = vperm.slane %v1538_v48, 0  ;;  %v4446_v58 = vpop.f32.mrf.mxu0  ;;  %v1944_v54 = vmul.f32 %v3307_v10, %v4428_v9 }
 0x30e   :  { %5604 = vst [vmem:[#allocation11_spill] sm:$0xff] %v4446_v58  ;;  %v1945_v18 = vmul.f32 %v3308_v38, %v4428_v9  ;;  %v4453_v0 = vmul.f32 %v3305_v33, %v4428_v9  ;;  %v4456_v4 = vmul.f32 %v3306_v23, %v4428_v9  ;;  %v1592_v48 = vrot.slane %v1584_v19, 1 }
 0x30f   :  { %v1950_v63 = vmul.f32 %v3313_v35, %v4440_v28  ;;  %v1951_v3 = vmul.f32 %v3314_v31, %v4440_v28  ;;  %v4463_v10 = vmul.f32 %v3319_v37, %v4442_v32  ;;  %v1593_v51 = vrot.slane %v1584_v19, 2 }
 0x310   :  { %v1594_v59 = vrot.slane %v1584_v19, 3  ;;  %v4465_v38 = vperm.slane %v1584_v19, 0  ;;  %v1515_v33 = vpop.permute.xlu2 %1514  ;;  %v4468_v23 = vmul.f32 %v3320_v11, %v4442_v32  ;;  %v4471_v14 = vmul.f32 %v3311_v16, %v4440_v28 }
 0x311   :  { %v1459_v6 = vpop.permute.xlu1 %1458  ;;  %v4474_v7 = vmul.f32 %v3312_v25, %v4440_v28  ;;  %v5605_v35 = vmov 0.0   ;;  %v4482_v37 = vperm.slane %v1592_v48, 0  ;;  %v4484_v49 = vperm.slane %v1593_v51, 0 }
 0x312   :  { %v4480_v31 = vsel %vm2060_vm13, 1.0, %v5605_v35  ;;  %v4486_v19 = vperm.slane %v1594_v59, 0  ;;  %v1473_v11 = vsel %vm1430_vm7, %v4178_v34, %v1459_v6  ;;  %v2376_v25 = vmul.f32 %v3403_v52, %v4465_v38 }
 0x313   :  { %v1477_v16 = vsel %vm1435_vm8, %v1473_v11, %v1467_v46  ;;  %v2377_v24 = vmul.f32 %v3404_v57, %v4465_v38  ;;  %v2374_v39 = vmul.f32 %v3401_v62, %v4465_v38  ;;  %v2382_v36 = vmul.f32 %v3409_v13, %v4482_v37  ;;  %v1425_v57 = vpop.permute.xlu0 %1424 }
 0x314   :  { %v1483_v41 = vrot.slane %v1477_v16, 1  ;;  %v1484_v53 = vrot.slane %v1477_v16, 2  ;;  %v1485_v21 = vrot.slane %v1477_v16, 3  ;;  %v4494_v48 = vperm.slane %v1477_v16, 0 }
 0x315   :  { %v4496_v51 = vpop.f32.mrf.mxu0  ;;  %v2472_v59 = vadd.f32 %v2376_v25, %v1944_v54  ;;  %v2473_v58 = vadd.f32 %v2377_v24, %v1945_v18  ;;  %v2383_v34 = vmul.f32 %v3410_v60, %v4482_v37  ;;  %v1437_v24 = vsel %vm1435_vm8, %v4361_v29, %v1425_v57 }
 0x316   :  { %5606 = vst [vmem:[#allocation12_spill] sm:$0xff] %v4496_v51  ;;  %v4502_v6 = vperm.slane %v1483_v41, 0  ;;  %v4504_v52 = vperm.slane %v1484_v53, 0  ;;  %v4506_v46 = vperm.slane %v1485_v21, 0  ;;  %v2478_v18 = vadd.f32 %v2382_v36, %v1950_v63 }
 0x317   :  { %v2568_v54 = vpack.c.bf16 %v2472_v59, %v2472_v59  ;;  %v2569_v13 = vpack.c.bf16 %v2473_v58, %v2473_v58  ;;  %v1443_v60 = vrot.slane %v1437_v24, 1  ;;  %v1444_v41 = vrot.slane %v1437_v24, 2 }
 0x318   :  { %5607 = vst [vmem:[#allocation13_spill] sm:$0xff] %v4502_v6  ;;  %v1445_v11 = vrot.slane %v1437_v24, 3  ;;  %v4514_v53 = vperm.slane %v1437_v24, 0  ;;  %v1461_v21 = vpop.permute.xlu2 %1460  ;;  %v2479_v29 = vadd.f32 %v2383_v34, %v1951_v3  ;;  %vm2067_vm3 = vcmp.eq.s32.totalorder %v4350_v43, %v4385_v8 }
 0x319   :  { %5608 = vst [vmem:[#allocation14_spill] sm:$0xff] %v4504_v52  ;;  %v2686_v16 = vunpack.c.l.b16 %v2568_v54  ;;  %v2687_v25 = vunpack.c.l.b16 %v2569_v13  ;;  %v4518_v62 = vsel %vm1430_vm7, %v4244_v42, %v1461_v21  ;;  %v4520_v59 = vperm.slane %v1443_v60, 0 }
 0x31a   :  { %5609 = vst [vmem:[#allocation15_spill] sm:$0xff] %v4506_v46  ;;  %v1503_v46 = vpop.permute.xlu1 %1502  ;;  %v4522_v36 = vperm.slane %v1444_v41, 0  ;;  %v4524_v58 = vperm.slane %v1445_v11, 0  ;;  %v2574_v54 = vpack.c.bf16 %v2478_v18, %v2478_v18  ;;  %v2575_v13 = vpack.c.bf16 %v2479_v29, %v2479_v29 }
 0x31b   :  { %v1525_v63 = vsel %vm1430_vm7, %v4199_v47, %v1503_v46  ;;  %v2690_v57 = vpack.c.b16 %v2687_v25, %v2686_v16  ;;  %v2388_v60 = vmul.f32 %v4417_v56, %v4484_v49  ;;  %v2389_v41 = vmul.f32 %v4423_v61, %v4484_v49  ;;  %v1559_v11 = vpop.permute.xlu0 %1558 }
 0x31c   :  { %v1529_v24 = vsel %vm1435_vm8, %v1525_v63, %v1515_v33  ;;  %v2721_v3 = vunpack.c.l.b16 %v2574_v54  ;;  %v2722_v34 = vunpack.c.l.b16 %v2575_v13  ;;  %v2375_v21 = vmul.f32 %v4431_v55, %v4465_v38 }
 0x31d   :  { %v1539_v52 = vrot.slane %v1529_v24, 1  ;;  %v1540_v6 = vrot.slane %v1529_v24, 2  ;;  %v1541_v51 = vrot.slane %v1529_v24, 3  ;;  %v4529_v42 = vperm.slane %v1529_v24, 0  ;;  %2703 = vmatpush.bf16.msra.mxu1 %v2690_v57  ;;  %v4535_v47 = vpop.f32.mrf.mxu0 }
 0x31e   :  { %v2725_v16 = vpack.c.b16 %v2722_v34, %v2721_v3  ;;  %v2484_v25 = vadd.f32 %v2388_v60, %v4463_v10  ;;  %v2485_v56 = vadd.f32 %v2389_v41, %v4468_v23  ;;  %v4549_v61 = vsel %vm1430_vm7, %v4214_v44, %v1559_v11 }
 0x31f   :  { %v4537_v46 = vperm.slane %v1539_v52, 0  ;;  %v4539_v33 = vperm.slane %v1540_v6, 0  ;;  %v4541_v18 = vperm.slane %v1541_v51, 0  ;;  %v2470_v52 = vadd.f32 %v2374_v39, %v4453_v0 }
 0x320   :  { %v2471_v6 = vadd.f32 %v2375_v21, %v4456_v4  ;;  %v2664_v51 = vpack.c.bf16 %v4535_v47, %v4535_v47  ;;  %v3408_v55 = vsel %vm2061_vm14, 1.0, %v5605_v35  ;;  %2737 = vmatpush.bf16.msrb.mxu2 %v2725_v16  ;;  %v2580_v10 = vpack.c.bf16 %v2484_v25, %v2484_v25 }
 0x321   :  { %v2581_v29 = vpack.c.bf16 %v2485_v56, %v2485_v56  ;;  %v2380_v23 = vmul.f32 %v4480_v31, %v4482_v37  ;;  %v2381_v44 = vmul.f32 %v3408_v55, %v4482_v37  ;;  %v2566_v63 = vpack.c.bf16 %v2470_v52, %v2470_v52  ;;  %v4573_v31 = vld [vmem:[%s5575_s3] sm:$0xff] }
 0x322   :  { %v2567_v39 = vpack.c.bf16 %v2471_v6, %v2471_v6  ;;  %v3317_v0 = vsel %vm1634_vm15, 1.0, %v5605_v35  ;;  %v2755_v4 = vunpack.c.l.b16 %v2580_v10  ;;  %v3318_v34 = vsel %vm1635_vm1, 1.0, %v5605_v35 }
 0x323   :  { %v2756_v57 = vunpack.c.l.b16 %v2581_v29  ;;  %v2476_v24 = vadd.f32 %v2380_v23, %v4471_v14  ;;  %v2477_v54 = vadd.f32 %v2381_v44, %v4474_v7  ;;  %v2684_v13 = vunpack.c.l.b16 %v2566_v63  ;;  %v4581_v14 = vld [vmem:[%s5575_s3 + $0x8] sm:$0xff] }
 0x324   :  { %v2685_v3 = vunpack.c.l.b16 %v2567_v39  ;;  %v1954_v60 = vmul.f32 %v3317_v0, %v4442_v32  ;;  %v1955_v16 = vmul.f32 %v3318_v34, %v4442_v32  ;;  %vm1620_vm4 = vcmp.eq.s32.totalorder %v4573_v31, %v4311_v5 }
 0x325   :  { %v2759_v41 = vpack.c.b16 %v2756_v57, %v2755_v4  ;;  %v2572_v11 = vpack.c.bf16 %v2476_v24, %v2476_v24  ;;  %v2573_v21 = vpack.c.bf16 %v2477_v54, %v2477_v54  ;;  %v3413_v52 = vsel %vm2066_vm2, 1.0, %v5605_v35 }
 0x326   :  { %v2689_v7 = vpack.c.b16 %v2685_v3, %v2684_v13  ;;  %v3414_v6 = vsel %vm2067_vm3, 1.0, %v5605_v35  ;;  %v2386_v55 = vmul.f32 %v3413_v52, %v4484_v49  ;;  %vm1621_vm5 = vcmp.eq.s32.totalorder %v4581_v14, %v4311_v5 }
 0x327   :  { %2771 = vmatpush.bf16.msrb.mxu3 %v2759_v41  ;;  %v2719_v25 = vunpack.c.l.b16 %v2572_v11  ;;  %v2720_v56 = vunpack.c.l.b16 %v2573_v21  ;;  %v2387_v10 = vmul.f32 %v3414_v6, %v4484_v49  ;;  %v3303_v29 = vsel %vm1620_vm4, 1.0, %v5605_v35  ;;  %v1571_v21 = vpop.permute.xlu1 %1570 }
 0x328   :  { %2704 = vmatpush.bf16.msra.mxu1 %v2689_v7  ;;  %v3304_v44 = vsel %vm1621_vm5, 1.0, %v5605_v35  ;;  %v1940_v63 = vmul.f32 %v3303_v29, %v4428_v9  ;;  %vm2052_vm0 = vcmp.eq.s32.totalorder %v4573_v31, %v4374_v27  ;;  %v2482_v39 = vadd.f32 %v2386_v55, %v1954_v60 }
 0x329   :  { %v2724_v23 = vpack.c.b16 %v2720_v56, %v2719_v25  ;;  %v2483_v0 = vadd.f32 %v2387_v10, %v1955_v16  ;;  %v1941_v4 = vmul.f32 %v3304_v44, %v4428_v9  ;;  %vm2053_vm6 = vcmp.eq.s32.totalorder %v4581_v14, %v4374_v27  ;;  %v1505_v16 = vpop.permute.xlu2 %1504 }
 0x32a   :  { %v3399_v5 = vsel %vm2052_vm0, 1.0, %v5605_v35  ;;  %v3400_v57 = vsel %vm2053_vm6, 1.0, %v5605_v35  ;;  %vm1642_vm9 = vcmp.eq.s32.totalorder %v4316_v12, %v4339_v26  ;;  %vm1643_vm10 = vcmp.eq.s32.totalorder %v4321_v15, %v4339_v26 }
 0x32b   :  { %2738 = vmatpush.bf16.msrb.mxu2 %v2724_v23  ;;  %v2578_v24 = vpack.c.bf16 %v2482_v39, %v2482_v39  ;;  %v2579_v54 = vpack.c.bf16 %v2483_v0, %v2483_v0  ;;  %v2372_v13 = vmul.f32 %v3399_v5, %v4465_v38  ;;  %v2373_v9 = vmul.f32 %v3400_v57, %v4465_v38 }
 0x32c   :  { %v3325_v3 = vsel %vm1642_vm9, 1.0, %v5605_v35  ;;  %v3326_v27 = vsel %vm1643_vm10, 1.0, %v5605_v35  ;;  %vm2074_vm11 = vcmp.eq.s32.totalorder %v4316_v12, %v4392_v30  ;;  %vm2075_vm12 = vcmp.eq.s32.totalorder %v4321_v15, %v4392_v30 }
 0x32d   :  { %v2753_v34 = vunpack.c.l.b16 %v2578_v24  ;;  %v2754_v60 = vunpack.c.l.b16 %v2579_v54  ;;  %v2468_v41 = vadd.f32 %v2372_v13, %v1940_v63  ;;  %v2469_v11 = vadd.f32 %v2373_v9, %v1941_v4 }
 0x32e   :  { %v1962_v7 = vmul.f32 %v3325_v3, %v4444_v1  ;;  %v1963_v38 = vmul.f32 %v3326_v27, %v4444_v1  ;;  %v3421_v25 = vsel %vm2074_vm11, 1.0, %v5605_v35  ;;  %v3422_v56 = vsel %vm2075_vm12, 1.0, %v5605_v35 }
 0x32f   :  { %v2758_v52 = vpack.c.b16 %v2754_v60, %v2753_v34  ;;  %v2564_v6 = vpack.c.bf16 %v2468_v41, %v2468_v41  ;;  %v2565_v55 = vpack.c.bf16 %v2469_v11, %v2469_v11  ;;  %v2394_v10 = vmul.f32 %v3421_v25, %v4486_v19  ;;  %v1419_v25 = vpop.permute.xlu0 %1418 }
 0x330   :  { %v2395_v29 = vmul.f32 %v3422_v56, %v4486_v19  ;;  %v1585_v23 = vsel %vm1435_vm8, %v4549_v61, %v1571_v21  ;;  %v4627_v44 = vsel %vm1430_vm7, %v4258_v22, %v1505_v16  ;;  %vm1626_vm13 = vcmp.eq.s32.totalorder %v4573_v31, %v4331_v50 }
 0x331   :  { %2772 = vmatpush.bf16.msrb.mxu3 %v2758_v52  ;;  %v2682_v63 = vunpack.c.l.b16 %v2564_v6  ;;  %v2683_v39 = vunpack.c.l.b16 %v2565_v55  ;;  %v2490_v0 = vadd.f32 %v2394_v10, %v1962_v7  ;;  %v1595_v4 = vrot.slane %v1585_v23, 1 }
 0x332   :  { %v2491_v5 = vadd.f32 %v2395_v29, %v1963_v38  ;;  %v1596_v57 = vrot.slane %v1585_v23, 2  ;;  %v1597_v24 = vrot.slane %v1585_v23, 3  ;;  %v4631_v54 = vperm.slane %v1585_v23, 0  ;;  %v4666_v29 = vpop.f32.mrf.mxu0 }
 0x333   :  { %v2688_v13 = vpack.c.b16 %v2683_v39, %v2682_v63  ;;  %v2586_v9 = vpack.c.bf16 %v2490_v0, %v2490_v0  ;;  %v4633_v61 = vperm.slane %v1595_v4, 0  ;;  %vm1627_vm14 = vcmp.eq.s32.totalorder %v4581_v14, %v4331_v50 }
 0x334   :  { %v2587_v22 = vpack.c.bf16 %v2491_v5, %v2491_v5  ;;  %v4637_v3 = vperm.slane %v1596_v57, 0  ;;  %v4639_v27 = vperm.slane %v1597_v24, 0  ;;  %v3309_v34 = vsel %vm1626_vm13, 1.0, %v5605_v35 }
 0x335   :  { %2705 = vmatpush.bf16.msra.mxu1 %v2688_v13  ;;  %v2789_v60 = vunpack.c.l.b16 %v2586_v9  ;;  %v3310_v41 = vsel %vm1627_vm14, 1.0, %v5605_v35  ;;  %v1946_v11 = vmul.f32 %v3309_v34, %v4440_v28  ;;  %vm2058_vm15 = vcmp.eq.s32.totalorder %v4573_v31, %v4383_v40 }
 0x336   :  { %v2790_v21 = vunpack.c.l.b16 %v2587_v22  ;;  %v1947_v16 = vmul.f32 %v3310_v41, %v4440_v28  ;;  %vm2059_vm1 = vcmp.eq.s32.totalorder %v4581_v14, %v4383_v40  ;;  %v3405_v7 = vsel %vm2058_vm15, 1.0, %v5605_v35 }
 0x337   :  { %v3406_v50 = vsel %vm2059_vm1, 1.0, %v5605_v35  ;;  %v2378_v38 = vmul.f32 %v3405_v7, %v4482_v37  ;;  %vm1632_vm2 = vcmp.eq.s32.totalorder %v4573_v31, %v4333_v20  ;;  %vm1633_vm3 = vcmp.eq.s32.totalorder %v4581_v14, %v4333_v20 }
 0x338   :  { %v2793_v56 = vpack.c.b16 %v2790_v21, %v2789_v60  ;;  %v2379_v52 = vmul.f32 %v3406_v50, %v4482_v37  ;;  %v3315_v28 = vsel %vm1632_vm2, 1.0, %v5605_v35  ;;  %v3316_v40 = vsel %vm1633_vm3, 1.0, %v5605_v35 }
 0x339   :  { %v2474_v6 = vadd.f32 %v2378_v38, %v1946_v11  ;;  %v1952_v55 = vmul.f32 %v3315_v28, %v4442_v32  ;;  %v1953_v10 = vmul.f32 %v3316_v40, %v4442_v32  ;;  %vm2064_vm4 = vcmp.eq.s32.totalorder %v4573_v31, %v4385_v8 }
 0x33a   :  { %2805 = vmatpush.bf16.msrb.mxu1 %v2793_v56  ;;  %v2475_v20 = vadd.f32 %v2379_v52, %v1947_v16  ;;  %vm2065_vm5 = vcmp.eq.s32.totalorder %v4581_v14, %v4385_v8  ;;  %v3411_v37 = vsel %vm2064_vm4, 1.0, %v5605_v35  ;;  %v1433_v23 = vsel %vm1430_vm7, %v4226_v45, %v1419_v25  ;;  %v1427_v56 = vpop.permute.xlu1 %1426 }
 0x33b   :  { %v2570_v63 = vpack.c.bf16 %v2474_v6, %v2474_v6  ;;  %v3412_v39 = vsel %vm2065_vm5, 1.0, %v5605_v35  ;;  %v2384_v32 = vmul.f32 %v3411_v37, %v4484_v49  ;;  %vm2694_vm0 = vcmask 392192  }
 0x33c   :  { %v2571_v0 = vpack.c.bf16 %v2475_v20, %v2475_v20  ;;  %v2385_v4 = vmul.f32 %v3412_v39, %v4484_v49  ;;  %v5610_v5 = vpack.c.bf16 %v4324_v2, %v4324_v2  ;;  %vm1640_vm6 = vcmp.eq.s32.totalorder %v4329_v17, %v4339_v26 }
 0x33d   :  { %vm1641_vm9 = vcmp.eq.s32.totalorder %v4350_v43, %v4339_v26  ;;  %v2717_v45 = vunpack.c.l.b16 %v2570_v63  ;;  %v2480_v8 = vadd.f32 %v2384_v32, %v1952_v55  ;;  %v3323_v57 = vsel %vm1640_vm6, 1.0, %v5605_v35  ;;  %v1469_v55 = vpop.permute.xlu0 %1468  ;;  %v5611_v63 = vld [vmem:[#allocation10_spill] sm:$0xff] }
 0x33e   :  { %3495 = vmatmul.msk.bf16.vlgmr.msra.gmra.mxu1 %vm2694_vm0, %v5610_v5  ;;  %v3324_v24 = vsel %vm1641_vm9, 1.0, %v5605_v35  ;;  %v2718_v13 = vunpack.c.l.b16 %v2571_v0  ;;  %v2481_v9 = vadd.f32 %v2385_v4, %v1953_v10  ;;  %v1960_v49 = vmul.f32 %v3323_v57, %v4444_v1  ;;  %v4707_v10 = vpop.f32.mrf.mxu0 }
 0x33f   :  { %v1961_v2 = vmul.f32 %v3324_v24, %v4444_v1  ;;  %v2576_v22 = vpack.c.bf16 %v2480_v8, %v2480_v8  ;;  %vm2072_vm10 = vcmp.eq.s32.totalorder %v4329_v17, %v4392_v30  ;;  %vm2073_vm11 = vcmp.eq.s32.totalorder %v4350_v43, %v4392_v30 }
 0x340   :  { %v2665_v34 = vpack.c.bf16 %v4666_v29, %v4666_v29  ;;  %v2723_v60 = vpack.c.b16 %v2718_v13, %v2717_v45  ;;  %v2577_v41 = vpack.c.bf16 %v2481_v9, %v2481_v9  ;;  %v3419_v11 = vsel %vm2072_vm10, 1.0, %v5605_v35 }
 0x341   :  { %v3420_v21 = vsel %vm2073_vm11, 1.0, %v5605_v35  ;;  %v2751_v16 = vunpack.c.l.b16 %v2576_v22  ;;  %v2392_v7 = vmul.f32 %v3419_v11, %v4486_v19  ;;  %vm1638_vm12 = vcmp.eq.s32.totalorder %v4573_v31, %v4339_v26 }
 0x342   :  { %v2393_v50 = vmul.f32 %v3420_v21, %v4486_v19  ;;  %2739 = vmatpush.bf16.msrb.mxu2 %v2723_v60  ;;  %v2752_v38 = vunpack.c.l.b16 %v2577_v41  ;;  %vm1639_vm13 = vcmp.eq.s32.totalorder %v4581_v14, %v4339_v26  ;;  %v3321_v25 = vsel %vm1638_vm12, 1.0, %v5605_v35  ;;  %v5613_v41 = vld [vmem:[#allocation11_spill] sm:$0xff] }
 0x343   :  { %vm2070_vm14 = vcmp.eq.s32.totalorder %v4573_v31, %v4392_v30  ;;  %v2488_v52 = vadd.f32 %v2392_v7, %v1960_v49  ;;  %v3322_v40 = vsel %vm1639_vm13, 1.0, %v5605_v35  ;;  %v1958_v6 = vmul.f32 %v3321_v25, %v4444_v1 }
 0x344   :  { %v2489_v28 = vadd.f32 %v2393_v50, %v1961_v2  ;;  %v2757_v20 = vpack.c.b16 %v2752_v38, %v2751_v16  ;;  %v1959_v37 = vmul.f32 %v3322_v40, %v4444_v1  ;;  %vm2071_vm15 = vcmp.eq.s32.totalorder %v4581_v14, %v4392_v30 }
 0x345   :  { %v3417_v26 = vsel %vm2070_vm14, 1.0, %v5605_v35  ;;  %v5612_v39 = vpack.c.bf16 %v5611_v63, %v5611_v63  ;;  %v2584_v32 = vpack.c.bf16 %v2488_v52, %v2488_v52  ;;  %v3418_v4 = vsel %vm2071_vm15, 1.0, %v5605_v35 }
 0x346   :  { %v2585_v0 = vpack.c.bf16 %v2489_v28, %v2489_v28  ;;  %v2390_v5 = vmul.f32 %v3417_v26, %v4486_v19  ;;  %2773 = vmatpush.bf16.msrb.mxu3 %v2757_v20  ;;  %v2391_v45 = vmul.f32 %v3418_v4, %v4486_v19  ;;  %v1438_v1 = vsel %vm1435_vm8, %v1433_v23, %v1427_v56 }
 0x347   :  { %3496 = vmatmul.msk.bf16.vlgmr.msrb.gmra.mxu2 %vm2694_vm0, %v5612_v39  ;;  %v1478_v30 = vsel %vm1435_vm8, %v4518_v62, %v1469_v55  ;;  %v2666_v8 = vpack.c.bf16 %v4707_v10, %v4707_v10  ;;  %v2787_v57 = vunpack.c.l.b16 %v2584_v32  ;;  %v1446_v9 = vrot.slane %v1438_v1, 1  ;;  %v1561_v55 = vpop.permute.xlu1 %1560 }
 0x348   :  { %v2788_v24 = vunpack.c.l.b16 %v2585_v0  ;;  %v2486_v13 = vadd.f32 %v2390_v5, %v1958_v6  ;;  %v2487_v49 = vadd.f32 %v2391_v45, %v1959_v37  ;;  %v1447_v2 = vrot.slane %v1438_v1, 2  ;;  %v1573_v0 = vpop.permute.xlu2 %1572  ;;  %v5615_v45 = vld [vmem:[#allocation5_spill] sm:$0xff] }
 0x349   :  { %v1448_v22 = vrot.slane %v1438_v1, 3  ;;  %v4725_v60 = vperm.slane %v1438_v1, 0  ;;  %v5614_v19 = vpack.c.bf16 %v5613_v41, %v5613_v41  ;;  %v4731_v62 = vperm.slane %v1446_v9, 0 }
 0x34a   :  { %v2792_v23 = vpack.c.b16 %v2788_v24, %v2787_v57  ;;  %v2582_v11 = vpack.c.bf16 %v2486_v13, %v2486_v13  ;;  %v1486_v21 = vrot.slane %v1478_v30, 1  ;;  %v2583_v16 = vpack.c.bf16 %v2487_v49, %v2487_v49 }
 0x34b   :  { %3497 = vmatmul.msk.bf16.vlgmr.msrb.gmra.mxu3 %vm2694_vm0, %v5614_v19  ;;  %v4733_v7 = vperm.slane %v1447_v2, 0  ;;  %v4735_v50 = vperm.slane %v1448_v22, 0  ;;  %v1487_v38 = vrot.slane %v1478_v30, 2  ;;  %v1488_v56 = vrot.slane %v1478_v30, 3 }
 0x34c   :  { %2806 = vmatpush.bf16.msrb.mxu1 %v2792_v23  ;;  %v2785_v25 = vunpack.c.l.b16 %v2582_v11  ;;  %v4737_v52 = vperm.slane %v1478_v30, 0  ;;  %v4739_v28 = vperm.slane %v1486_v21, 0  ;;  %v2786_v40 = vunpack.c.l.b16 %v2583_v16 }
 0x34d   :  { %v4741_v6 = vperm.slane %v1487_v38, 0  ;;  %vm1648_vm1 = vcmp.eq.s32.totalorder %v4316_v12, %v4514_v53  ;;  %vm1649_vm2 = vcmp.eq.s32.totalorder %v4321_v15, %v4514_v53  ;;  %v4747_v20 = vperm.slane %v1488_v56, 0 }
 0x34e   :  { %v3331_v37 = vsel %vm1648_vm1, 1.0, %v5605_v35  ;;  %v3332_v26 = vsel %vm1649_vm2, 1.0, %v5605_v35  ;;  %vm2080_vm3 = vcmp.eq.s32.totalorder %v4316_v12, %v4494_v48  ;;  %v2791_v63 = vpack.c.b16 %v2786_v40, %v2785_v25  ;;  %v5616_v25 = vld [vmem:[#allocation12_spill] sm:$0xff] }
 0x34f   :  { %v1968_v39 = vmul.f32 %v3331_v37, %v4529_v42  ;;  %v1969_v32 = vmul.f32 %v3332_v26, %v4529_v42  ;;  %vm2081_vm4 = vcmp.eq.s32.totalorder %v4321_v15, %v4494_v48  ;;  %v3427_v4 = vsel %vm2080_vm3, 1.0, %v5605_v35  ;;  %v5618_v26 = vld [vmem:[#allocation13_spill] sm:$0xff] }
 0x350   :  { %v3428_v5 = vsel %vm2081_vm4, 1.0, %v5605_v35  ;;  %v1582_v1 = vsel %vm1430_vm7, %v5615_v45, %v1561_v55  ;;  %vm1654_vm5 = vcmp.eq.s32.totalorder %v4316_v12, %v4520_v59  ;;  %2807 = vmatpush.bf16.msrb.mxu1 %v2791_v63  ;;  %v2400_v30 = vmul.f32 %v3427_v4, %v4631_v54 }
 0x351   :  { %v2401_v57 = vmul.f32 %v3428_v5, %v4631_v54  ;;  %v1586_v24 = vsel %vm1435_vm8, %v1582_v1, %v1573_v0  ;;  %vm1655_vm6 = vcmp.eq.s32.totalorder %v4321_v15, %v4520_v59  ;;  %v3337_v19 = vsel %vm1654_vm5, 1.0, %v5605_v35  ;;  %v1517_v5 = vpop.permute.xlu0 %1516 }
 0x352   :  { %v1598_v13 = vrot.slane %v1586_v24, 1  ;;  %v1599_v9 = vrot.slane %v1586_v24, 2  ;;  %v1600_v49 = vrot.slane %v1586_v24, 3  ;;  %v4768_v2 = vperm.slane %v1586_v24, 0 }
 0x353   :  { %v2496_v22 = vadd.f32 %v2400_v30, %v1968_v39  ;;  %v2497_v41 = vadd.f32 %v2401_v57, %v1969_v32  ;;  %v3338_v23 = vsel %vm1655_vm6, 1.0, %v5605_v35  ;;  %v1974_v38 = vmul.f32 %v3337_v19, %v4537_v46  ;;  %v5619_v57 = vld [vmem:[#allocation14_spill] sm:$0xff] }
 0x354   :  { %v4772_v11 = vperm.slane %v1598_v13, 0  ;;  %v4774_v21 = vperm.slane %v1599_v9, 0  ;;  %v4776_v16 = vperm.slane %v1600_v49, 0  ;;  %v5617_v56 = vpack.c.bf16 %v5616_v25, %v5616_v25 }
 0x355   :  { %v2592_v40 = vpack.c.bf16 %v2496_v22, %v2496_v22  ;;  %v2593_v55 = vpack.c.bf16 %v2497_v41, %v2497_v41  ;;  %v1975_v37 = vmul.f32 %v3338_v23, %v4537_v46  ;;  %vm2086_vm9 = vcmp.eq.s32.totalorder %v4316_v12, %v5618_v26 }
 0x356   :  { %3498 = vmatmul.msk.bf16.vlgmr.msrb.gmra.mxu1 %vm2694_vm0, %v5617_v56  ;;  %vm2087_vm10 = vcmp.eq.s32.totalorder %v4321_v15, %v5618_v26  ;;  %v3433_v63 = vsel %vm2086_vm9, 1.0, %v5605_v35  ;;  %vm1660_vm11 = vcmp.eq.s32.totalorder %v4316_v12, %v4522_v36  ;;  %vm1661_vm12 = vcmp.eq.s32.totalorder %v4321_v15, %v4522_v36 }
 0x357   :  { %v2823_v39 = vunpack.c.l.b16 %v2592_v40  ;;  %v2824_v32 = vunpack.c.l.b16 %v2593_v55  ;;  %v3434_v0 = vsel %vm2087_vm10, 1.0, %v5605_v35  ;;  %v2406_v4 = vmul.f32 %v3433_v63, %v4633_v61 }
 0x358   :  { %v2407_v45 = vmul.f32 %v3434_v0, %v4633_v61  ;;  %v3343_v1 = vsel %vm1660_vm11, 1.0, %v5605_v35  ;;  %v3344_v30 = vsel %vm1661_vm12, 1.0, %v5605_v35  ;;  %vm2092_vm13 = vcmp.eq.s32.totalorder %v4316_v12, %v5619_v57 }
 0x359   :  { %v2827_v24 = vpack.c.b16 %v2824_v32, %v2823_v39  ;;  %v2502_v13 = vadd.f32 %v2406_v4, %v1974_v38  ;;  %v1980_v9 = vmul.f32 %v3343_v1, %v4539_v33  ;;  %v1981_v49 = vmul.f32 %v3344_v30, %v4539_v33  ;;  %v4824_v1 = vpop.f32.mrf.mxu0 }
 0x35a   :  { %v2503_v22 = vadd.f32 %v2407_v45, %v1975_v37  ;;  %vm2093_vm14 = vcmp.eq.s32.totalorder %v4321_v15, %v5619_v57  ;;  %v3439_v41 = vsel %vm2092_vm13, 1.0, %v5605_v35  ;;  %v1530_v19 = vsel %vm1435_vm8, %v4627_v44, %v1517_v5 }
 0x35b   :  { %2839 = vmatpush.bf16.msra.mxu2 %v2827_v24  ;;  %v2598_v23 = vpack.c.bf16 %v2502_v13, %v2502_v13  ;;  %v3440_v25 = vsel %vm2093_vm14, 1.0, %v5605_v35  ;;  %v2412_v12 = vmul.f32 %v3439_v41, %v4637_v3  ;;  %v1542_v38 = vrot.slane %v1530_v19, 1 }
 0x35c   :  { %v2599_v56 = vpack.c.bf16 %v2503_v22, %v2503_v22  ;;  %v2413_v40 = vmul.f32 %v3440_v25, %v4637_v3  ;;  %v1543_v55 = vrot.slane %v1530_v19, 2  ;;  %v1544_v37 = vrot.slane %v1530_v19, 3 }
 0x35d   :  { %v2857_v63 = vunpack.c.l.b16 %v2598_v23  ;;  %v2508_v39 = vadd.f32 %v2412_v12, %v1980_v9  ;;  %v4810_v15 = vperm.slane %v1530_v19, 0  ;;  %v4812_v32 = vperm.slane %v1542_v38, 0 }
 0x35e   :  { %v2858_v0 = vunpack.c.l.b16 %v2599_v56  ;;  %v2509_v44 = vadd.f32 %v2413_v40, %v1981_v49  ;;  %v4814_v4 = vperm.slane %v1543_v55, 0  ;;  %v4816_v5 = vperm.slane %v1544_v37, 0 }
 0x35f   :  { %v2604_v45 = vpack.c.bf16 %v2508_v39, %v2508_v39  ;;  %vm1646_vm15 = vcmp.eq.s32.totalorder %v4329_v17, %v4514_v53  ;;  %vm1647_vm1 = vcmp.eq.s32.totalorder %v4350_v43, %v4514_v53  ;;  %vm2078_vm2 = vcmp.eq.s32.totalorder %v4329_v17, %v4494_v48 }
 0x360   :  { %v2861_v30 = vpack.c.b16 %v2858_v0, %v2857_v63  ;;  %v2605_v24 = vpack.c.bf16 %v2509_v44, %v2509_v44  ;;  %v3329_v13 = vsel %vm1646_vm15, 1.0, %v5605_v35  ;;  %v3330_v9 = vsel %vm1647_vm1, 1.0, %v5605_v35 }
 0x361   :  { %v2891_v49 = vunpack.c.l.b16 %v2604_v45  ;;  %v1966_v22 = vmul.f32 %v3329_v13, %v4529_v42  ;;  %v1967_v41 = vmul.f32 %v3330_v9, %v4529_v42  ;;  %vm2079_vm3 = vcmp.eq.s32.totalorder %v4350_v43, %v4494_v48 }
 0x362   :  { %2873 = vmatpush.bf16.msra.mxu3 %v2861_v30  ;;  %v2892_v19 = vunpack.c.l.b16 %v2605_v24  ;;  %v3425_v23 = vsel %vm2078_vm2, 1.0, %v5605_v35  ;;  %v3426_v25 = vsel %vm2079_vm3, 1.0, %v5605_v35  ;;  %v2667_v12 = vpack.c.bf16 %v4824_v1, %v4824_v1 }
 0x363   :  { %v2398_v38 = vmul.f32 %v3425_v23, %v4631_v54  ;;  %v2399_v56 = vmul.f32 %v3426_v25, %v4631_v54  ;;  %vm1652_vm4 = vcmp.eq.s32.totalorder %v4329_v17, %v4520_v59  ;;  %vm1653_vm5 = vcmp.eq.s32.totalorder %v4350_v43, %v4520_v59 }
 0x364   :  { %v2895_v40 = vpack.c.b16 %v2892_v19, %v2891_v49  ;;  %v3335_v55 = vsel %vm1652_vm4, 1.0, %v5605_v35  ;;  %v3336_v37 = vsel %vm1653_vm5, 1.0, %v5605_v35  ;;  %vm2084_vm6 = vcmp.eq.s32.totalorder %v4329_v17, %v5618_v26  ;;  %v1429_v19 = vpop.permute.xlu2 %1428 }
 0x365   :  { %v2494_v63 = vadd.f32 %v2398_v38, %v1966_v22  ;;  %v2495_v39 = vadd.f32 %v2399_v56, %v1967_v41  ;;  %v1972_v0 = vmul.f32 %v3335_v55, %v4537_v46  ;;  %v1973_v44 = vmul.f32 %v3336_v37, %v4537_v46 }
 0x366   :  { %2907 = vmatpush.bf16.msra.mxu1 %v2895_v40  ;;  %vm2085_vm9 = vcmp.eq.s32.totalorder %v4350_v43, %v5618_v26  ;;  %v3431_v45 = vsel %vm2084_vm6, 1.0, %v5605_v35  ;;  %vm1658_vm10 = vcmp.eq.s32.totalorder %v4329_v17, %v4522_v36  ;;  %vm1659_vm11 = vcmp.eq.s32.totalorder %v4350_v43, %v4522_v36 }
 0x367   :  { %v2590_v30 = vpack.c.bf16 %v2494_v63, %v2494_v63  ;;  %v2591_v24 = vpack.c.bf16 %v2495_v39, %v2495_v39  ;;  %v3432_v13 = vsel %vm2085_vm9, 1.0, %v5605_v35  ;;  %v2404_v9 = vmul.f32 %v3431_v45, %v4633_v61 }
 0x368   :  { %v2405_v49 = vmul.f32 %v3432_v13, %v4633_v61  ;;  %v3341_v22 = vsel %vm1658_vm10, 1.0, %v5605_v35  ;;  %v3342_v41 = vsel %vm1659_vm11, 1.0, %v5605_v35  ;;  %vm2090_vm12 = vcmp.eq.s32.totalorder %v4329_v17, %v5619_v57 }
 0x369   :  { %v2821_v23 = vunpack.c.l.b16 %v2590_v30  ;;  %v2822_v25 = vunpack.c.l.b16 %v2591_v24  ;;  %v2500_v38 = vadd.f32 %v2404_v9, %v1972_v0  ;;  %v1978_v56 = vmul.f32 %v3341_v22, %v4539_v33 }
 0x36a   :  { %v2501_v40 = vadd.f32 %v2405_v49, %v1973_v44  ;;  %v1979_v55 = vmul.f32 %v3342_v41, %v4539_v33  ;;  %vm2091_vm13 = vcmp.eq.s32.totalorder %v4350_v43, %v5619_v57  ;;  %v3437_v37 = vsel %vm2090_vm12, 1.0, %v5605_v35 }
 0x36b   :  { %v2826_v63 = vpack.c.b16 %v2822_v25, %v2821_v23  ;;  %v2596_v39 = vpack.c.bf16 %v2500_v38, %v2500_v38  ;;  %v3438_v45 = vsel %vm2091_vm13, 1.0, %v5605_v35  ;;  %v2410_v17 = vmul.f32 %v3437_v37, %v4637_v3 }
 0x36c   :  { %v2597_v13 = vpack.c.bf16 %v2501_v40, %v2501_v40  ;;  %v2411_v30 = vmul.f32 %v3438_v45, %v4637_v3  ;;  %vm1644_vm14 = vcmp.eq.s32.totalorder %v4573_v31, %v4514_v53  ;;  %vm1645_vm15 = vcmp.eq.s32.totalorder %v4581_v14, %v4514_v53  ;;  %v4885_v53 = vld [vmem:[%s5575_s3 + $0x20] sm:$0xff] }
 0x36d   :  { %2840 = vmatpush.bf16.msra.mxu2 %v2826_v63  ;;  %v2855_v0 = vunpack.c.l.b16 %v2596_v39  ;;  %v2506_v43 = vadd.f32 %v2410_v17, %v1978_v56  ;;  %v3327_v44 = vsel %vm1644_vm14, 1.0, %v5605_v35  ;;  %v3328_v24 = vsel %vm1645_vm15, 1.0, %v5605_v35  ;;  %v1421_v63 = vpop.permute.xlu1 %1420 }
 0x36e   :  { %v2856_v9 = vunpack.c.l.b16 %v2597_v13  ;;  %v2507_v49 = vadd.f32 %v2411_v30, %v1979_v55  ;;  %v1964_v22 = vmul.f32 %v3327_v44, %v4529_v42  ;;  %v1965_v41 = vmul.f32 %v3328_v24, %v4529_v42  ;;  %v5620_v13 = vld [vmem:[#allocation15_spill] sm:$0xff]  ;;  %v1563_v44 = vpop.permute.xlu2 %1562 }
 0x36f   :  { %v2602_v23 = vpack.c.bf16 %v2506_v43, %v2506_v43  ;;  %vm2076_vm1 = vcmp.eq.s32.totalorder %v4573_v31, %v4494_v48  ;;  %vm2077_vm2 = vcmp.eq.s32.totalorder %v4581_v14, %v4494_v48  ;;  %vm1666_vm3 = vcmp.eq.s32.totalorder %v4885_v53, %v4524_v58  ;;  %v4896_v48 = vld [vmem:[%s5575_s3 + $0x28] sm:$0xff] }
 0x370   :  { %v2860_v25 = vpack.c.b16 %v2856_v9, %v2855_v0  ;;  %v2603_v38 = vpack.c.bf16 %v2507_v49, %v2507_v49  ;;  %v3423_v56 = vsel %vm2076_vm1, 1.0, %v5605_v35  ;;  %v3424_v42 = vsel %vm2077_vm2, 1.0, %v5605_v35  ;;  %v5621_v49 = vld [vmem:[#allocation6_spill] sm:$0xff] }
 0x371   :  { %v2889_v40 = vunpack.c.l.b16 %v2602_v23  ;;  %v2396_v55 = vmul.f32 %v3423_v56, %v4631_v54  ;;  %v2397_v37 = vmul.f32 %v3424_v42, %v4631_v54  ;;  %vm1667_vm4 = vcmp.eq.s32.totalorder %v4896_v48, %v4524_v58 }
 0x372   :  { %2874 = vmatpush.bf16.msra.mxu3 %v2860_v25  ;;  %v2890_v39 = vunpack.c.l.b16 %v2603_v38  ;;  %v3349_v45 = vsel %vm1666_vm3, 1.0, %v5605_v35  ;;  %v3350_v17 = vsel %vm1667_vm4, 1.0, %v5605_v35  ;;  %vm2098_vm5 = vcmp.eq.s32.totalorder %v4885_v53, %v5620_v13 }
 0x373   :  { %v2492_v30 = vadd.f32 %v2396_v55, %v1964_v22  ;;  %v2493_v54 = vadd.f32 %v2397_v37, %v1965_v41  ;;  %v1986_v0 = vmul.f32 %v3349_v45, %v4541_v18  ;;  %v1987_v43 = vmul.f32 %v3350_v17, %v4541_v18 }
 0x374   :  { %v2894_v24 = vpack.c.b16 %v2890_v39, %v2889_v40  ;;  %vm2099_vm6 = vcmp.eq.s32.totalorder %v4896_v48, %v5620_v13  ;;  %v3445_v9 = vsel %vm2098_vm5, 1.0, %v5605_v35  ;;  %v1434_v23 = vsel %vm1430_vm7, %v5621_v49, %v1421_v63  ;;  %v5622_v40 = vld [vmem:[#allocation9_spill] sm:$0xff] }
 0x375   :  { %v2588_v25 = vpack.c.bf16 %v2492_v30, %v2492_v30  ;;  %v2589_v38 = vpack.c.bf16 %v2493_v54, %v2493_v54  ;;  %v3446_v56 = vsel %vm2099_vm6, 1.0, %v5605_v35  ;;  %v2418_v22 = vmul.f32 %v3445_v9, %v4639_v27 }
 0x376   :  { %2908 = vmatpush.bf16.msra.mxu1 %v2894_v24  ;;  %v2419_v41 = vmul.f32 %v3446_v56, %v4639_v27  ;;  %v1439_v42 = vsel %vm1435_vm8, %v1434_v23, %v1429_v19  ;;  %v4917_v55 = vsel %vm1430_vm7, %v5622_v40, %v1563_v44  ;;  %vm1650_vm9 = vcmp.eq.s32.totalorder %v4573_v31, %v4520_v59 }
 0x377   :  { %v2819_v37 = vunpack.c.l.b16 %v2588_v25  ;;  %v2820_v63 = vunpack.c.l.b16 %v2589_v38  ;;  %v2514_v39 = vadd.f32 %v2418_v22, %v1986_v0  ;;  %v1449_v45 = vrot.slane %v1439_v42, 1 }
 0x378   :  { %v2515_v17 = vadd.f32 %v2419_v41, %v1987_v43  ;;  %v1450_v30 = vrot.slane %v1439_v42, 2  ;;  %v1451_v54 = vrot.slane %v1439_v42, 3  ;;  %v4921_v9 = vperm.slane %v1439_v42, 0 }
 0x379   :  { %v2825_v24 = vpack.c.b16 %v2820_v63, %v2819_v37  ;;  %v2610_v49 = vpack.c.bf16 %v2514_v39, %v2514_v39  ;;  %v4923_v56 = vperm.slane %v1449_v45, 0  ;;  %vm1651_vm10 = vcmp.eq.s32.totalorder %v4581_v14, %v4520_v59  ;;  %v1463_v37 = vpop.permute.xlu0 %1462 }
 0x37a   :  { %v2611_v19 = vpack.c.bf16 %v2515_v17, %v2515_v17  ;;  %v4927_v44 = vperm.slane %v1450_v30, 0  ;;  %v4929_v23 = vperm.slane %v1451_v54, 0  ;;  %v3333_v0 = vsel %vm1650_vm9, 1.0, %v5605_v35  ;;  %v5623_v54 = vld [vmem:[#allocation7_spill] sm:$0xff] }
 0x37b   :  { %2841 = vmatpush.bf16.msra.mxu2 %v2825_v24  ;;  %v2925_v43 = vunpack.c.l.b16 %v2610_v49  ;;  %v3334_v25 = vsel %vm1651_vm10, 1.0, %v5605_v35  ;;  %v1970_v38 = vmul.f32 %v3333_v0, %v4537_v46  ;;  %vm2082_vm11 = vcmp.eq.s32.totalorder %v4573_v31, %v5618_v26  ;;  %v4980_v0 = vld [vmem:[%s5575_s3 + $0x18] sm:$0xff] }
 0x37c   :  { %v2926_v22 = vunpack.c.l.b16 %v2611_v19  ;;  %v1971_v41 = vmul.f32 %v3334_v25, %v4537_v46  ;;  %vm2083_vm12 = vcmp.eq.s32.totalorder %v4581_v14, %v5618_v26  ;;  %v3429_v42 = vsel %vm2082_vm11, 1.0, %v5605_v35  ;;  %v4985_v25 = vpop.f32.mrf.mxu0 }
 0x37d   :  { %v3430_v59 = vsel %vm2083_vm12, 1.0, %v5605_v35  ;;  %v2402_v40 = vmul.f32 %v3429_v42, %v4633_v61  ;;  %vm1656_vm13 = vcmp.eq.s32.totalorder %v4573_v31, %v4522_v36  ;;  %vm1657_vm14 = vcmp.eq.s32.totalorder %v4581_v14, %v4522_v36 }
 0x37e   :  { %v2929_v63 = vpack.c.b16 %v2926_v22, %v2925_v43  ;;  %v2403_v39 = vmul.f32 %v3430_v59, %v4633_v61  ;;  %v3339_v46 = vsel %vm1656_vm13, 1.0, %v5605_v35  ;;  %v3340_v26 = vsel %vm1657_vm14, 1.0, %v5605_v35  ;;  %3499 = vmatmul.msk.bf16.vlgmr.msra.gmra.mxu2 %vm2694_vm0, %v2664_v51 }
 0x37f   :  { %v2498_v45 = vadd.f32 %v2402_v40, %v1970_v38  ;;  %v1976_v17 = vmul.f32 %v3339_v46, %v4539_v33  ;;  %v1977_v30 = vmul.f32 %v3340_v26, %v4539_v33  ;;  %vm2088_vm15 = vcmp.eq.s32.totalorder %v4573_v31, %v5619_v57  ;;  %v4972_v33 = vld [vmem:[%s5575_s3 + $0x10] sm:$0xff] }
 0x380   :  { %2941 = vmatpush.bf16.msrb.mxu2 %v2929_v63  ;;  %v2499_v36 = vadd.f32 %v2403_v39, %v1971_v41  ;;  %vm2089_vm1 = vcmp.eq.s32.totalorder %v4581_v14, %v5619_v57  ;;  %v3435_v61 = vsel %vm2088_vm15, 1.0, %v5605_v35  ;;  %v4965_v47 = vsel %vm1430_vm7, %v5623_v54, %v1463_v37 }
 0x381   :  { %v2594_v51 = vpack.c.bf16 %v2498_v45, %v2498_v45  ;;  %v3436_v24 = vsel %vm2089_vm1, 1.0, %v5605_v35  ;;  %v2408_v49 = vmul.f32 %v3435_v61, %v4637_v3  ;;  %vm1664_vm2 = vcmp.eq.s32.totalorder %v4972_v33, %v4524_v58 }
 0x382   :  { %v2595_v57 = vpack.c.bf16 %v2499_v36, %v2499_v36  ;;  %v2409_v19 = vmul.f32 %v3436_v24, %v4637_v3  ;;  %vm1665_vm3 = vcmp.eq.s32.totalorder %v4980_v0, %v4524_v58  ;;  %v3347_v43 = vsel %vm1664_vm2, 1.0, %v5605_v35 }
 0x383   :  { %v2853_v38 = vunpack.c.l.b16 %v2594_v51  ;;  %v2504_v22 = vadd.f32 %v2408_v49, %v1976_v17  ;;  %v3348_v41 = vsel %vm1665_vm3, 1.0, %v5605_v35  ;;  %v1984_v42 = vmul.f32 %v3347_v43, %v4541_v18 }
 0x384   :  { %v2854_v59 = vunpack.c.l.b16 %v2595_v57  ;;  %v2505_v3 = vadd.f32 %v2409_v19, %v1977_v30  ;;  %v1985_v40 = vmul.f32 %v3348_v41, %v4541_v18  ;;  %vm2096_vm4 = vcmp.eq.s32.totalorder %v4972_v33, %v5620_v13 }
 0x385   :  { %v2600_v37 = vpack.c.bf16 %v2504_v22, %v2504_v22  ;;  %vm2097_vm5 = vcmp.eq.s32.totalorder %v4980_v0, %v5620_v13  ;;  %v3443_v63 = vsel %vm2096_vm4, 1.0, %v5605_v35  ;;  %v2668_v39 = vpack.c.bf16 %v4985_v25, %v4985_v25 }
 0x386   :  { %v2859_v46 = vpack.c.b16 %v2854_v59, %v2853_v38  ;;  %v2601_v26 = vpack.c.bf16 %v2505_v3, %v2505_v3  ;;  %v3444_v45 = vsel %vm2097_vm5, 1.0, %v5605_v35  ;;  %v2416_v17 = vmul.f32 %v3443_v63, %v4639_v27  ;;  %v1471_v3 = vpop.permute.xlu1 %1470 }
 0x387   :  { %v2887_v30 = vunpack.c.l.b16 %v2600_v37  ;;  %v2417_v36 = vmul.f32 %v3444_v45, %v4639_v27  ;;  %vm1662_vm6 = vcmp.eq.s32.totalorder %v4573_v31, %v4524_v58  ;;  %vm1663_vm9 = vcmp.eq.s32.totalorder %v4581_v14, %v4524_v58 }
 0x388   :  { %2875 = vmatpush.bf16.msra.mxu3 %v2859_v46  ;;  %v2888_v61 = vunpack.c.l.b16 %v2601_v26  ;;  %v2512_v54 = vadd.f32 %v2416_v17, %v1984_v42  ;;  %v3345_v51 = vsel %vm1662_vm6, 1.0, %v5605_v35  ;;  %v3346_v24 = vsel %vm1663_vm9, 1.0, %v5605_v35 }
 0x389   :  { %v2513_v49 = vadd.f32 %v2417_v36, %v1985_v40  ;;  %v1982_v57 = vmul.f32 %v3345_v51, %v4541_v18  ;;  %v1983_v19 = vmul.f32 %v3346_v24, %v4541_v18  ;;  %vm2094_vm10 = vcmp.eq.s32.totalorder %v4573_v31, %v5620_v13 }
 0x38a   :  { %v2893_v43 = vpack.c.b16 %v2888_v61, %v2887_v30  ;;  %v2608_v38 = vpack.c.bf16 %v2512_v54, %v2512_v54  ;;  %vm2095_vm11 = vcmp.eq.s32.totalorder %v4581_v14, %v5620_v13  ;;  %v3441_v58 = vsel %vm2094_vm10, 1.0, %v5605_v35  ;;  %v1507_v61 = vpop.permute.xlu0 %1506 }
 0x38b   :  { %3500 = vmatmul.msk.bf16.vlgmr.msra.gmra.mxu3 %vm2694_vm0, %v2665_v34  ;;  %v2609_v22 = vpack.c.bf16 %v2513_v49, %v2513_v49  ;;  %v3442_v41 = vsel %vm2095_vm11, 1.0, %v5605_v35  ;;  %v2414_v18 = vmul.f32 %v3441_v58, %v4639_v27  ;;  %vm1672_vm12 = vcmp.eq.s32.totalorder %v4885_v53, %v4725_v60 }
 0x38c   :  { %2909 = vmatpush.bf16.msra.mxu1 %v2893_v43  ;;  %v2923_v31 = vunpack.c.l.b16 %v2608_v38  ;;  %v2415_v42 = vmul.f32 %v3442_v41, %v4639_v27  ;;  %vm1673_vm13 = vcmp.eq.s32.totalorder %v4896_v48, %v4725_v60  ;;  %v3355_v14 = vsel %vm1672_vm12, 1.0, %v5605_v35 }
 0x38d   :  { %v2924_v29 = vunpack.c.l.b16 %v2609_v22  ;;  %v2510_v13 = vadd.f32 %v2414_v18, %v1982_v57  ;;  %v3356_v34 = vsel %vm1673_vm13, 1.0, %v5605_v35  ;;  %v1992_v59 = vmul.f32 %v3355_v14, %v4810_v15  ;;  %v5624_v22 = vld [vmem:[#allocation8_spill] sm:$0xff] }
 0x38e   :  { %v2511_v40 = vadd.f32 %v2415_v42, %v1983_v19  ;;  %v1993_v37 = vmul.f32 %v3356_v34, %v4810_v15  ;;  %vm2104_vm14 = vcmp.eq.s32.totalorder %v4885_v53, %v4737_v52  ;;  %vm2105_vm15 = vcmp.eq.s32.totalorder %v4896_v48, %v4737_v52 }
 0x38f   :  { %v2928_v27 = vpack.c.b16 %v2924_v29, %v2923_v31  ;;  %v2606_v63 = vpack.c.bf16 %v2510_v13, %v2510_v13  ;;  %v3451_v46 = vsel %vm2104_vm14, 1.0, %v5605_v35  ;;  %v3452_v26 = vsel %vm2105_vm15, 1.0, %v5605_v35  ;;  %3501 = vmatmul.msk.bf16.vlgmr.msra.gmra.mxu1 %vm2694_vm0, %v2666_v8 }
 0x390   :  { %v2607_v45 = vpack.c.bf16 %v2511_v40, %v2511_v40  ;;  %v2424_v17 = vmul.f32 %v3451_v46, %v4768_v2  ;;  %v2425_v30 = vmul.f32 %v3452_v26, %v4768_v2  ;;  %v1479_v36 = vsel %vm1435_vm8, %v4965_v47, %v1471_v3 }
 0x391   :  { %2942 = vmatpush.bf16.msrb.mxu2 %v2928_v27  ;;  %v2921_v54 = vunpack.c.l.b16 %v2606_v63  ;;  %v1489_v51 = vrot.slane %v1479_v36, 1  ;;  %v1490_v24 = vrot.slane %v1479_v36, 2  ;;  %v1491_v49 = vrot.slane %v1479_v36, 3 }
 0x392   :  { %v2922_v57 = vunpack.c.l.b16 %v2607_v45  ;;  %v2520_v19 = vadd.f32 %v2424_v17, %v1992_v59  ;;  %v2521_v43 = vadd.f32 %v2425_v30, %v1993_v37  ;;  %v5042_v10 = vperm.slane %v1479_v36, 0 }
 0x393   :  { %v5044_v8 = vperm.slane %v1489_v51, 0  ;;  %v5046_v38 = vperm.slane %v1490_v24, 0  ;;  %v5048_v58 = vperm.slane %v1491_v49, 0  ;;  %v5052_v47 = vsel %vm1430_vm7, %v5624_v22, %v1507_v61 }
 0x394   :  { %v2927_v41 = vpack.c.b16 %v2922_v57, %v2921_v54  ;;  %v2616_v18 = vpack.c.bf16 %v2520_v19, %v2520_v19  ;;  %v2617_v31 = vpack.c.bf16 %v2521_v43, %v2521_v43  ;;  %vm1678_vm1 = vcmp.eq.s32.totalorder %v4885_v53, %v4731_v62 }
 0x395   :  { %vm1679_vm2 = vcmp.eq.s32.totalorder %v4896_v48, %v4731_v62  ;;  %v3361_v42 = vsel %vm1678_vm1, 1.0, %v5605_v35  ;;  %vm2110_vm3 = vcmp.eq.s32.totalorder %v4885_v53, %v4739_v28  ;;  %vm2111_vm4 = vcmp.eq.s32.totalorder %v4896_v48, %v4739_v28 }
 0x396   :  { %2943 = vmatpush.bf16.msrb.mxu2 %v2927_v41  ;;  %v2959_v14 = vunpack.c.l.b16 %v2616_v18  ;;  %v2960_v29 = vunpack.c.l.b16 %v2617_v31  ;;  %v3362_v13 = vsel %vm1679_vm2, 1.0, %v5605_v35  ;;  %v1998_v34 = vmul.f32 %v3361_v42, %v4812_v32  ;;  %v5100_v18 = vpop.f32.mrf.mxu0 }
 0x397   :  { %v1999_v59 = vmul.f32 %v3362_v13, %v4812_v32  ;;  %v3457_v3 = vsel %vm2110_vm3, 1.0, %v5605_v35  ;;  %v3458_v40 = vsel %vm2111_vm4, 1.0, %v5605_v35  ;;  %vm1684_vm7 = vcmp.eq.s32.totalorder %v4885_v53, %v4733_v7 }
 0x398   :  { %v2963_v37 = vpack.c.b16 %v2960_v29, %v2959_v14  ;;  %v2430_v27 = vmul.f32 %v3457_v3, %v4772_v11  ;;  %v2431_v63 = vmul.f32 %v3458_v40, %v4772_v11  ;;  %vm1685_vm5 = vcmp.eq.s32.totalorder %v4896_v48, %v4733_v7 }
 0x399   :  { %v3367_v46 = vsel %vm1684_vm7, 1.0, %v5605_v35  ;;  %v3368_v26 = vsel %vm1685_vm5, 1.0, %v5605_v35  ;;  %vm2116_vm6 = vcmp.eq.s32.totalorder %v4885_v53, %v4741_v6  ;;  %vm2117_vm9 = vcmp.eq.s32.totalorder %v4896_v48, %v4741_v6  ;;  %3502 = vmatmul.msk.bf16.vlgmr.msrb.gmra.mxu2 %vm2694_vm0, %v2667_v12 }
 0x39a   :  { %2975 = vmatpush.bf16.msrb.mxu3 %v2963_v37  ;;  %v2526_v45 = vadd.f32 %v2430_v27, %v1998_v34  ;;  %v2527_v17 = vadd.f32 %v2431_v63, %v1999_v59  ;;  %v2004_v30 = vmul.f32 %v3367_v46, %v4814_v4  ;;  %v2005_v36 = vmul.f32 %v3368_v26, %v4814_v4 }
 0x39b   :  { %v3463_v61 = vsel %vm2116_vm6, 1.0, %v5605_v35  ;;  %v3464_v54 = vsel %vm2117_vm9, 1.0, %v5605_v35  ;;  %vm1670_vm10 = vcmp.eq.s32.totalorder %v4972_v33, %v4725_v60  ;;  %vm1671_vm11 = vcmp.eq.s32.totalorder %v4980_v0, %v4725_v60 }
 0x39c   :  { %v2622_v1 = vpack.c.bf16 %v2526_v45, %v2526_v45  ;;  %v2623_v51 = vpack.c.bf16 %v2527_v17, %v2527_v17  ;;  %v2436_v12 = vmul.f32 %v3463_v61, %v4774_v21  ;;  %v2437_v24 = vmul.f32 %v3464_v54, %v4774_v21 }
 0x39d   :  { %v3353_v49 = vsel %vm1670_vm10, 1.0, %v5605_v35  ;;  %v3354_v57 = vsel %vm1671_vm11, 1.0, %v5605_v35  ;;  %vm2102_vm12 = vcmp.eq.s32.totalorder %v4972_v33, %v4737_v52  ;;  %vm2103_vm13 = vcmp.eq.s32.totalorder %v4980_v0, %v4737_v52 }
 0x39e   :  { %v2993_v19 = vunpack.c.l.b16 %v2622_v1  ;;  %v2994_v43 = vunpack.c.l.b16 %v2623_v51  ;;  %v2532_v22 = vadd.f32 %v2436_v12, %v2004_v30  ;;  %v2533_v41 = vadd.f32 %v2437_v24, %v2005_v36 }
 0x39f   :  { %v1990_v31 = vmul.f32 %v3353_v49, %v4810_v15  ;;  %v1991_v42 = vmul.f32 %v3354_v57, %v4810_v15  ;;  %v3449_v14 = vsel %vm2102_vm12, 1.0, %v5605_v35  ;;  %v3450_v29 = vsel %vm2103_vm13, 1.0, %v5605_v35 }
 0x3a0   :  { %v2997_v13 = vpack.c.b16 %v2994_v43, %v2993_v19  ;;  %v2628_v34 = vpack.c.bf16 %v2532_v22, %v2532_v22  ;;  %v2629_v59 = vpack.c.bf16 %v2533_v41, %v2533_v41  ;;  %v2422_v3 = vmul.f32 %v3449_v14, %v4768_v2 }
 0x3a1   :  { %v2423_v40 = vmul.f32 %v3450_v29, %v4768_v2  ;;  %v2669_v37 = vpack.c.bf16 %v5100_v18, %v5100_v18  ;;  %vm1676_vm14 = vcmp.eq.s32.totalorder %v4972_v33, %v4731_v62  ;;  %vm1677_vm15 = vcmp.eq.s32.totalorder %v4980_v0, %v4731_v62 }
 0x3a2   :  { %3009 = vmatpush.bf16.msrb.mxu1 %v2997_v13  ;;  %v3027_v27 = vunpack.c.l.b16 %v2628_v34  ;;  %v3028_v63 = vunpack.c.l.b16 %v2629_v59  ;;  %v2518_v46 = vadd.f32 %v2422_v3, %v1990_v31  ;;  %v3359_v26 = vsel %vm1676_vm14, 1.0, %v5605_v35  ;;  %v5142_v34 = vld [vmem:[%s5575_s3] sm:$0xff] }
 0x3a3   :  { %v2519_v45 = vadd.f32 %v2423_v40, %v1991_v42  ;;  %v3360_v17 = vsel %vm1677_vm15, 1.0, %v5605_v35  ;;  %v1996_v30 = vmul.f32 %v3359_v26, %v4812_v32  ;;  %vm2108_vm1 = vcmp.eq.s32.totalorder %v4972_v33, %v4739_v28 }
 0x3a4   :  { %v3031_v36 = vpack.c.b16 %v3028_v63, %v3027_v27  ;;  %v2614_v61 = vpack.c.bf16 %v2518_v46, %v2518_v46  ;;  %v1997_v54 = vmul.f32 %v3360_v17, %v4812_v32  ;;  %vm2109_vm2 = vcmp.eq.s32.totalorder %v4980_v0, %v4739_v28  ;;  %v5152_v46 = vld [vmem:[%s5575_s3 + $0x8] sm:$0xff] }
 0x3a5   :  { %v2615_v1 = vpack.c.bf16 %v2519_v45, %v2519_v45  ;;  %v3455_v51 = vsel %vm2108_vm1, 1.0, %v5605_v35  ;;  %v3456_v12 = vsel %vm2109_vm2, 1.0, %v5605_v35  ;;  %vm1682_vm3 = vcmp.eq.s32.totalorder %v4972_v33, %v4733_v7 }
 0x3a6   :  { %3043 = vmatpush.bf16.msra.mxu2 %v3031_v36  ;;  %v2957_v24 = vunpack.c.l.b16 %v2614_v61  ;;  %v2428_v49 = vmul.f32 %v3455_v51, %v4772_v11  ;;  %v2429_v57 = vmul.f32 %v3456_v12, %v4772_v11  ;;  %vm1683_vm4 = vcmp.eq.s32.totalorder %v4980_v0, %v4733_v7  ;;  %v1519_v61 = vpop.permute.xlu1 %1518 }
 0x3a7   :  { %v2958_v19 = vunpack.c.l.b16 %v2615_v1  ;;  %v3365_v43 = vsel %vm1682_vm3, 1.0, %v5605_v35  ;;  %v3366_v22 = vsel %vm1683_vm4, 1.0, %v5605_v35  ;;  %vm2114_vm7 = vcmp.eq.s32.totalorder %v4972_v33, %v4741_v6 }
 0x3a8   :  { %v2524_v41 = vadd.f32 %v2428_v49, %v1996_v30  ;;  %v2525_v31 = vadd.f32 %v2429_v57, %v1997_v54  ;;  %v2002_v42 = vmul.f32 %v3365_v43, %v4814_v4  ;;  %v2003_v14 = vmul.f32 %v3366_v22, %v4814_v4 }
 0x3a9   :  { %v2962_v29 = vpack.c.b16 %v2958_v19, %v2957_v24  ;;  %vm2115_vm5 = vcmp.eq.s32.totalorder %v4980_v0, %v4741_v6  ;;  %v3461_v13 = vsel %vm2114_vm7, 1.0, %v5605_v35  ;;  %vm1668_vm6 = vcmp.eq.s32.totalorder %v5142_v34, %v4725_v60 }
 0x3aa   :  { %v2620_v59 = vpack.c.bf16 %v2524_v41, %v2524_v41  ;;  %v2621_v3 = vpack.c.bf16 %v2525_v31, %v2525_v31  ;;  %v3462_v40 = vsel %vm2115_vm5, 1.0, %v5605_v35  ;;  %v2434_v27 = vmul.f32 %v3461_v13, %v4774_v21 }
 0x3ab   :  { %2976 = vmatpush.bf16.msrb.mxu3 %v2962_v29  ;;  %v2435_v63 = vmul.f32 %v3462_v40, %v4774_v21  ;;  %vm1669_vm9 = vcmp.eq.s32.totalorder %v5152_v46, %v4725_v60  ;;  %v3351_v26 = vsel %vm1668_vm6, 1.0, %v5605_v35  ;;  %vm2100_vm10 = vcmp.eq.s32.totalorder %v5142_v34, %v4737_v52 }
 0x3ac   :  { %v2991_v45 = vunpack.c.l.b16 %v2620_v59  ;;  %v2992_v17 = vunpack.c.l.b16 %v2621_v3  ;;  %v2530_v30 = vadd.f32 %v2434_v27, %v2002_v42  ;;  %v3352_v36 = vsel %vm1669_vm9, 1.0, %v5605_v35 }
 0x3ad   :  { %v2531_v54 = vadd.f32 %v2435_v63, %v2003_v14  ;;  %v1988_v1 = vmul.f32 %v3351_v26, %v4810_v15  ;;  %v1989_v51 = vmul.f32 %v3352_v36, %v4810_v15  ;;  %vm2101_vm11 = vcmp.eq.s32.totalorder %v5152_v46, %v4737_v52  ;;  %v1575_v63 = vpop.permute.xlu0 %1574 }
 0x3ae   :  { %v2996_v60 = vpack.c.b16 %v2992_v17, %v2991_v45  ;;  %v2626_v12 = vpack.c.bf16 %v2530_v30, %v2530_v30  ;;  %v3447_v24 = vsel %vm2100_vm10, 1.0, %v5605_v35  ;;  %v3448_v49 = vsel %vm2101_vm11, 1.0, %v5605_v35 }
 0x3af   :  { %v2627_v57 = vpack.c.bf16 %v2531_v54, %v2531_v54  ;;  %v2420_v19 = vmul.f32 %v3447_v24, %v4768_v2  ;;  %v2421_v43 = vmul.f32 %v3448_v49, %v4768_v2  ;;  %v1531_v22 = vsel %vm1435_vm8, %v5052_v47, %v1519_v61 }
 0x3b0   :  { %3010 = vmatpush.bf16.msrb.mxu1 %v2996_v60  ;;  %v3025_v41 = vunpack.c.l.b16 %v2626_v12  ;;  %v1545_v15 = vrot.slane %v1531_v22, 1  ;;  %v1546_v31 = vrot.slane %v1531_v22, 2  ;;  %v1547_v42 = vrot.slane %v1531_v22, 3 }
 0x3b1   :  { %v3026_v52 = vunpack.c.l.b16 %v2627_v57  ;;  %v2516_v14 = vadd.f32 %v2420_v19, %v1988_v1  ;;  %v2517_v29 = vadd.f32 %v2421_v43, %v1989_v51  ;;  %v5170_v13 = vperm.slane %v1531_v22, 0 }
 0x3b2   :  { %v5172_v59 = vperm.slane %v1545_v15, 0  ;;  %v5174_v3 = vperm.slane %v1546_v31, 0  ;;  %v5176_v40 = vperm.slane %v1547_v42, 0  ;;  %vm1690_vm12 = vcmp.eq.s32.totalorder %v4885_v53, %v4735_v50 }
 0x3b3   :  { %v3030_v2 = vpack.c.b16 %v3026_v52, %v3025_v41  ;;  %v2612_v47 = vpack.c.bf16 %v2516_v14, %v2516_v14  ;;  %v2613_v27 = vpack.c.bf16 %v2517_v29, %v2517_v29  ;;  %vm1691_vm13 = vcmp.eq.s32.totalorder %v4896_v48, %v4735_v50 }
 0x3b4   :  { %v3373_v26 = vsel %vm1690_vm12, 1.0, %v5605_v35  ;;  %v3374_v45 = vsel %vm1691_vm13, 1.0, %v5605_v35  ;;  %vm2122_vm14 = vcmp.eq.s32.totalorder %v4885_v53, %v4747_v20  ;;  %vm2123_vm15 = vcmp.eq.s32.totalorder %v4896_v48, %v4747_v20 }
 0x3b5   :  { %3044 = vmatpush.bf16.msra.mxu2 %v3030_v2  ;;  %v2955_v17 = vunpack.c.l.b16 %v2612_v47  ;;  %v2956_v30 = vunpack.c.l.b16 %v2613_v27  ;;  %v2010_v36 = vmul.f32 %v3373_v26, %v4816_v5  ;;  %v2011_v61 = vmul.f32 %v3374_v45, %v4816_v5 }
 0x3b6   :  { %v3469_v54 = vsel %vm2122_vm14, 1.0, %v5605_v35  ;;  %v3470_v1 = vsel %vm2123_vm15, 1.0, %v5605_v35  ;;  %v1587_v51 = vsel %vm1435_vm8, %v4917_v55, %v1575_v63  ;;  %vm1674_vm1 = vcmp.eq.s32.totalorder %v5142_v34, %v4731_v62 }
 0x3b7   :  { %v2961_v60 = vpack.c.b16 %v2956_v30, %v2955_v17  ;;  %v2442_v12 = vmul.f32 %v3469_v54, %v4776_v16  ;;  %v2443_v24 = vmul.f32 %v3470_v1, %v4776_v16  ;;  %v1601_v49 = vrot.slane %v1587_v51, 1 }
 0x3b8   :  { %v1602_v57 = vrot.slane %v1587_v51, 2  ;;  %v1603_v19 = vrot.slane %v1587_v51, 3  ;;  %v5198_v43 = vperm.slane %v1587_v51, 0  ;;  %vm1675_vm2 = vcmp.eq.s32.totalorder %v5152_v46, %v4731_v62 }
 0x3b9   :  { %2977 = vmatpush.bf16.msrb.mxu3 %v2961_v60  ;;  %v2538_v22 = vadd.f32 %v2442_v12, %v2010_v36  ;;  %v2539_v41 = vadd.f32 %v2443_v24, %v2011_v61  ;;  %v5202_v55 = vperm.slane %v1601_v49, 0  ;;  %v3357_v15 = vsel %vm1674_vm1, 1.0, %v5605_v35 }
 0x3ba   :  { %v5205_v31 = vperm.slane %v1602_v57, 0  ;;  %v5207_v42 = vperm.slane %v1603_v19, 0  ;;  %v3358_v52 = vsel %vm1675_vm2, 1.0, %v5605_v35  ;;  %v1994_v14 = vmul.f32 %v3357_v15, %v4812_v32 }
 0x3bb   :  { %v2634_v29 = vpack.c.bf16 %v2538_v22, %v2538_v22  ;;  %v2635_v2 = vpack.c.bf16 %v2539_v41, %v2539_v41  ;;  %v1995_v47 = vmul.f32 %v3358_v52, %v4812_v32  ;;  %vm2106_vm8 = vcmp.eq.s32.totalorder %v5142_v34, %v4739_v28 }
 0x3bc   :  { %vm2107_vm3 = vcmp.eq.s32.totalorder %v5152_v46, %v4739_v28  ;;  %v3453_v62 = vsel %vm2106_vm8, 1.0, %v5605_v35  ;;  %vm1680_vm4 = vcmp.eq.s32.totalorder %v5142_v34, %v4733_v7  ;;  %vm1681_vm7 = vcmp.eq.s32.totalorder %v5152_v46, %v4733_v7  ;;  %3503 = vmatmul.msk.bf16.vlgmr.msrb.gmra.mxu3 %vm2694_vm0, %v2668_v39  ;;  %v5227_v28 = vpop.f32.mrf.mxu0 }
 0x3bd   :  { %v3061_v32 = vunpack.c.l.b16 %v2634_v29  ;;  %v3062_v27 = vunpack.c.l.b16 %v2635_v2  ;;  %v3454_v63 = vsel %vm2107_vm3, 1.0, %v5605_v35  ;;  %v2426_v26 = vmul.f32 %v3453_v62, %v4772_v11 }
 0x3be   :  { %v2427_v45 = vmul.f32 %v3454_v63, %v4772_v11  ;;  %v3363_v17 = vsel %vm1680_vm4, 1.0, %v5605_v35  ;;  %v3364_v30 = vsel %vm1681_vm7, 1.0, %v5605_v35  ;;  %vm2112_vm5 = vcmp.eq.s32.totalorder %v5142_v34, %v4741_v6 }
 0x3bf   :  { %v3065_v7 = vpack.c.b16 %v3062_v27, %v3061_v32  ;;  %v2522_v25 = vadd.f32 %v2426_v26, %v1994_v14  ;;  %v2000_v39 = vmul.f32 %v3363_v17, %v4814_v4  ;;  %v2001_v36 = vmul.f32 %v3364_v30, %v4814_v4 }
 0x3c0   :  { %v2523_v61 = vadd.f32 %v2427_v45, %v1995_v47  ;;  %vm2113_vm6 = vcmp.eq.s32.totalorder %v5152_v46, %v4741_v6  ;;  %v3459_v54 = vsel %vm2112_vm5, 1.0, %v5605_v35  ;;  %v2670_v11 = vpack.c.bf16 %v5227_v28, %v5227_v28 }
 0x3c1   :  { %3077 = vmatpush.bf16.msra.mxu3 %v3065_v7  ;;  %v2618_v1 = vpack.c.bf16 %v2522_v25, %v2522_v25  ;;  %v3460_v51 = vsel %vm2113_vm6, 1.0, %v5605_v35  ;;  %v2432_v60 = vmul.f32 %v3459_v54, %v4774_v21  ;;  %vm1688_vm9 = vcmp.eq.s32.totalorder %v4972_v33, %v4735_v50 }
 0x3c2   :  { %v2619_v12 = vpack.c.bf16 %v2523_v61, %v2523_v61  ;;  %v2433_v4 = vmul.f32 %v3460_v51, %v4774_v21  ;;  %vm1689_vm10 = vcmp.eq.s32.totalorder %v4980_v0, %v4735_v50  ;;  %v3371_v6 = vsel %vm1688_vm9, 1.0, %v5605_v35 }
 0x3c3   :  { %v2989_v24 = vunpack.c.l.b16 %v2618_v1  ;;  %v2528_v49 = vadd.f32 %v2432_v60, %v2000_v39  ;;  %v3372_v57 = vsel %vm1689_vm10, 1.0, %v5605_v35  ;;  %v2008_v19 = vmul.f32 %v3371_v6, %v4816_v5 }
 0x3c4   :  { %v2990_v22 = vunpack.c.l.b16 %v2619_v12  ;;  %v2529_v41 = vadd.f32 %v2433_v4, %v2001_v36  ;;  %v2009_v15 = vmul.f32 %v3372_v57, %v4816_v5  ;;  %vm2120_vm11 = vcmp.eq.s32.totalorder %v4972_v33, %v4747_v20  ;;  %v5267_v30 = vpop.f32.mrf.mxu0 }
 0x3c5   :  { %v2624_v52 = vpack.c.bf16 %v2528_v49, %v2528_v49  ;;  %vm2121_vm12 = vcmp.eq.s32.totalorder %v4980_v0, %v4747_v20  ;;  %v3467_v21 = vsel %vm2120_vm11, 1.0, %v5605_v35  ;;  %vm1686_vm13 = vcmp.eq.s32.totalorder %v5142_v34, %v4735_v50 }
 0x3c6   :  { %v2995_v14 = vpack.c.b16 %v2990_v22, %v2989_v24  ;;  %v2625_v29 = vpack.c.bf16 %v2529_v41, %v2529_v41  ;;  %v3468_v2 = vsel %vm2121_vm12, 1.0, %v5605_v35  ;;  %v2440_v47 = vmul.f32 %v3467_v21, %v4776_v16 }
 0x3c7   :  { %v3023_v62 = vunpack.c.l.b16 %v2624_v52  ;;  %v2441_v32 = vmul.f32 %v3468_v2, %v4776_v16  ;;  %vm1687_vm14 = vcmp.eq.s32.totalorder %v5152_v46, %v4735_v50  ;;  %v3369_v27 = vsel %vm1686_vm13, 1.0, %v5605_v35 }
 0x3c8   :  { %3011 = vmatpush.bf16.msrb.mxu1 %v2995_v14  ;;  %v3024_v63 = vunpack.c.l.b16 %v2625_v29  ;;  %v2536_v26 = vadd.f32 %v2440_v47, %v2008_v19  ;;  %v3370_v45 = vsel %vm1687_vm14, 1.0, %v5605_v35  ;;  %v2006_v17 = vmul.f32 %v3369_v27, %v4816_v5 }
 0x3c9   :  { %v2537_v7 = vadd.f32 %v2441_v32, %v2009_v15  ;;  %v2007_v25 = vmul.f32 %v3370_v45, %v4816_v5  ;;  %vm2118_vm15 = vcmp.eq.s32.totalorder %v5142_v34, %v4747_v20  ;;  %vm2119_vm1 = vcmp.eq.s32.totalorder %v5152_v46, %v4747_v20 }
 0x3ca   :  { %v3029_v50 = vpack.c.b16 %v3024_v63, %v3023_v62  ;;  %v2632_v39 = vpack.c.bf16 %v2536_v26, %v2536_v26  ;;  %v3465_v36 = vsel %vm2118_vm15, 1.0, %v5605_v35  ;;  %v3466_v61 = vsel %vm2119_vm1, 1.0, %v5605_v35 }
 0x3cb   :  { %v2633_v54 = vpack.c.bf16 %v2537_v7, %v2537_v7  ;;  %v2438_v1 = vmul.f32 %v3465_v36, %v4776_v16  ;;  %v2439_v51 = vmul.f32 %v3466_v61, %v4776_v16  ;;  %3504 = vmatmul.msk.bf16.vlgmr.msrb.gmra.mxu1 %vm2694_vm0, %v2669_v37  ;;  %v2671_v5 = vpack.c.bf16 %v5267_v30, %v5267_v30 }
 0x3cc   :  { %3045 = vmatpush.bf16.msra.mxu2 %v3029_v50  ;;  %v3059_v20 = vunpack.c.l.b16 %v2632_v39  ;;  %vm1696_vm2 = vcmp.eq.s32.totalorder %v4885_v53, %v4921_v9  ;;  %vm1697_vm8 = vcmp.eq.s32.totalorder %v4896_v48, %v4921_v9  ;;  %vm2128_vm3 = vcmp.eq.s32.totalorder %v4885_v53, %v5042_v10 }
 0x3cd   :  { %v3060_v16 = vunpack.c.l.b16 %v2633_v54  ;;  %v2534_v60 = vadd.f32 %v2438_v1, %v2006_v17  ;;  %v2535_v12 = vadd.f32 %v2439_v51, %v2007_v25  ;;  %v3379_v18 = vsel %vm1696_vm2, 1.0, %v5605_v35 }
 0x3ce   :  { %v3380_v37 = vsel %vm1697_vm8, 1.0, %v5605_v35  ;;  %v2016_v4 = vmul.f32 %v3379_v18, %v5170_v13  ;;  %vm2129_vm4 = vcmp.eq.s32.totalorder %v4896_v48, %v5042_v10  ;;  %v3475_v6 = vsel %vm2128_vm3, 1.0, %v5605_v35 }
 0x3cf   :  { %v3064_v24 = vpack.c.b16 %v3060_v16, %v3059_v20  ;;  %v2630_v49 = vpack.c.bf16 %v2534_v60, %v2534_v60  ;;  %v2631_v57 = vpack.c.bf16 %v2535_v12, %v2535_v12  ;;  %v2017_v19 = vmul.f32 %v3380_v37, %v5170_v13  ;;  %3505 = vmatmul.msk.bf16.vlgmr.msra.gmra.mxu2 %vm2694_vm0, %v2670_v11 }
 0x3d0   :  { %v3476_v22 = vsel %vm2129_vm4, 1.0, %v5605_v35  ;;  %v2448_v41 = vmul.f32 %v3475_v6, %v5198_v43  ;;  %vm1702_vm7 = vcmp.eq.s32.totalorder %v4885_v53, %v4923_v56  ;;  %vm1703_vm5 = vcmp.eq.s32.totalorder %v4896_v48, %v4923_v56 }
 0x3d1   :  { %3078 = vmatpush.bf16.msra.mxu3 %v3064_v24  ;;  %v3057_v15 = vunpack.c.l.b16 %v2630_v49  ;;  %v3058_v52 = vunpack.c.l.b16 %v2631_v57  ;;  %v2449_v21 = vmul.f32 %v3476_v22, %v5198_v43  ;;  %v3385_v14 = vsel %vm1702_vm7, 1.0, %v5605_v35 }
 0x3d2   :  { %v2544_v28 = vadd.f32 %v2448_v41, %v2016_v4  ;;  %v3386_v11 = vsel %vm1703_vm5, 1.0, %v5605_v35  ;;  %v2022_v29 = vmul.f32 %v3385_v14, %v5172_v59  ;;  %vm2134_vm6 = vcmp.eq.s32.totalorder %v4885_v53, %v5044_v8 }
 0x3d3   :  { %v3063_v2 = vpack.c.b16 %v3058_v52, %v3057_v15  ;;  %v2545_v47 = vadd.f32 %v2449_v21, %v2017_v19  ;;  %v2023_v62 = vmul.f32 %v3386_v11, %v5172_v59  ;;  %vm2135_vm9 = vcmp.eq.s32.totalorder %v4896_v48, %v5044_v8 }
 0x3d4   :  { %v2640_v32 = vpack.c.bf16 %v2544_v28, %v2544_v28  ;;  %v3481_v27 = vsel %vm2134_vm6, 1.0, %v5605_v35  ;;  %v3482_v63 = vsel %vm2135_vm9, 1.0, %v5605_v35  ;;  %vm1708_vm10 = vcmp.eq.s32.totalorder %v4885_v53, %v4927_v44 }
 0x3d5   :  { %3079 = vmatpush.bf16.msra.mxu3 %v3063_v2  ;;  %v2641_v26 = vpack.c.bf16 %v2545_v47, %v2545_v47  ;;  %v2454_v45 = vmul.f32 %v3481_v27, %v5202_v55  ;;  %v2455_v17 = vmul.f32 %v3482_v63, %v5202_v55  ;;  %vm1709_vm11 = vcmp.eq.s32.totalorder %v4896_v48, %v4927_v44 }
 0x3d6   :  { %v3095_v30 = vunpack.c.l.b16 %v2640_v32  ;;  %v3391_v7 = vsel %vm1708_vm10, 1.0, %v5605_v35  ;;  %v3392_v25 = vsel %vm1709_vm11, 1.0, %v5605_v35  ;;  %vm2140_vm12 = vcmp.eq.s32.totalorder %v4885_v53, %v5046_v38 }
 0x3d7   :  { %v3096_v50 = vunpack.c.l.b16 %v2641_v26  ;;  %v2550_v39 = vadd.f32 %v2454_v45, %v2022_v29  ;;  %v2551_v36 = vadd.f32 %v2455_v17, %v2023_v62  ;;  %v2028_v61 = vmul.f32 %v3391_v7, %v5174_v3 }
 0x3d8   :  { %v2029_v54 = vmul.f32 %v3392_v25, %v5174_v3  ;;  %vm2141_vm13 = vcmp.eq.s32.totalorder %v4896_v48, %v5046_v38  ;;  %v3487_v1 = vsel %vm2140_vm12, 1.0, %v5605_v35  ;;  %vm1694_vm14 = vcmp.eq.s32.totalorder %v4972_v33, %v4921_v9  ;;  %3506 = vmatmul.msk.bf16.vlgmr.msra.gmra.mxu3 %vm2694_vm0, %v2671_v5 }
 0x3d9   :  { %v3099_v51 = vpack.c.b16 %v3096_v50, %v3095_v30  ;;  %v2646_v20 = vpack.c.bf16 %v2550_v39, %v2550_v39  ;;  %v2647_v53 = vpack.c.bf16 %v2551_v36, %v2551_v36  ;;  %v3488_v16 = vsel %vm2141_vm13, 1.0, %v5605_v35 }
 0x3da   :  { %v2460_v60 = vmul.f32 %v3487_v1, %v5205_v31  ;;  %v2461_v12 = vmul.f32 %v3488_v16, %v5205_v31  ;;  %vm1695_vm15 = vcmp.eq.s32.totalorder %v4980_v0, %v4921_v9  ;;  %v3377_v48 = vsel %vm1694_vm14, 1.0, %v5605_v35 }
 0x3db   :  { %3111 = vmatpush.bf16.msra.mxu1 %v3099_v51  ;;  %v3129_v18 = vunpack.c.l.b16 %v2646_v20  ;;  %v3130_v37 = vunpack.c.l.b16 %v2647_v53  ;;  %v3378_v4 = vsel %vm1695_vm15, 1.0, %v5605_v35  ;;  %v2014_v5 = vmul.f32 %v3377_v48, %v5170_v13 }
 0x3dc   :  { %v2556_v6 = vadd.f32 %v2460_v60, %v2028_v61  ;;  %v2557_v24 = vadd.f32 %v2461_v12, %v2029_v54  ;;  %v2015_v49 = vmul.f32 %v3378_v4, %v5170_v13  ;;  %vm2126_vm1 = vcmp.eq.s32.totalorder %v4972_v33, %v5042_v10 }
 0x3dd   :  { %v3133_v57 = vpack.c.b16 %v3130_v37, %v3129_v18  ;;  %vm2127_vm2 = vcmp.eq.s32.totalorder %v4980_v0, %v5042_v10  ;;  %v3473_v19 = vsel %vm2126_vm1, 1.0, %v5605_v35  ;;  %vm1700_vm8 = vcmp.eq.s32.totalorder %v4972_v33, %v4923_v56 }
 0x3de   :  { %v2652_v22 = vpack.c.bf16 %v2556_v6, %v2556_v6  ;;  %v2653_v41 = vpack.c.bf16 %v2557_v24, %v2557_v24  ;;  %v3474_v15 = vsel %vm2127_vm2, 1.0, %v5605_v35  ;;  %v2446_v52 = vmul.f32 %v3473_v19, %v5198_v43 }
 0x3df   :  { %3145 = vmatpush.bf16.msrb.mxu2 %v3133_v57  ;;  %v2447_v21 = vmul.f32 %v3474_v15, %v5198_v43  ;;  %vm1701_vm3 = vcmp.eq.s32.totalorder %v4980_v0, %v4923_v56  ;;  %v3383_v14 = vsel %vm1700_vm8, 1.0, %v5605_v35  ;;  %vm2132_vm4 = vcmp.eq.s32.totalorder %v4972_v33, %v5044_v8 }
 0x3e0   :  { %v3163_v28 = vunpack.c.l.b16 %v2652_v22  ;;  %v3164_v11 = vunpack.c.l.b16 %v2653_v41  ;;  %v2542_v29 = vadd.f32 %v2446_v52, %v2014_v5  ;;  %v3384_v2 = vsel %vm1701_vm3, 1.0, %v5605_v35 }
 0x3e1   :  { %v2543_v47 = vadd.f32 %v2447_v21, %v2015_v49  ;;  %v2020_v62 = vmul.f32 %v3383_v14, %v5172_v59  ;;  %v2021_v32 = vmul.f32 %v3384_v2, %v5172_v59  ;;  %vm2133_vm7 = vcmp.eq.s32.totalorder %v4980_v0, %v5044_v8 }
 0x3e2   :  { %v3167_v27 = vpack.c.b16 %v3164_v11, %v3163_v28  ;;  %v2638_v63 = vpack.c.bf16 %v2542_v29, %v2542_v29  ;;  %v3479_v26 = vsel %vm2132_vm4, 1.0, %v5605_v35  ;;  %v3480_v45 = vsel %vm2133_vm7, 1.0, %v5605_v35 }
 0x3e3   :  { %v2639_v17 = vpack.c.bf16 %v2543_v47, %v2543_v47  ;;  %v2452_v30 = vmul.f32 %v3479_v26, %v5202_v55  ;;  %v2453_v7 = vmul.f32 %v3480_v45, %v5202_v55  ;;  %vm1706_vm5 = vcmp.eq.s32.totalorder %v4972_v33, %v4927_v44 }
 0x3e4   :  { %3179 = vmatpush.bf16.msrb.mxu3 %v3167_v27  ;;  %v3093_v25 = vunpack.c.l.b16 %v2638_v63  ;;  %vm1707_vm6 = vcmp.eq.s32.totalorder %v4980_v0, %v4927_v44  ;;  %v3389_v50 = vsel %vm1706_vm5, 1.0, %v5605_v35  ;;  %vm2138_vm9 = vcmp.eq.s32.totalorder %v4972_v33, %v5046_v38 }
 0x3e5   :  { %v3094_v39 = vunpack.c.l.b16 %v2639_v17  ;;  %v2548_v36 = vadd.f32 %v2452_v30, %v2020_v62  ;;  %v2549_v61 = vadd.f32 %v2453_v7, %v2021_v32  ;;  %v3390_v54 = vsel %vm1707_vm6, 1.0, %v5605_v35  ;;  %v5416_v32 = vpop.f32.mrf.mxu3 }
 0x3e6   :  { %v2026_v1 = vmul.f32 %v3389_v50, %v5174_v3  ;;  %v2027_v51 = vmul.f32 %v3390_v54, %v5174_v3  ;;  %vm2139_vm10 = vcmp.eq.s32.totalorder %v4980_v0, %v5046_v38  ;;  %v3485_v20 = vsel %vm2138_vm9, 1.0, %v5605_v35 }
 0x3e7   :  { %v3098_v53 = vpack.c.b16 %v3094_v39, %v3093_v25  ;;  %v2644_v16 = vpack.c.bf16 %v2548_v36, %v2548_v36  ;;  %v2645_v60 = vpack.c.bf16 %v2549_v61, %v2549_v61  ;;  %v3486_v12 = vsel %vm2139_vm10, 1.0, %v5605_v35 }
 0x3e8   :  { %v2458_v33 = vmul.f32 %v3485_v20, %v5205_v31  ;;  %v2459_v48 = vmul.f32 %v3486_v12, %v5205_v31  ;;  %vm1692_vm11 = vcmp.eq.s32.totalorder %v5142_v34, %v4921_v9  ;;  %vm1693_vm12 = vcmp.eq.s32.totalorder %v5152_v46, %v4921_v9  ;;  %v3601_v9 = vld [vmem:[%s5575_s3 + $0x20] sm:$0xff] }
 0x3e9   :  { %3112 = vmatpush.bf16.msra.mxu1 %v3098_v53  ;;  %v3127_v18 = vunpack.c.l.b16 %v2644_v16  ;;  %v3128_v0 = vunpack.c.l.b16 %v2645_v60  ;;  %v3375_v37 = vsel %vm1692_vm11, 1.0, %v5605_v35  ;;  %v3376_v4 = vsel %vm1693_vm12, 1.0, %v5605_v35  ;;  %v5437_v60 = vpop.f32.mrf.mxu1 }
 0x3ea   :  { %v2554_v5 = vadd.f32 %v2458_v33, %v2026_v1  ;;  %v2555_v6 = vadd.f32 %v2459_v48, %v2027_v51  ;;  %v2012_v24 = vmul.f32 %v3375_v37, %v5170_v13  ;;  %v2013_v49 = vmul.f32 %v3376_v4, %v5170_v13 }
 0x3eb   :  { %v3132_v57 = vpack.c.b16 %v3128_v0, %v3127_v18  ;;  %vm2124_vm13 = vcmp.eq.s32.totalorder %v5142_v34, %v5042_v10  ;;  %vm2125_vm14 = vcmp.eq.s32.totalorder %v5152_v46, %v5042_v10  ;;  %vm1714_vm15 = vcmp.eq.s32.totalorder %v3601_v9, %v4929_v23  ;;  %v3602_v10 = vld [vmem:[%s5575_s3 + $0x28] sm:$0xff] }
 0x3ec   :  { %v2650_v19 = vpack.c.bf16 %v2554_v5, %v2554_v5  ;;  %v2651_v22 = vpack.c.bf16 %v2555_v6, %v2555_v6  ;;  %v3471_v41 = vsel %vm2124_vm13, 1.0, %v5605_v35  ;;  %v3472_v15 = vsel %vm2125_vm14, 1.0, %v5605_v35 }
 0x3ed   :  { %3146 = vmatpush.bf16.msrb.mxu2 %v3132_v57  ;;  %v2444_v13 = vmul.f32 %v3471_v41, %v5198_v43  ;;  %v2445_v52 = vmul.f32 %v3472_v15, %v5198_v43  ;;  %vm1715_vm1 = vcmp.eq.s32.totalorder %v3602_v10, %v4929_v23  ;;  %v3397_v21 = vsel %vm1714_vm15, 1.0, %v5605_v35  ;;  %v5414_v43 = vpop.f32.mrf.mxu2  ;;  %v5450_v0 = vpop.f32.mrf.mxu3  ;;  %v3603_v15 = vld [vmem:[%s5575_s3 + $0x10] sm:$0xff] }
 0x3ee   :  { %v3161_v14 = vunpack.c.l.b16 %v2650_v19  ;;  %v3162_v28 = vunpack.c.l.b16 %v2651_v22  ;;  %v3398_v11 = vsel %vm1715_vm1, 1.0, %v5605_v35  ;;  %v2034_v29 = vmul.f32 %v3397_v21, %v5176_v40 }
 0x3ef   :  { %v2540_v2 = vadd.f32 %v2444_v13, %v2012_v24  ;;  %v2541_v47 = vadd.f32 %v2445_v52, %v2013_v49  ;;  %v2035_v62 = vmul.f32 %v3398_v11, %v5176_v40  ;;  %vm2146_vm2 = vcmp.eq.s32.totalorder %v3601_v9, %v5048_v58 }
 0x3f0   :  { %v3166_v27 = vpack.c.b16 %v3162_v28, %v3161_v14  ;;  %vm2147_vm8 = vcmp.eq.s32.totalorder %v3602_v10, %v5048_v58  ;;  %v3493_v63 = vsel %vm2146_vm2, 1.0, %v5605_v35  ;;  %vm1698_vm3 = vcmp.eq.s32.totalorder %v5142_v34, %v4923_v56 }
 0x3f1   :  { %v2636_v26 = vpack.c.bf16 %v2540_v2, %v2540_v2  ;;  %v2637_v45 = vpack.c.bf16 %v2541_v47, %v2541_v47  ;;  %v3494_v17 = vsel %vm2147_vm8, 1.0, %v5605_v35  ;;  %v2466_v30 = vmul.f32 %v3493_v63, %v5207_v42  ;;  %v2709_v11 = vpop.f32.mrf.mxu1 }
 0x3f2   :  { %3180 = vmatpush.bf16.msrb.mxu3 %v3166_v27  ;;  %v2467_v7 = vmul.f32 %v3494_v17, %v5207_v42  ;;  %vm1699_vm4 = vcmp.eq.s32.totalorder %v5152_v46, %v4923_v56  ;;  %v3381_v25 = vsel %vm1698_vm3, 1.0, %v5605_v35  ;;  %vm2130_vm7 = vcmp.eq.s32.totalorder %v5142_v34, %v5044_v8 }
 0x3f3   :  { %v3091_v50 = vunpack.c.l.b16 %v2636_v26  ;;  %v3092_v39 = vunpack.c.l.b16 %v2637_v45  ;;  %v2562_v36 = vadd.f32 %v2466_v30, %v2034_v29  ;;  %v3382_v61 = vsel %vm1699_vm4, 1.0, %v5605_v35 }
 0x3f4   :  { %v2563_v54 = vadd.f32 %v2467_v7, %v2035_v62  ;;  %v2018_v1 = vmul.f32 %v3381_v25, %v5172_v59  ;;  %v2019_v51 = vmul.f32 %v3382_v61, %v5172_v59  ;;  %vm2131_vm5 = vcmp.eq.s32.totalorder %v5152_v46, %v5044_v8 }
 0x3f5   :  { %v3097_v20 = vpack.c.b16 %v3092_v39, %v3091_v50  ;;  %v2658_v56 = vpack.c.bf16 %v2562_v36, %v2562_v36  ;;  %v3477_v53 = vsel %vm2130_vm7, 1.0, %v5605_v35  ;;  %v3478_v16 = vsel %vm2131_vm5, 1.0, %v5605_v35  ;;  %v5448_v18 = vpop.f32.mrf.mxu2  ;;  %v2775_v26 = vpop.f32.mrf.mxu3 }
 0x3f6   :  { %v2659_v12 = vpack.c.bf16 %v2563_v54, %v2563_v54  ;;  %v2450_v33 = vmul.f32 %v3477_v53, %v5202_v55  ;;  %v2451_v48 = vmul.f32 %v3478_v16, %v5202_v55  ;;  %vm1704_vm6 = vcmp.eq.s32.totalorder %v5142_v34, %v4927_v44 }
 0x3f7   :  { %3113 = vmatpush.bf16.msra.mxu1 %v3097_v20  ;;  %v3197_v59 = vunpack.c.l.b16 %v2658_v56  ;;  %vm1705_vm9 = vcmp.eq.s32.totalorder %v5152_v46, %v4927_v44  ;;  %v3387_v8 = vsel %vm1704_vm6, 1.0, %v5605_v35  ;;  %vm2136_vm10 = vcmp.eq.s32.totalorder %v5142_v34, %v5046_v38 }
 0x3f8   :  { %v3198_v37 = vunpack.c.l.b16 %v2659_v12  ;;  %v2546_v4 = vadd.f32 %v2450_v33, %v2018_v1  ;;  %v2547_v55 = vadd.f32 %v2451_v48, %v2019_v51  ;;  %v3388_v5 = vsel %vm1705_vm9, 1.0, %v5605_v35 }
 0x3f9   :  { %v2024_v6 = vmul.f32 %v3387_v8, %v5174_v3  ;;  %v2025_v24 = vmul.f32 %v3388_v5, %v5174_v3  ;;  %vm2137_vm11 = vcmp.eq.s32.totalorder %v5152_v46, %v5046_v38  ;;  %v3483_v44 = vsel %vm2136_vm10, 1.0, %v5605_v35  ;;  %v3604_v38 = vld [vmem:[%s5575_s3 + $0x18] sm:$0xff] }
 0x3fa   :  { %v3201_v49 = vpack.c.b16 %v3198_v37, %v3197_v59  ;;  %v2642_v57 = vpack.c.bf16 %v2546_v4, %v2546_v4  ;;  %v2643_v9 = vpack.c.bf16 %v2547_v55, %v2547_v55  ;;  %v3484_v19 = vsel %vm2137_vm11, 1.0, %v5605_v35 }
 0x3fb   :  { %v2456_v22 = vmul.f32 %v3483_v44, %v5205_v31  ;;  %v2457_v41 = vmul.f32 %v3484_v19, %v5205_v31  ;;  %vm1712_vm12 = vcmp.eq.s32.totalorder %v3603_v15, %v4929_v23  ;;  %vm1713_vm13 = vcmp.eq.s32.totalorder %v3604_v38, %v4929_v23 }
 0x3fc   :  { %3213 = vmatpush.bf16.msrb.mxu1 %v3201_v49  ;;  %v3125_v3 = vunpack.c.l.b16 %v2642_v57  ;;  %v3126_v13 = vunpack.c.l.b16 %v2643_v9  ;;  %v3395_v52 = vsel %vm1712_vm12, 1.0, %v5605_v35  ;;  %v3396_v10 = vsel %vm1713_vm13, 1.0, %v5605_v35 }
 0x3fd   :  { %v2552_v31 = vadd.f32 %v2456_v22, %v2024_v6  ;;  %v2553_v21 = vadd.f32 %v2457_v41, %v2025_v24  ;;  %v2032_v14 = vmul.f32 %v3395_v52, %v5176_v40  ;;  %v2033_v28 = vmul.f32 %v3396_v10, %v5176_v40  ;;  %v2741_v63 = vpop.f32.mrf.mxu2 }
 0x3fe   :  { %v3131_v29 = vpack.c.b16 %v3126_v13, %v3125_v3  ;;  %vm2144_vm14 = vcmp.eq.s32.totalorder %v3603_v15, %v5048_v58  ;;  %vm2145_vm15 = vcmp.eq.s32.totalorder %v3604_v38, %v5048_v58  ;;  %vm1710_vm1 = vcmp.eq.s32.totalorder %v5142_v34, %v4929_v23 }
 0x3ff   :  { %v2648_v2 = vpack.c.bf16 %v2552_v31, %v2552_v31  ;;  %v2649_v47 = vpack.c.bf16 %v2553_v21, %v2553_v21  ;;  %v3491_v62 = vsel %vm2144_vm14, 1.0, %v5605_v35  ;;  %v3492_v27 = vsel %vm2145_vm15, 1.0, %v5605_v35 }
 0x400   :  { %3147 = vmatpush.bf16.msrb.mxu2 %v3131_v29  ;;  %v2464_v45 = vmul.f32 %v3491_v62, %v5207_v42  ;;  %v2465_v17 = vmul.f32 %v3492_v27, %v5207_v42  ;;  %vm1711_vm2 = vcmp.eq.s32.totalorder %v5152_v46, %v4929_v23  ;;  %v3393_v30 = vsel %vm1710_vm1, 1.0, %v5605_v35 }
 0x401   :  { %v3159_v7 = vunpack.c.l.b16 %v2648_v2  ;;  %v3160_v25 = vunpack.c.l.b16 %v2649_v47  ;;  %v3394_v50 = vsel %vm1711_vm2, 1.0, %v5605_v35  ;;  %v2030_v39 = vmul.f32 %v3393_v30, %v5176_v40 }
 0x402   :  { %v2560_v36 = vadd.f32 %v2464_v45, %v2032_v14  ;;  %v2561_v61 = vadd.f32 %v2465_v17, %v2033_v28  ;;  %v2031_v54 = vmul.f32 %v3394_v50, %v5176_v40  ;;  %vm2142_vm8 = vcmp.eq.s32.totalorder %v5142_v34, %v5048_v58 }
 0x403   :  { %v3165_v1 = vpack.c.b16 %v3160_v25, %v3159_v7  ;;  %vm2143_vm3 = vcmp.eq.s32.totalorder %v5152_v46, %v5048_v58  ;;  %v3489_v23 = vsel %vm2142_vm8, 1.0, %v5605_v35  ;;  %v2672_v51 = vpack.c.bf16 %v5414_v43, %v5414_v43  ;;  %v2809_v46 = vpop.f32.mrf.mxu1 }
 0x404   :  { %v2656_v20 = vpack.c.bf16 %v2560_v36, %v2560_v36  ;;  %v2657_v56 = vpack.c.bf16 %v2561_v61, %v2561_v61  ;;  %v3490_v53 = vsel %vm2143_vm3, 1.0, %v5605_v35  ;;  %v2462_v16 = vmul.f32 %v3489_v23, %v5207_v42 }
 0x405   :  { %3181 = vmatpush.bf16.msrb.mxu3 %v3165_v1  ;;  %v2463_v40 = vmul.f32 %v3490_v53, %v5207_v42  ;;  %3507 = vmatmul.msk.bf16.vlgmr.msra.gmra.mxu1 %vm2694_vm0, %v2672_v51  ;;  %v2673_v34 = vpack.c.bf16 %v5448_v18, %v5448_v18  ;;  %v2674_v58 = vpack.c.bf16 %v5416_v32, %v5416_v32  ;;  %vm3221_vm4 = vcmask 195584   ;;  %v2743_v42 = vpop.f32.mrf.mxu2  ;;  %v2777_v32 = vpop.f32.mrf.mxu3 }
 0x406   :  { %v3195_v43 = vunpack.c.l.b16 %v2656_v20  ;;  %v3196_v12 = vunpack.c.l.b16 %v2657_v56  ;;  %v2558_v33 = vadd.f32 %v2462_v16, %v2030_v39  ;;  %3222 = vst.msk [vmem:[%s5578_s6] sm:$0xff] %vm3221_vm4, %v5437_v60  ;;  %v2675_v6 = vpack.c.bf16 %v5450_v0, %v5450_v0 }
 0x407   :  { %v2559_v35 = vadd.f32 %v2463_v40, %v2031_v54  ;;  %3508 = vmatmul.msk.bf16.vlgmr.msrb.gmra.mxu2 %vm2694_vm0, %v2673_v34  ;;  %3223 = vst.msk [vmem:[%s5578_s6 + $0x8] sm:$0xff] %vm3221_vm4, %v2741_v63 }
 0x408   :  { %v3200_v48 = vpack.c.b16 %v3196_v12, %v3195_v43  ;;  %v2654_v59 = vpack.c.bf16 %v2558_v33, %v2558_v33  ;;  %3509 = vmatmul.msk.bf16.vlgmr.msrb.gmra.mxu3 %vm2694_vm0, %v2674_v58  ;;  %3224 = vst.msk [vmem:[%s5578_s6 + $0x10] sm:$0xff] %vm3221_vm4, %v2775_v26 }
 0x409   :  { %v2655_v60 = vpack.c.bf16 %v2559_v35, %v2559_v35  ;;  %3225 = vst.msk [vmem:[%s5578_s6 + $0x18] sm:$0xff] %vm3221_vm4, %v2809_v46 }
 0x40a   :  { %3214 = vmatpush.bf16.msrb.mxu1 %v3200_v48  ;;  %v3193_v8 = vunpack.c.l.b16 %v2654_v59 }
 0x40b   :  { %v3194_v18 = vunpack.c.l.b16 %v2655_v60  ;;  %v2811_v4 = vpop.f32.mrf.mxu1 }
 0x40d   :  { %v3199_v37 = vpack.c.b16 %v3194_v18, %v3193_v8  ;;  %v2843_v55 = vpop.f32.mrf.mxu2 }
 0x40e   :  { %v2877_v5 = vpop.f32.mrf.mxu3  ;;  %3226 = vst.msk [vmem:[%s5578_s6 + $0x20] sm:$0xff] %vm3221_vm4, %v2843_v55 }
 0x40f   :  { %3215 = vmatpush.bf16.msrb.mxu1 %v3199_v37  ;;  %3227 = vst.msk [vmem:[%s5578_s6 + $0x28] sm:$0xff] %vm3221_vm4, %v2877_v5 }
 0x413   :  { %v2911_v24 = vpop.f32.mrf.mxu1 }
 0x414   :  { %3228 = vst.msk [vmem:[%s5578_s6 + $0x30] sm:$0xff] %vm3221_vm4, %v2911_v24 }
 0x415   :  { %3510 = vmatmul.msk.bf16.vlgmr.msrb.gmra.mxu1 %vm2694_vm0, %v2675_v6  ;;  %v2845_v44 = vpop.f32.mrf.mxu2 }
 0x416   :  { %v2879_v49 = vpop.f32.mrf.mxu3 }
 0x41b   :  { %v2913_v57 = vpop.f32.mrf.mxu1 }
 0x41d   :  { %v2945_v9 = vpop.f32.mrf.mxu2 }
 0x41e   :  { %3229 = vst.msk [vmem:[%s5578_s6 + $0x38] sm:$0xff] %vm3221_vm4, %v2945_v9 }
 0x425   :  { %v2947_v0 = vpop.f32.mrf.mxu2 }
 0x43f   :  { %v2979_v19 = vpop.f32.mrf.mxu3 }
 0x440   :  { %3230 = vst.msk [vmem:[%s5578_s6 + $0x40] sm:$0xff] %vm3221_vm4, %v2979_v19 }
 0x447   :  { %v2981_v22 = vpop.f32.mrf.mxu3 }
 0x448   :  { %v3013_v41 = vpop.f32.mrf.mxu1 }
 0x449   :  { %3231 = vst.msk [vmem:[%s5578_s6 + $0x48] sm:$0xff] %vm3221_vm4, %v3013_v41 }
 0x450   :  { %v3015_v15 = vpop.f32.mrf.mxu1 }
 0x452   :  { %v3047_v38 = vpop.f32.mrf.mxu2 }
 0x453   :  { %3232 = vst.msk [vmem:[%s5578_s6 + $0x50] sm:$0xff] %vm3221_vm4, %v3047_v38 }
 0x45a   :  { %v3049_v3 = vpop.f32.mrf.mxu2 }
 0x45b   :  { %v3081_v13 = vpop.f32.mrf.mxu3 }
 0x45c   :  { %3233 = vst.msk [vmem:[%s5578_s6 + $0x58] sm:$0xff] %vm3221_vm4, %v3081_v13 }
 0x463   :  { %v3083_v52 = vpop.f32.mrf.mxu3 }
 0x482   :  { %v3115_v10 = vpop.f32.mrf.mxu1 }
 0x483   :  { %3234 = vst.msk [vmem:[%s5578_s6 + $0x60] sm:$0xff] %vm3221_vm4, %v3115_v10 }
 0x48a   :  { %v3117_v31 = vpop.f32.mrf.mxu1  ;;  %v3149_v21 = vpop.f32.mrf.mxu2 }
 0x48b   :  { %3235 = vst.msk [vmem:[%s5578_s6 + $0x68] sm:$0xff] %vm3221_vm4, %v3149_v21  ;;  %v3183_v14 = vpop.f32.mrf.mxu3 }
 0x48c   :  { %3236 = vst.msk [vmem:[%s5578_s6 + $0x70] sm:$0xff] %vm3221_vm4, %v3183_v14 }
 0x492   :  { %v3151_v28 = vpop.f32.mrf.mxu2  ;;  %v3217_v11 = vpop.f32.mrf.mxu1 }
 0x493   :  { %3237 = vst.msk [vmem:[%s5578_s6 + $0x78] sm:$0xff] %vm3221_vm4, %v3217_v11  ;;  %v3185_v29 = vpop.f32.mrf.mxu3 }
 0x49a   :  { %v3219_v2 = vpop.f32.mrf.mxu1 }
 0x49b   :  { %3246 = vsyncpa [#allocation3], 1 }

</bundles_post_ra>
